<compile_context>
chip_gen: v5e
topology: v5e:2x2
jax: 0.10.0
libtpu: 0.0.40
codegen_flags: <defaults>
</compile_context>

<pallas_src>
import functools

import jax
import jax.numpy as jnp
import numpy as np
from jax.experimental import pallas as pl
from jax.experimental.pallas import tpu as pltpu


def _full_attn_kernel(*refs, num_heads, head_dim, scale, has_mask):
    if has_mask:
        q_ref, k_ref, v_ref, qm_ref, km_ref, o_ref, acc_ref = refs
    else:
        q_ref, k_ref, v_ref, o_ref, acc_ref = refs

    if has_mask:
        qm = qm_ref[0]                                    # (TL, 1) f32 {0,1}
        km = km_ref[0]                                    # (1,  S) f32 {0,1}
        # Additive bias built ONCE, shared by every head: 0 where valid,
        # -inf where masked (matches masked_fill(-inf) + softmax semantics,
        # including NaN rows when q_mask is fully False).
        bias = jnp.where((qm * km) > 0.0, 0.0, -jnp.inf)  # (TL, S) f32

    for h in range(num_heads):                            # static unroll
        lo = h * head_dim
        hd = slice(lo, lo + head_dim)

        # Native-dtype MXU operands (no blanket f32 upcast); scale folded
        # into q: TL*D multiplies per head instead of TL*S on the scores.
        qh = q_ref[0, :, hd] * scale                      # (TL, D)
        kh = k_ref[0, :, hd]                              # (S,  D)
        vh = v_ref[0, :, hd]                              # (S,  D)

        s = jax.lax.dot_general(qh, kh, (((1,), (1,)), ((), ())),
                                preferred_element_type=jnp.float32)  # (TL, S)
        if has_mask:
            s = s + bias

        # Softmax over S kept in f32; normalization deferred to the (TL, D)
        # output (S/D x less VPU work than normalizing p over (TL, S)).
        m = jnp.max(s, axis=-1, keepdims=True)
        e = jnp.exp(s - m)
        denom = jnp.sum(e, axis=-1, keepdims=True)
        oh = jnp.dot(e.astype(vh.dtype), vh,
                     preferred_element_type=jnp.float32)              # (TL, D)
        oh = oh * pl.reciprocal(denom, approx=True)

        # Immediate store bounds live ranges across the unrolled head loop
        # (no outs list / concatenate -> no spills, no lane-shuffle concat).
        acc_ref[:, hd] = oh.astype(acc_ref.dtype)

    # Single lane-dense (H*D >= 128 wide) store of the full output block.
    o_ref[0] = acc_ref[...]


def _choose_l_tile(L, S):
    """Largest of (512, 256, 128) dividing L whose f32 (TL, S) softmax working
    set stays modest; otherwise pad L up to a multiple of 128."""
    for tl in (512, 256, 128):
        if L % tl == 0 and tl * S * 4 * 4 <= (12 << 20):
            return tl, 0
    if L % 128 == 0:
        return 128, 0
    return 128, (-L) % 128


def full_attention(q, k, v, q_mask=None, kv_mask=None):
    """q: [B, L, H, D], k/v: [B, S, H, D], q_mask: [B, L], kv_mask: [B, S].
    Returns [B, L, H, D] in q.dtype.

    Notes: rows with q_mask == False come out NaN (exp(-inf - -inf)), matching
    PyTorch masked_fill(-inf) + softmax; softmax denominators use the EUP
    approximate reciprocal (~1e-3 relative error)."""
    B, L, H, D = q.shape
    S = k.shape[1]
    assert k.shape == (B, S, H, D) and v.shape == (B, S, H, D)

    has_mask = kv_mask is not None
    if has_mask:
        assert q_mask is not None, "q_mask required when kv_mask is given"

    scale = 1.0 / float(D) ** 0.5
    HD = H * D

    # Free reshapes only (H, D are contiguous trailing dims): no HBM transpose
    # and no wrapper-side dtype casts.
    q2 = q.reshape(B, L, HD)
    k2 = k.reshape(B, S, HD)
    v2 = v.reshape(B, S, HD)

    TL, pad = _choose_l_tile(L, S)
    Lp = L + pad
    if pad:
        q2 = jnp.pad(q2, ((0, 0), (0, pad), (0, 0)))
    nL = Lp // TL

    in_specs = [
        pl.BlockSpec((1, TL, HD), lambda b, l: (b, l, 0)),   # q tile
        # K/V block index is constant over the inner l axis -> fetched once
        # per batch; don't regress this ordering when restructuring.
        pl.BlockSpec((1, S, HD), lambda b, l: (b, 0, 0)),    # k (full S)
        pl.BlockSpec((1, S, HD), lambda b, l: (b, 0, 0)),    # v (full S)
    ]
    args = [q2, k2, v2]
    if has_mask:
        qm = q_mask.astype(jnp.float32).reshape(B, L, 1)
        km = kv_mask.astype(jnp.float32).reshape(B, 1, S)
        if pad:
            qm = jnp.pad(qm, ((0, 0), (0, pad), (0, 0)), constant_values=1.0)
        in_specs += [
            pl.BlockSpec((1, TL, 1), lambda b, l: (b, l, 0)),   # q_mask tile
            pl.BlockSpec((1, 1, S), lambda b, l: (b, 0, 0)),    # kv_mask
        ]
        args += [qm, km]

    kernel = functools.partial(_full_attn_kernel, num_heads=H, head_dim=D,
                               scale=scale, has_mask=has_mask)

    itemsize = q.dtype.itemsize
    # Explicit VMEM budget with headroom (v7x: 64 MiB physical per TC).
    vmem_bytes = (2 * TL * HD * itemsize * 2      # q + out blocks, double-buf
                  + 2 * 2 * S * HD * itemsize     # k + v blocks, double-buf
                  + TL * HD * itemsize            # scratch slab
                  + 6 * TL * S * 4)               # f32 softmax intermediates
    vmem_limit = int(min(64 * 2 ** 20, max(32 * 2 ** 20, vmem_bytes * 5 // 4)))

    flops = 4 * B * Lp * S * H * D                # QK^T + P@V, 2 flops / MAC
    bytes_accessed = (q2.size + k2.size + v2.size + B * Lp * HD) * itemsize
    cost = pl.CostEstimate(flops=int(flops),
                           transcendentals=int(B * Lp * S * H),
                           bytes_accessed=int(bytes_accessed))

    out = pl.pallas_call(
        kernel,
        out_shape=jax.ShapeDtypeStruct((B, Lp, HD), q.dtype),
        grid=(B, nL),
        in_specs=in_specs,
        out_specs=pl.BlockSpec((1, TL, HD), lambda b, l: (b, l, 0)),
        scratch_shapes=[pltpu.VMEM((TL, HD), q.dtype)],
        compiler_params=pltpu.CompilerParams(
            dimension_semantics=("parallel", "parallel"),
            vmem_limit_bytes=vmem_limit),
        cost_estimate=cost,
    )(*args)

    if pad:
        out = out[:, :L]
    return out.reshape(B, L, H, D)


def full_attention_reference(q, k, v, q_mask=None, kv_mask=None):
    """Pure-JAX reference mirroring the PyTorch forward."""
    hi = jax.lax.Precision.HIGHEST
    qk = jnp.einsum('nlhd,nshd->nlsh', q, k, precision=hi)
    if kv_mask is not None:
        valid = q_mask[:, :, None, None] & kv_mask[:, None, :, None]
        qk = jnp.where(valid, qk, -jnp.inf)
    scale = 1.0 / float(q.shape[3]) ** 0.5
    a = jax.nn.softmax(scale * qk, axis=2)
    return jnp.einsum('nlsh,nshd->nlhd', a, v, precision=hi)


if __name__ == "__main__":
    B, L, S, H, D = 2, 128, 256, 4, 64

    key = jax.random.PRNGKey(0)
    kq, kk, kv = jax.random.split(key, 3)
    q = jax.random.normal(kq, (B, L, H, D), jnp.float32)
    k = jax.random.normal(kk, (B, S, H, D), jnp.float32)
    v = jax.random.normal(kv, (B, S, H, D), jnp.float32)

    # --- unmasked f32 path ---
    out = jax.block_until_ready(full_attention(q, k, v))
    assert out.shape == (B, L, H, D), out.shape
    ref = full_attention_reference(q, k, v)
    np.testing.assert_allclose(np.asarray(out), np.asarray(ref),
                               rtol=2e-2, atol=2e-2)

    # --- masked path (kv padding; q_mask all valid so no NaN rows) ---
    q_mask = jnp.ones((B, L), dtype=bool)
    kv_lens = jnp.array([[S], [S - 56]], dtype=jnp.int32)
    kv_mask = jnp.arange(S, dtype=jnp.int32)[None, :] < kv_lens
    out_m = jax.block_until_ready(full_attention(q, k, v, q_mask, kv_mask))
    ref_m = full_attention_reference(q, k, v, q_mask, kv_mask)
    np.testing.assert_allclose(np.asarray(out_m), np.asarray(ref_m),
                               rtol=2e-2, atol=2e-2)

    # --- L not a multiple of 128 (exercises the bounded-TL / pad path) ---
    Lo = 96
    qo = jax.random.normal(jax.random.PRNGKey(1), (B, Lo, H, D), jnp.float32)
    out_o = jax.block_until_ready(full_attention(qo, k, v))
    assert out_o.shape == (B, Lo, H, D), out_o.shape
    ref_o = full_attention_reference(qo, k, v)
    np.testing.assert_allclose(np.asarray(out_o), np.asarray(ref_o),
                               rtol=2e-2, atol=2e-2)

    # --- bf16 inputs exercise the native-dtype MXU path ---
    qb, kb, vb = (x.astype(jnp.bfloat16) for x in (q, k, v))
    out_b = jax.block_until_ready(full_attention(qb, kb, vb))
    ref_b = full_attention_reference(qb.astype(jnp.float32),
                                     kb.astype(jnp.float32),
                                     vb.astype(jnp.float32))
    np.testing.assert_allclose(np.asarray(out_b.astype(jnp.float32)),
                               np.asarray(ref_b), rtol=8e-2, atol=8e-2)

    print("KERNEL_OK")
</pallas_src>

<mosaic_0001>
module attributes {stable_mosaic.version = 11 : i64} {
  func.func @_full_attn_kernel(%arg0: i32, %arg1: i32, %arg2: memref<1x128x256xf32, #tpu.memory_space<vmem>>, %arg3: memref<1x256x256xf32, #tpu.memory_space<vmem>>, %arg4: memref<1x256x256xf32, #tpu.memory_space<vmem>>, %arg5: memref<1x128x256xf32, #tpu.memory_space<vmem>>, %arg6: memref<128x256xf32, #tpu.memory_space<vmem>>) attributes {dimension_semantics = [#tpu.dimension_semantics<parallel>, #tpu.dimension_semantics<parallel>], iteration_bounds = array<i64: 2, 1>, scalar_prefetch = 0 : i64, scratch_operands = 1 : i64, tpu.core_type = #tpu.core_type<tc>, window_params = [{transform_indices = @transform_0, window_bounds = array<i64: 1, 128, 256>}, {transform_indices = @transform_1, window_bounds = array<i64: 1, 256, 256>}, {transform_indices = @transform_2, window_bounds = array<i64: 1, 256, 256>}, {transform_indices = @transform_3, window_bounds = array<i64: 1, 128, 256>}]} {
    %c0 = arith.constant 0 : index
    %c0_0 = arith.constant 0 : index
    %c0_1 = arith.constant 0 : index
    %0 = vector.load %arg2[%c0, %c0_0, %c0_1] : memref<1x128x256xf32, #tpu.memory_space<vmem>>, vector<1x128x64xf32>
    %1 = vector.shape_cast %0 : vector<1x128x64xf32> to vector<128x64xf32>
    %cst = arith.constant 1.250000e-01 : f32
    %2 = vector.broadcast %cst : f32 to vector<128x64xf32>
    %3 = arith.mulf %1, %2 : vector<128x64xf32>
    %c0_2 = arith.constant 0 : index
    %c0_3 = arith.constant 0 : index
    %c0_4 = arith.constant 0 : index
    %4 = vector.load %arg3[%c0_2, %c0_3, %c0_4] : memref<1x256x256xf32, #tpu.memory_space<vmem>>, vector<1x256x64xf32>
    %5 = vector.shape_cast %4 : vector<1x256x64xf32> to vector<256x64xf32>
    %c0_5 = arith.constant 0 : index
    %c0_6 = arith.constant 0 : index
    %c0_7 = arith.constant 0 : index
    %6 = vector.load %arg4[%c0_5, %c0_6, %c0_7] : memref<1x256x256xf32, #tpu.memory_space<vmem>>, vector<1x256x64xf32>
    %7 = vector.shape_cast %6 : vector<1x256x64xf32> to vector<256x64xf32>
    %cst_8 = arith.constant dense<0.000000e+00> : vector<128x256xf32>
    %8 = tpu.matmul %3, %5, %cst_8 {dimension_numbers = #tpu.dot_dimension_numbers<[1], [1], [0], [0], [0, 0, 1, 0], [], []>} : vector<128x64xf32>, vector<256x64xf32>, vector<128x256xf32> -> vector<128x256xf32>
    %cst_9 = arith.constant dense<0xFF800000> : vector<128xf32>
    %9 = vector.multi_reduction <maximumf>, %8, %cst_9 [1] : vector<128x256xf32> to vector<128xf32>
    %10 = vector.shape_cast %9 : vector<128xf32> to vector<128x1xf32>
    %11 = vector.broadcast %10 : vector<128x1xf32> to vector<128x256xf32>
    %12 = arith.subf %8, %11 : vector<128x256xf32>
    %13 = math.exp %12 : vector<128x256xf32>
    %cst_10 = arith.constant dense<0.000000e+00> : vector<128xf32>
    %14 = vector.multi_reduction <add>, %13, %cst_10 [1] : vector<128x256xf32> to vector<128xf32>
    %15 = vector.shape_cast %14 : vector<128xf32> to vector<128x1xf32>
    %cst_11 = arith.constant dense<0.000000e+00> : vector<128x64xf32>
    %16 = tpu.matmul %13, %7, %cst_11 {dimension_numbers = #tpu.dot_dimension_numbers<[1], [0], [0], [1], [0, 0, 1, 1], [], []>} : vector<128x256xf32>, vector<256x64xf32>, vector<128x64xf32> -> vector<128x64xf32>
    %17 = tpu.reciprocal %15 {approx = true} : vector<128x1xf32> -> vector<128x1xf32>
    %18 = vector.broadcast %17 : vector<128x1xf32> to vector<128x64xf32>
    %19 = arith.mulf %16, %18 : vector<128x64xf32>
    %c0_12 = arith.constant 0 : index
    %c0_13 = arith.constant 0 : index
    %20 = vector.load %arg6[%c0_12, %c0_13] : memref<128x256xf32, #tpu.memory_space<vmem>>, vector<128x64xf32>
    tpu.vector_store %arg6[%c0_12, %c0_13], %19 {strides = array<i32>} : memref<128x256xf32, #tpu.memory_space<vmem>>, vector<128x64xf32>,
    %c0_14 = arith.constant 0 : index
    %c0_15 = arith.constant 0 : index
    %c64 = arith.constant 64 : index
    %21 = vector.load %arg2[%c0_14, %c0_15, %c64] : memref<1x128x256xf32, #tpu.memory_space<vmem>>, vector<1x128x64xf32>
    %22 = vector.shape_cast %21 : vector<1x128x64xf32> to vector<128x64xf32>
    %cst_16 = arith.constant 1.250000e-01 : f32
    %23 = vector.broadcast %cst_16 : f32 to vector<128x64xf32>
    %24 = arith.mulf %22, %23 : vector<128x64xf32>
    %c0_17 = arith.constant 0 : index
    %c0_18 = arith.constant 0 : index
    %c64_19 = arith.constant 64 : index
    %25 = vector.load %arg3[%c0_17, %c0_18, %c64_19] : memref<1x256x256xf32, #tpu.memory_space<vmem>>, vector<1x256x64xf32>
    %26 = vector.shape_cast %25 : vector<1x256x64xf32> to vector<256x64xf32>
    %c0_20 = arith.constant 0 : index
    %c0_21 = arith.constant 0 : index
    %c64_22 = arith.constant 64 : index
    %27 = vector.load %arg4[%c0_20, %c0_21, %c64_22] : memref<1x256x256xf32, #tpu.memory_space<vmem>>, vector<1x256x64xf32>
    %28 = vector.shape_cast %27 : vector<1x256x64xf32> to vector<256x64xf32>
    %cst_23 = arith.constant dense<0.000000e+00> : vector<128x256xf32>
    %29 = tpu.matmul %24, %26, %cst_23 {dimension_numbers = #tpu.dot_dimension_numbers<[1], [1], [0], [0], [0, 0, 1, 0], [], []>} : vector<128x64xf32>, vector<256x64xf32>, vector<128x256xf32> -> vector<128x256xf32>
    %cst_24 = arith.constant dense<0xFF800000> : vector<128xf32>
    %30 = vector.multi_reduction <maximumf>, %29, %cst_24 [1] : vector<128x256xf32> to vector<128xf32>
    %31 = vector.shape_cast %30 : vector<128xf32> to vector<128x1xf32>
    %32 = vector.broadcast %31 : vector<128x1xf32> to vector<128x256xf32>
    %33 = arith.subf %29, %32 : vector<128x256xf32>
    %34 = math.exp %33 : vector<128x256xf32>
    %cst_25 = arith.constant dense<0.000000e+00> : vector<128xf32>
    %35 = vector.multi_reduction <add>, %34, %cst_25 [1] : vector<128x256xf32> to vector<128xf32>
    %36 = vector.shape_cast %35 : vector<128xf32> to vector<128x1xf32>
    %cst_26 = arith.constant dense<0.000000e+00> : vector<128x64xf32>
    %37 = tpu.matmul %34, %28, %cst_26 {dimension_numbers = #tpu.dot_dimension_numbers<[1], [0], [0], [1], [0, 0, 1, 1], [], []>} : vector<128x256xf32>, vector<256x64xf32>, vector<128x64xf32> -> vector<128x64xf32>
    %38 = tpu.reciprocal %36 {approx = true} : vector<128x1xf32> -> vector<128x1xf32>
    %39 = vector.broadcast %38 : vector<128x1xf32> to vector<128x64xf32>
    %40 = arith.mulf %37, %39 : vector<128x64xf32>
    %c0_27 = arith.constant 0 : index
    %c64_28 = arith.constant 64 : index
    %41 = vector.load %arg6[%c0_27, %c64_28] : memref<128x256xf32, #tpu.memory_space<vmem>>, vector<128x64xf32>
    tpu.vector_store %arg6[%c0_27, %c64_28], %40 {strides = array<i32>} : memref<128x256xf32, #tpu.memory_space<vmem>>, vector<128x64xf32>,
    %c0_29 = arith.constant 0 : index
    %c0_30 = arith.constant 0 : index
    %c128 = arith.constant 128 : index
    %42 = vector.load %arg2[%c0_29, %c0_30, %c128] : memref<1x128x256xf32, #tpu.memory_space<vmem>>, vector<1x128x64xf32>
    %43 = vector.shape_cast %42 : vector<1x128x64xf32> to vector<128x64xf32>
    %cst_31 = arith.constant 1.250000e-01 : f32
    %44 = vector.broadcast %cst_31 : f32 to vector<128x64xf32>
    %45 = arith.mulf %43, %44 : vector<128x64xf32>
    %c0_32 = arith.constant 0 : index
    %c0_33 = arith.constant 0 : index
    %c128_34 = arith.constant 128 : index
    %46 = vector.load %arg3[%c0_32, %c0_33, %c128_34] : memref<1x256x256xf32, #tpu.memory_space<vmem>>, vector<1x256x64xf32>
    %47 = vector.shape_cast %46 : vector<1x256x64xf32> to vector<256x64xf32>
    %c0_35 = arith.constant 0 : index
    %c0_36 = arith.constant 0 : index
    %c128_37 = arith.constant 128 : index
    %48 = vector.load %arg4[%c0_35, %c0_36, %c128_37] : memref<1x256x256xf32, #tpu.memory_space<vmem>>, vector<1x256x64xf32>
    %49 = vector.shape_cast %48 : vector<1x256x64xf32> to vector<256x64xf32>
    %cst_38 = arith.constant dense<0.000000e+00> : vector<128x256xf32>
    %50 = tpu.matmul %45, %47, %cst_38 {dimension_numbers = #tpu.dot_dimension_numbers<[1], [1], [0], [0], [0, 0, 1, 0], [], []>} : vector<128x64xf32>, vector<256x64xf32>, vector<128x256xf32> -> vector<128x256xf32>
    %cst_39 = arith.constant dense<0xFF800000> : vector<128xf32>
    %51 = vector.multi_reduction <maximumf>, %50, %cst_39 [1] : vector<128x256xf32> to vector<128xf32>
    %52 = vector.shape_cast %51 : vector<128xf32> to vector<128x1xf32>
    %53 = vector.broadcast %52 : vector<128x1xf32> to vector<128x256xf32>
    %54 = arith.subf %50, %53 : vector<128x256xf32>
    %55 = math.exp %54 : vector<128x256xf32>
    %cst_40 = arith.constant dense<0.000000e+00> : vector<128xf32>
    %56 = vector.multi_reduction <add>, %55, %cst_40 [1] : vector<128x256xf32> to vector<128xf32>
    %57 = vector.shape_cast %56 : vector<128xf32> to vector<128x1xf32>
    %cst_41 = arith.constant dense<0.000000e+00> : vector<128x64xf32>
    %58 = tpu.matmul %55, %49, %cst_41 {dimension_numbers = #tpu.dot_dimension_numbers<[1], [0], [0], [1], [0, 0, 1, 1], [], []>} : vector<128x256xf32>, vector<256x64xf32>, vector<128x64xf32> -> vector<128x64xf32>
    %59 = tpu.reciprocal %57 {approx = true} : vector<128x1xf32> -> vector<128x1xf32>
    %60 = vector.broadcast %59 : vector<128x1xf32> to vector<128x64xf32>
    %61 = arith.mulf %58, %60 : vector<128x64xf32>
    %c0_42 = arith.constant 0 : index
    %c128_43 = arith.constant 128 : index
    %62 = vector.load %arg6[%c0_42, %c128_43] : memref<128x256xf32, #tpu.memory_space<vmem>>, vector<128x64xf32>
    tpu.vector_store %arg6[%c0_42, %c128_43], %61 {strides = array<i32>} : memref<128x256xf32, #tpu.memory_space<vmem>>, vector<128x64xf32>,
    %c0_44 = arith.constant 0 : index
    %c0_45 = arith.constant 0 : index
    %c192 = arith.constant 192 : index
    %63 = vector.load %arg2[%c0_44, %c0_45, %c192] : memref<1x128x256xf32, #tpu.memory_space<vmem>>, vector<1x128x64xf32>
    %64 = vector.shape_cast %63 : vector<1x128x64xf32> to vector<128x64xf32>
    %cst_46 = arith.constant 1.250000e-01 : f32
    %65 = vector.broadcast %cst_46 : f32 to vector<128x64xf32>
    %66 = arith.mulf %64, %65 : vector<128x64xf32>
    %c0_47 = arith.constant 0 : index
    %c0_48 = arith.constant 0 : index
    %c192_49 = arith.constant 192 : index
    %67 = vector.load %arg3[%c0_47, %c0_48, %c192_49] : memref<1x256x256xf32, #tpu.memory_space<vmem>>, vector<1x256x64xf32>
    %68 = vector.shape_cast %67 : vector<1x256x64xf32> to vector<256x64xf32>
    %c0_50 = arith.constant 0 : index
    %c0_51 = arith.constant 0 : index
    %c192_52 = arith.constant 192 : index
    %69 = vector.load %arg4[%c0_50, %c0_51, %c192_52] : memref<1x256x256xf32, #tpu.memory_space<vmem>>, vector<1x256x64xf32>
    %70 = vector.shape_cast %69 : vector<1x256x64xf32> to vector<256x64xf32>
    %cst_53 = arith.constant dense<0.000000e+00> : vector<128x256xf32>
    %71 = tpu.matmul %66, %68, %cst_53 {dimension_numbers = #tpu.dot_dimension_numbers<[1], [1], [0], [0], [0, 0, 1, 0], [], []>} : vector<128x64xf32>, vector<256x64xf32>, vector<128x256xf32> -> vector<128x256xf32>
    %cst_54 = arith.constant dense<0xFF800000> : vector<128xf32>
    %72 = vector.multi_reduction <maximumf>, %71, %cst_54 [1] : vector<128x256xf32> to vector<128xf32>
    %73 = vector.shape_cast %72 : vector<128xf32> to vector<128x1xf32>
    %74 = vector.broadcast %73 : vector<128x1xf32> to vector<128x256xf32>
    %75 = arith.subf %71, %74 : vector<128x256xf32>
    %76 = math.exp %75 : vector<128x256xf32>
    %cst_55 = arith.constant dense<0.000000e+00> : vector<128xf32>
    %77 = vector.multi_reduction <add>, %76, %cst_55 [1] : vector<128x256xf32> to vector<128xf32>
    %78 = vector.shape_cast %77 : vector<128xf32> to vector<128x1xf32>
    %cst_56 = arith.constant dense<0.000000e+00> : vector<128x64xf32>
    %79 = tpu.matmul %76, %70, %cst_56 {dimension_numbers = #tpu.dot_dimension_numbers<[1], [0], [0], [1], [0, 0, 1, 1], [], []>} : vector<128x256xf32>, vector<256x64xf32>, vector<128x64xf32> -> vector<128x64xf32>
    %80 = tpu.reciprocal %78 {approx = true} : vector<128x1xf32> -> vector<128x1xf32>
    %81 = vector.broadcast %80 : vector<128x1xf32> to vector<128x64xf32>
    %82 = arith.mulf %79, %81 : vector<128x64xf32>
    %c0_57 = arith.constant 0 : index
    %c192_58 = arith.constant 192 : index
    %83 = vector.load %arg6[%c0_57, %c192_58] : memref<128x256xf32, #tpu.memory_space<vmem>>, vector<128x64xf32>
    tpu.vector_store %arg6[%c0_57, %c192_58], %82 {strides = array<i32>} : memref<128x256xf32, #tpu.memory_space<vmem>>, vector<128x64xf32>,
    %c0_59 = arith.constant 0 : index
    %c0_60 = arith.constant 0 : index
    %84 = vector.load %arg6[%c0_59, %c0_60] : memref<128x256xf32, #tpu.memory_space<vmem>>, vector<128x256xf32>
    %c0_61 = arith.constant 0 : index
    %c0_62 = arith.constant 0 : index
    %c0_63 = arith.constant 0 : index
    %85 = vector.load %arg5[%c0_61, %c0_62, %c0_63] : memref<1x128x256xf32, #tpu.memory_space<vmem>>, vector<1x128x256xf32>
    %86 = vector.shape_cast %85 : vector<1x128x256xf32> to vector<128x256xf32>
    %87 = vector.shape_cast %84 : vector<128x256xf32> to vector<1x128x256xf32>
    tpu.vector_store %arg5[%c0_61, %c0_62, %c0_63], %87 {strides = array<i32>} : memref<1x128x256xf32, #tpu.memory_space<vmem>>, vector<1x128x256xf32>,
    return
  }
  func.func @transform_0(%arg0: i32, %arg1: i32) -> (i32, i32, i32) {
    %c0_i32 = arith.constant 0 : i32
    %c0_i32_0 = arith.constant 0 : i32
    return %arg0, %arg1, %c0_i32 : i32, i32, i32
  }
  func.func @transform_1(%arg0: i32, %arg1: i32) -> (i32, i32, i32) {
    %c0_i32 = arith.constant 0 : i32
    %c0_i32_0 = arith.constant 0 : i32
    %c0_i32_1 = arith.constant 0 : i32
    return %arg0, %c0_i32, %c0_i32_0 : i32, i32, i32
  }
  func.func @transform_2(%arg0: i32, %arg1: i32) -> (i32, i32, i32) {
    %c0_i32 = arith.constant 0 : i32
    %c0_i32_0 = arith.constant 0 : i32
    %c0_i32_1 = arith.constant 0 : i32
    return %arg0, %c0_i32, %c0_i32_0 : i32, i32, i32
  }
  func.func @transform_3(%arg0: i32, %arg1: i32) -> (i32, i32, i32) {
    %c0_i32 = arith.constant 0 : i32
    %c0_i32_0 = arith.constant 0 : i32
    return %arg0, %arg1, %c0_i32 : i32, i32, i32
  }
}

</mosaic_0001>

<bundles_post_ra>
// kernel: tpu_custom_call.1
= control target key start
LH: loop header
LB: loop body
LE: loop exit
PB: predicated region body
PF: predicated region fallthrough
CT: control target
= control target key end

     0   :  { %s8093_s0 = inlined_call_operand.hbm [shape: f32[2,128,256], index: 0, kind: input, shape index: {}]   ;;  %s8094_s1 = inlined_call_operand.hbm [shape: f32[2,256,256], index: 1, kind: input, shape index: {}]   ;;  %s8095_s2 = inlined_call_operand.hbm [shape: f32[2,256,256], index: 2, kind: input, shape index: {}]   ;;  %s8096_s3 = inlined_call_operand.hbm [shape: f32[2,128,256], index: 3, kind: output, shape index: {}]  }
   0x1   :  { %8198 = sst [smem:[#allocation62_spill]] %s8094_s1 }
   0x2   :  { %8 = vsyncpa [#allocation4], 0 }
   0x3   :  { %10 = vsyncpa [#allocation4 + $0x1], 0 }
   0x4   :  { %11 = vsyncpa [#allocation7], 0 }
   0x5   :  { %13 = vsyncpa [#allocation7 + $0x1], 0 }
   0x6   :  { %14 = vsyncpa [#allocation5], 0 }
   0x7   :  { %16 = vsyncpa [#allocation5 + $0x1], 0  ;;  %s5183_s12 = smov 0   ;;  %s5185_s13 = smov 0  }
   0x8   :  { %s5187_s14 = smov 0   ;;  %s5189_s15 = smov 0  }
   0x9   :  { %s5191_s16 = smov 0   ;;  %s5193_s17 = smov 0  }
   0xa LB: > { %8199 = sst [smem:[#allocation13_spill]] %s5144_s14  ;;  %s5214_s18 = sadd.s32 4294967295, %s5156_s17   ;;  %s5156_s17 = sphi %s5193_s17, %s22_s17   ;;  %s5152_s16 = sphi %s5191_s16, %s8444_s16   ;;  %s5148_s15 = sphi %s5189_s15, %s8443_s15   ;;  %s5144_s14 = sphi %s5187_s14, %s8439_s14   ;;  %s5140_s13 = sphi %s5185_s13, %s8442_s13   ;;  %s5136_s12 = sphi %s5183_s12, %s8441_s12  }
   0xb   : > { %s4045_s19 = sadd.s32 4294967294, %s5156_s17   ;;  %s34_s20 = sadd.s32 1, %s5152_s16 }
   0xc   : > { %s43_s21 = sadd.s32 1, %s5144_s14  ;;  %p36_p0 = scmp.ge.s32.totalorder %s34_s20, 2 }
   0xd   : > { %p50_p1 = scmp.ne.s32.totalorder %s5144_s14, %s5140_s13  ;;  %p51_p2 = scmp.eq.s32.totalorder %s5156_s17, 0 }
   0xe   : > { %p56_p3 = scmp.ne.s32.totalorder %s5140_s13, %s5136_s12  ;;  %s8446_s20 = smov (%p36_p0, %s34_s20), 0 }
   0xf   : > { %8200 = sst [smem:[#allocation14_spill]] %s8446_s20  ;;  %p5226_p4 = por %p51_p2, %p50_p1 }
  0x10   : > { %p57_p5 = scmp.eq.s32.totalorder %s5214_s18, 0  ;;  %s38_s23 = ssub.s32 %s5152_s16, %s8446_s20 }
  0x11   : > { %p134_p6 = scmp.eq.s32.totalorder %s5214_s18, 1  ;;  %p41_p7 = scmp.eq.s32.totalorder %s38_s23, 0 }
  0x12   : > { %p5234_p8 = por %p57_p5, %p56_p3  ;;  %p140_p10 = scmp.eq.s32.totalorder %s4045_s19, 1 }
  0x13   : > { %p5238_p9 = por %p134_p6, %p50_p1  ;;  %p4047_p12 = scmp.ge.s32.totalorder %s5156_s17, 2 }
  0x14   : > { %s5243_s26 = scalar_select %p41_p7, %s5144_s14, %s43_s21  }
  0x15   : > { %p5245_p11 = por %p140_p10, %p56_p3  ;;  %p4381_p13 = scmp.lt.s32.totalorder %s5156_s17, 2 }
  0x16   : > { %8204 = sst [smem:[#allocation15_spill]] %s5243_s26  ;;  %s5252_s28 = sand.u32 1, %s5144_s14  }
  0x17   : > { %p5256_p0 = pnand %p4381_p13, %p5226_p4  ;;  %s185_s30 = sand.u32 1, %s5156_s17  }
  0x18   : > { %s4051_s4 = sshll.u32 %s5252_s28, 9  ;;  %s4324_s5 = sshll.u32 %s5152_s16, 9 }
  0x19   : > { %s189_s6 = scalar_lea.vmem [#allocation6], %s4051_s4  ;;  %s8207_s1 = sld [smem:[#allocation62_spill]] }
  0x1a   : > { %s197_s7 = sshll.u32 %s189_s6, 4  ;;  %s216_s22 = scalar_lea.hbm %s8095_s2, %s4324_s5  ;;  %s198_s7 = int_to_ptr.vmem [resolvable:$true] %s197_s7 }
  0x1b   : > { %s186_s23 = scalar_lea.sflag [#allocation7], %s185_s30  ;;  %s5158_s20 = smov 256  }
  0x1c   : > { %s5159_s26 = smov 16   ;;  %s217_s6 = sshll.u32 %s216_s22, 4  ;;  %s218_s6 = int_to_ptr.hbm [resolvable:$true] %s217_s6 }
  0x1d   : > { %s211_s14 = scalar_lea.vmem [#allocation8], %s4051_s4  ;;  %p4057_p1 = scmp.ge.s32.totalorder %s5156_s17, 1 }
  0x1e   : > { %s219_s8 = sshll.u32 %s211_s14, 4  ;;  %p227_p2 = scmp.lt.s32.totalorder %s5156_s17, 3  ;;  %s220_s8 = int_to_ptr.vmem [resolvable:$true] %s219_s8 }
  0x1f   : > { %s194_s10 = scalar_lea.hbm %s8207_s1, %s4324_s5  ;;  %s4048_s9 = sshll.u32 %s5252_s28, 8 }
  0x20   : > { %s195_s11 = sshll.u32 %s194_s10, 4  ;;  %p228_p3 = pnand %p4057_p1, %p227_p2  ;;  %s196_s11 = int_to_ptr.hbm [resolvable:$true] %s195_s11 }
  0x21   : > { %4373 = dma.hbm_to_vmem [thread:$0]  (!%p5256_p0), %s196_s11, 8192, %s198_s7, %s186_s23, %s5158_s20, %s5158_s20, %s5159_s26  }
  0x22   : > { %s4323_s10 = sshll.u32 %s5152_s16, 8  ;;  %s164_s1 = scalar_lea.vmem [#allocation3], %s4048_s9 }
  0x23   : > { %s172_s30 = scalar_lea.hbm %s8093_s0, %s4323_s10  ;;  %s175_s7 = sshll.u32 %s164_s1, 4  ;;  %s176_s7 = int_to_ptr.vmem [resolvable:$true] %s175_s7 }
  0x24   : > { %s173_s21 = sshll.u32 %s172_s30, 4  ;;  %s161_s4 = scalar_lea.sflag [#allocation4], %s5252_s28  ;;  %s174_s21 = int_to_ptr.hbm [resolvable:$true] %s173_s21 }
  0x25   : > { %4370 = dma.hbm_to_vmem [thread:$0]  (!%p5256_p0), %s174_s21, 4096, %s176_s7, %s161_s4, %s5158_s20, %s5158_s20, %s5159_s26  }
  0x26   : > { %4376 = dma.hbm_to_vmem [thread:$0]  (!%p5256_p0), %s218_s6, 8192, %s220_s8, %s186_s23, %s5158_s20, %s5158_s20, %s5159_s26  }
  0x27   : > { %231 = sbr.rel (%p228_p3) target bundleno = 1986 (0x7c2), region = 32 }
  0x2c   : > { %s5284_s14 = sand.u32 1, %s5140_s13  }
  0x2d   : > { %s4058_s11 = sshll.u32 %s5284_s14, 8  ;;  %s234_s22 = scalar_lea.sflag [#allocation4], %s5284_s14 }
  0x2e   : > { %s5290_s9 = scalar_lea.vmem [#allocation3], %s4058_s11 }
  0x2f   : > { %5123 = dma.done.wait (%p5234_p8), %s234_s22, 4096  }
  0x30   : > { %5125 = vsyncadd (%p5234_p8), %s234_s22, 4294963200  ;;  %s243_s1 = sand.u32 1, %s5214_s18   ;;  %s4059_s20 = sshll.u32 %s5284_s14, 9 }
  0x31   : > { %s244_s26 = scalar_lea.sflag [#allocation7], %s243_s1  ;;  %s5300_s28 = scalar_lea.vmem [#allocation6], %s4059_s20 }
  0x32   : > { %5127 = dma.done.wait (%p5234_p8), %s244_s26, 16384  }
  0x33   : > { %5129 = vsyncadd (%p5234_p8), %s244_s26, 4294950912  ;;  %vm389_vm0 = vcmask 523264   ;;  %v1036_v0 = vld [vmem:[%s5290_s9 + $0x20] sm:$0xff]  ;;  %v1035_v1 = vld [vmem:[%s5290_s9 + $0x10] sm:$0xff]  ;;  %s5160_s18 = smov 64   ;;  %s5593_s24 = scalar_lea.vmem [#allocation8], %s4059_s20 }
  0x34   : > { %v1034_v2 = vld [vmem:[%s5290_s9] sm:$0xff]  ;;  %v5309_v3 = vmul.f32 0.125, %v1036_v0  ;;  %v5311_v4 = vmul.f32 0.125, %v1035_v1  ;;  %v5316_v6 = vld [vmem:[%s5300_s28 + $0xf0] sm:$0xff]  ;;  %vm2046_vm1 = vcmask 1048064   ;;  %s7544_s29 = scalar_lea.vmem [#allocation9], %s4058_s11 }
  0x35   : > { %v5313_v5 = vmul.f32 0.125, %v1034_v2  ;;  %v5319_v7 = vld [vmem:[%s5300_s28 + $0x1f0] sm:$0xff]  ;;  %4062 = vmatpush.xpose.msk.msra.mxu0 %vm389_vm0, %v5316_v6  ;;  %v5330_v8 = vld [vmem:[%s5300_s28 + $0xe0] sm:$0xff]  ;;  %s4326_s23 = sshll.u32 %s5148_s15, 8  ;;  %s3911_s19 = sshll.u32 %s7544_s29, 4  ;;  %s3912_s19 = int_to_ptr.vmem [resolvable:$true] %s3911_s19 }
  0x36   : > { %4094 = vmatpush.xpose.msk.msra.mxu1 %vm389_vm0, %v5319_v7  ;;  %1150 = vrot.lane.b32.xlu1 %v5309_v3, %s5160_s18  ;;  %v5333_v9 = vld [vmem:[%s5300_s28 + $0x1e0] sm:$0xff]  ;;  %v1037_v12 = vld [vmem:[%s5290_s9 + $0x30] sm:$0xff]  ;;  %s3910_s10 = scalar_lea.hbm %s8096_s3, %s4326_s23  ;;  %s3896_s30 = scalar_lea.sflag [#allocation5], %s5284_s14 }
  0x37   : > { %1148 = vrot.lane.b32.xlu0 %v5311_v4, %s5160_s18  ;;  %1146 = vrot.lane.b32.xlu2 %v5313_v5, %s5160_s18  ;;  %v1040_v10 = vld [vmem:[%s5290_s9 + $0x60] sm:$0xff]  ;;  %v5349_v15 = vld [vmem:[%s5300_s28 + $0xd0] sm:$0xff]  ;;  %v5354_v17 = vmul.f32 0.125, %v1037_v12  ;;  %s3913_s5 = sshll.u32 %s3910_s10, 4  ;;  %s5090_s11 = scalar_lea.hbm %s8096_s3, 512  ;;  %s3914_s5 = int_to_ptr.hbm [resolvable:$true] %s3913_s5 }
  0x38   : > { %v1038_v11 = vld [vmem:[%s5290_s9 + $0x40] sm:$0xff]  ;;  %v5344_v13 = vmul.f32 0.125, %v1040_v10  ;;  %v5352_v16 = vld [vmem:[%s5300_s28 + $0x1d0] sm:$0xff]  ;;  %s5084_s21 = sshra.s32 %s3914_s5, 4  ;;  %s5085_s21 = int_to_ptr.hbm [resolvable:$true] %s5084_s21 }
  0x39   : > { %4063 = vmatpush.xpose.msk.msra.mxu0 %vm389_vm0, %v5330_v8  ;;  %v5346_v14 = vmul.f32 0.125, %v1038_v11  ;;  %v5365_v18 = vld [vmem:[%s5300_s28 + $0xc0] sm:$0xff]  ;;  %v1043_v20 = vld [vmem:[%s5290_s9 + $0x90] sm:$0xff]  ;;  %s5086_s15 = scalar_lea.hbm %s5085_s21, 256  ;;  %p5091_p7 = scmp.lt.s32.totalorder %s5085_s21, %s8096_s3 }
  0x3a   : > { %4095 = vmatpush.xpose.msk.msra.mxu1 %vm389_vm0, %v5333_v9  ;;  %v5368_v19 = vld [vmem:[%s5300_s28 + $0x1c0] sm:$0xff]  ;;  %v1041_v21 = vld [vmem:[%s5290_s9 + $0x70] sm:$0xff]  ;;  %v5379_v23 = vmul.f32 0.125, %v1043_v20  ;;  %p5087_p4 = scmp.ne.s32.totalorder %s5085_s21, %s5086_s15  ;;  %p5092_p8 = scmp.lt.s32.totalorder %s5090_s11, %s5086_s15 }
  0x3b   : > { %v1039_v22 = vld [vmem:[%s5290_s9 + $0x50] sm:$0xff]  ;;  %v5381_v24 = vmul.f32 0.125, %v1041_v21  ;;  %v5400_v28 = vld [vmem:[%s5300_s28 + $0xa0] sm:$0xff] }
  0x3c   : > { %v5384_v25 = vld [vmem:[%s5300_s28 + $0xb0] sm:$0xff]  ;;  %v5389_v27 = vmul.f32 0.125, %v1039_v22  ;;  %v5403_v29 = vld [vmem:[%s5300_s28 + $0x1a0] sm:$0xff]  ;;  %p5088_p5 = pnand %p5087_p4, %p5238_p9  ;;  %p5093_p10 = por %p5092_p8, %p5091_p7 }
  0x3d   : > { %4064 = vmatpush.xpose.msk.msra.mxu0 %vm389_vm0, %v5349_v15  ;;  %v5387_v26 = vld [vmem:[%s5300_s28 + $0x1b0] sm:$0xff]  ;;  %v1046_v30 = vld [vmem:[%s5290_s9 + $0xc0] sm:$0xff] }
  0x3e   : > { %4096 = vmatpush.xpose.msk.msra.mxu1 %vm389_vm0, %v5352_v16  ;;  %1158 = vrot.lane.b32.xlu1 %v5344_v13, %s5160_s18  ;;  %v1044_v31 = vld [vmem:[%s5290_s9 + $0xa0] sm:$0xff]  ;;  %v5414_v33 = vmul.f32 0.125, %v1046_v30  ;;  %v5419_v35 = vld [vmem:[%s5300_s28 + $0x90] sm:$0xff]  ;;  %p5089_p6 = pneg %p5088_p5 }
  0x3f   : > { %1154 = vrot.lane.b32.xlu0 %v5346_v14, %s5160_s18  ;;  %1152 = vrot.lane.b32.xlu2 %v5354_v17, %s5160_s18  ;;  %v1042_v32 = vld [vmem:[%s5290_s9 + $0x80] sm:$0xff]  ;;  %v5416_v34 = vmul.f32 0.125, %v1044_v31  ;;  %v5422_v36 = vld [vmem:[%s5300_s28 + $0x190] sm:$0xff] }
  0x40   : > { %v5424_v37 = vmul.f32 0.125, %v1042_v32  ;;  %v5435_v38 = vld [vmem:[%s5300_s28 + $0x80] sm:$0xff]  ;;  %v1049_v40 = vld [vmem:[%s5290_s9 + $0xf0] sm:$0xff]  ;;  %p5094_p13 = pnand %p5093_p10, %p5089_p6 }
  0x41   : > { %4065 = vmatpush.xpose.msk.msra.mxu0 %vm389_vm0, %v5365_v18  ;;  %v5438_v39 = vld [vmem:[%s5300_s28 + $0x180] sm:$0xff]  ;;  %v1047_v41 = vld [vmem:[%s5290_s9 + $0xd0] sm:$0xff]  ;;  %v1065_v43 = vmul.f32 0.125, %v1049_v40 }
  0x42   : > { %4097 = vmatpush.xpose.msk.msra.mxu1 %vm389_vm0, %v5368_v19  ;;  %v1045_v42 = vld [vmem:[%s5290_s9 + $0xb0] sm:$0xff]  ;;  %v5449_v44 = vmul.f32 0.125, %v1047_v41  ;;  %v5467_v48 = vld [vmem:[%s5300_s28 + $0x60] sm:$0xff] }
  0x43   : > { %v5452_v45 = vld [vmem:[%s5300_s28 + $0x70] sm:$0xff]  ;;  %v5457_v47 = vmul.f32 0.125, %v1045_v42  ;;  %v5470_v49 = vld [vmem:[%s5300_s28 + $0x160] sm:$0xff] }
  0x44   : > { %v5455_v46 = vld [vmem:[%s5300_s28 + $0x170] sm:$0xff]  ;;  %v1048_v50 = vld [vmem:[%s5290_s9 + $0xe0] sm:$0xff] }
  0x45   : > { %4066 = vmatpush.xpose.msk.msra.mxu0 %vm389_vm0, %v5384_v25  ;;  %v5480_v51 = vld [vmem:[%s5300_s28 + $0x50] sm:$0xff]  ;;  %v1068_v53 = vld [vmem:[%s5300_s28 + $0x20] sm:$0xff]  ;;  %v5487_v55 = vmul.f32 0.125, %v1048_v50 }
  0x46   : > { %4098 = vmatpush.xpose.msk.msra.mxu1 %vm389_vm0, %v5387_v26  ;;  %1164 = vrot.lane.b32.xlu1 %v5379_v23, %s5160_s18  ;;  %v5483_v52 = vld [vmem:[%s5300_s28 + $0x150] sm:$0xff]  ;;  %v1066_v54 = vld [vmem:[%s5300_s28] sm:$0xff] }
  0x47   : > { %1160 = vrot.lane.b32.xlu0 %v5381_v24, %s5160_s18  ;;  %1156 = vrot.lane.b32.xlu2 %v5389_v27, %s5160_s18  ;;  %v329_v56 = vld [vmem:[%s5300_s28 + $0x40] sm:$0xff]  ;;  %v5505_v58 = vld [vmem:[%s5300_s28 + $0x130] sm:$0xff] }
  0x48   : > { %v5497_v57 = vld [vmem:[%s5300_s28 + $0x140] sm:$0xff]  ;;  %v1069_v59 = vld [vmem:[%s5300_s28 + $0x30] sm:$0xff] }
  0x49   : > { %4067 = vmatpush.xpose.msk.msra.mxu0 %vm389_vm0, %v5400_v28  ;;  %v1067_v60 = vld [vmem:[%s5300_s28 + $0x10] sm:$0xff]  ;;  %v5516_v61 = vld [vmem:[%s5300_s28 + $0x120] sm:$0xff] }
  0x4a   : > { %4099 = vmatpush.xpose.msk.msra.mxu1 %vm389_vm0, %v5403_v29  ;;  %v5523_v62 = vld [vmem:[%s5300_s28 + $0x110] sm:$0xff]  ;;  %v5533_v63 = vld [vmem:[%s5300_s28 + $0x100] sm:$0xff] }
  0x4b   : > { %v5596_v1 = vld [vmem:[%s5593_s24 + $0xf0] sm:$0xff]  ;;  %v5599_v2 = vld [vmem:[%s5593_s24 + $0xe0] sm:$0xff] }
  0x4c   : > { %856 = vmatpush.msra.mxu2 %v5596_v1  ;;  %v1108_v10 = vld [vmem:[%s5593_s24 + $0xa0] sm:$0xff]  ;;  %v5644_v11 = vld [vmem:[%s5593_s24 + $0x90] sm:$0xff] }
  0x4d   : > { %4068 = vmatpush.xpose.msk.msra.mxu0 %vm389_vm0, %v5419_v35  ;;  %v5647_v12 = vld [vmem:[%s5593_s24 + $0x1d0] sm:$0xff] }
  0x4e   : > { %4100 = vmatpush.xpose.msk.msra.mxu1 %vm389_vm0, %v5422_v36  ;;  %1170 = vrot.lane.b32.xlu1 %v5414_v33, %s5160_s18  ;;  %v5666_v20 = vld [vmem:[%s5593_s24 + $0x1b0] sm:$0xff] }
  0x4f   : > { %1166 = vrot.lane.b32.xlu0 %v5416_v34, %s5160_s18  ;;  %1162 = vrot.lane.b32.xlu2 %v5424_v37, %s5160_s18  ;;  %v5669_v22 = vld [vmem:[%s5593_s24 + $0x70] sm:$0xff] }
  0x50   : > { %857 = vmatpush.msra.mxu2 %v5599_v2  ;;  %v1123_v31 = vld [vmem:[%s5593_s24 + $0x190] sm:$0xff] }
  0x51   : > { %4069 = vmatpush.xpose.msk.msra.mxu0 %vm389_vm0, %v5435_v38  ;;  %v5717_v40 = vld [vmem:[%s5593_s24 + $0x150] sm:$0xff] }
  0x52   : > { %4101 = vmatpush.xpose.msk.msra.mxu1 %vm389_vm0, %v5438_v39 }
  0x55   : > { %4070 = vmatpush.xpose.msk.msra.mxu0 %vm389_vm0, %v5452_v45 }
  0x56   : > { %4102 = vmatpush.xpose.msk.msra.mxu1 %vm389_vm0, %v5455_v46  ;;  %1176 = vrot.lane.b32.xlu1 %v1065_v43, %s5160_s18  ;;  %v1098_v43 = vld [vmem:[%s5593_s24] sm:$0xff] }
  0x57   : > { %1172 = vrot.lane.b32.xlu0 %v5449_v44, %s5160_s18  ;;  %1168 = vrot.lane.b32.xlu2 %v5457_v47, %s5160_s18 }
  0x59   : > { %4071 = vmatpush.xpose.msk.msra.mxu0 %vm389_vm0, %v5467_v48 }
  0x5a   : > { %4103 = vmatpush.xpose.msk.msra.mxu1 %vm389_vm0, %v5470_v49 }
  0x5d   : > { %4072 = vmatpush.xpose.msk.msra.mxu0 %vm389_vm0, %v5480_v51 }
  0x5e   : > { %4104 = vmatpush.xpose.msk.msra.mxu1 %vm389_vm0, %v5483_v52  ;;  %1214 = vrot.lane.b32.xlu1 %v1068_v53, %s5160_s18 }
  0x5f   : > { %1210 = vrot.lane.b32.xlu0 %v1066_v54, %s5160_s18  ;;  %1174 = vrot.lane.b32.xlu2 %v5487_v55, %s5160_s18 }
  0x61   : > { %4073 = vmatpush.xpose.msk.msra.mxu0 %vm389_vm0, %v329_v56 }
  0x62   : > { %4105 = vmatpush.xpose.msk.msra.mxu1 %vm389_vm0, %v5497_v57 }
  0x65   : > { %4074 = vmatpush.xpose.msk.msra.mxu0 %vm389_vm0, %v1069_v59 }
  0x66   : > { %4106 = vmatpush.xpose.msk.msra.mxu1 %vm389_vm0, %v5505_v58  ;;  %1240 = vrot.lane.b32.xlu1 %v5316_v6, %s5160_s18  ;;  %v5622_v6 = vld [vmem:[%s5593_s24 + $0xd0] sm:$0xff] }
  0x67   : > { %1216 = vrot.lane.b32.xlu0 %v1069_v59, %s5160_s18  ;;  %1212 = vrot.lane.b32.xlu2 %v1067_v60, %s5160_s18  ;;  %v5763_v59 = vld [vmem:[%s5593_s24 + $0x100] sm:$0xff] }
  0x68   : > { %858 = vmatpush.msra.mxu2 %v5622_v6 }
  0x69   : > { %4075 = vmatpush.xpose.msk.msra.mxu0 %vm389_vm0, %v1068_v53 }
  0x6a   : > { %4107 = vmatpush.xpose.msk.msra.mxu1 %vm389_vm0, %v5516_v61 }
  0x6d   : > { %4076 = vmatpush.xpose.msk.msra.mxu0 %vm389_vm0, %v1067_v60 }
  0x6e   : > { %4108 = vmatpush.xpose.msk.msra.mxu1 %vm389_vm0, %v5523_v62  ;;  %1270 = vrot.lane.b32.xlu1 %v5333_v9, %s5160_s18  ;;  %v1109_v9 = vld [vmem:[%s5593_s24 + $0xb0] sm:$0xff] }
  0x6f   : > { %1272 = vrot.lane.b32.xlu0 %v5319_v7, %s5160_s18  ;;  %1218 = vrot.lane.b32.xlu2 %v329_v56, %s5160_s18  ;;  %v5628_v7 = vld [vmem:[%s5593_s24 + $0xc0] sm:$0xff]  ;;  %v4461_v32 = vpack.i.bf16 %v1109_v9, %v1108_v10  ;;  %v5755_v56 = vld [vmem:[%s5593_s24 + $0x110] sm:$0xff] }
  0x70   : > { %859 = vmatpush.msra.mxu2 %v5628_v7 }
  0x71   : > { %4077 = vmatpush.xpose.msk.msra.mxu0 %vm389_vm0, %v1066_v54 }
  0x72   : > { %4109 = vmatpush.xpose.msk.msra.mxu1 %vm389_vm0, %v5533_v63  ;;  %860 = vmatpush.msra.mxu2 %v1109_v9 }
  0x74   : > { %4078 = vmatmul.msk.f32.vlgmr.msra.gmra.mxu0 %vm389_vm0, %v5313_v5  ;;  %861 = vmatpush.msra.mxu2 %v1108_v10  ;;  %v2865_v10 = vld [vmem:[%s5300_s28 + $0x1e8] sm:$0xff] }
  0x75   : > { %4110 = vmatmul.msk.f32.vlgmr.msra.gmra.mxu1 %vm389_vm0, %v5313_v5  ;;  %v5614_v5 = vld [vmem:[%s5593_s24 + $0x1e0] sm:$0xff] }
  0x76   : > { %1234 = vrot.lane.b32.xlu1 %v5365_v18, %s5160_s18  ;;  %862 = vmatpush.msra.mxu2 %v5644_v11  ;;  %v5661_v18 = vld [vmem:[%s5593_s24 + $0x1c0] sm:$0xff] }
  0x77   : > { %1236 = vrot.lane.b32.xlu0 %v5349_v15, %s5160_s18  ;;  %1238 = vrot.lane.b32.xlu2 %v5330_v8, %s5160_s18  ;;  %v1101_v15 = vld [vmem:[%s5593_s24 + $0x30] sm:$0xff] }
  0x7c   : > { %4079 = vmatmul.msk.f32.gmra.mxu0 %vm389_vm0, %v5311_v4 }
  0x7d   : > { %4111 = vmatmul.msk.f32.gmra.mxu1 %vm389_vm0, %v5311_v4  ;;  %v5605_v4 = vld [vmem:[%s5593_s24 + $0x1f0] sm:$0xff] }
  0x7e   : > { %1264 = vrot.lane.b32.xlu1 %v5387_v26, %s5160_s18  ;;  %921 = vmatpush.msra.mxu3 %v5605_v4  ;;  %v5678_v26 = vld [vmem:[%s5593_s24 + $0x1a0] sm:$0xff] }
  0x7f   : > { %1266 = vrot.lane.b32.xlu0 %v5368_v19, %s5160_s18  ;;  %1268 = vrot.lane.b32.xlu2 %v5352_v16, %s5160_s18 }
  0x80   : > { %922 = vmatpush.msra.mxu3 %v5614_v5 }
  0x82   : > { %923 = vmatpush.msra.mxu3 %v5647_v12 }
  0x84   : > { %4080 = vmatmul.msk.f32.gmra.mxu0 %vm389_vm0, %v5309_v3  ;;  %924 = vmatpush.msra.mxu3 %v5661_v18 }
  0x85   : > { %4112 = vmatmul.msk.f32.gmra.mxu1 %vm389_vm0, %v5309_v3 }
  0x86   : > { %1228 = vrot.lane.b32.xlu1 %v5419_v35, %s5160_s18  ;;  %925 = vmatpush.msra.mxu3 %v5666_v20 }
  0x87   : > { %1230 = vrot.lane.b32.xlu0 %v5400_v28, %s5160_s18  ;;  %1232 = vrot.lane.b32.xlu2 %v5384_v25, %s5160_s18  ;;  %v5674_v25 = vld [vmem:[%s5593_s24 + $0x60] sm:$0xff]  ;;  %v1103_v28 = vld [vmem:[%s5593_s24 + $0x50] sm:$0xff] }
  0x88   : > { %926 = vmatpush.msra.mxu3 %v5678_v26  ;;  %v4451_v60 = vpack.i.bf16 %v5669_v22, %v5674_v25 }
  0x8a   : > { %927 = vmatpush.msra.mxu3 %v1123_v31 }
  0x8c   : > { %4081 = vmatmul.msk.f32.gmra.mxu0 %vm389_vm0, %v5354_v17 }
  0x8d   : > { %4113 = vmatmul.msk.f32.gmra.mxu1 %vm389_vm0, %v5354_v17  ;;  %v1106_v17 = vld [vmem:[%s5593_s24 + $0x80] sm:$0xff] }
  0x8e   : > { %1258 = vrot.lane.b32.xlu1 %v5438_v39, %s5160_s18  ;;  %863 = vmatpush.msra.mxu2 %v1106_v17  ;;  %v5708_v39 = vld [vmem:[%s5593_s24 + $0x160] sm:$0xff] }
  0x8f   : > { %1260 = vrot.lane.b32.xlu0 %v5422_v36, %s5160_s18  ;;  %1262 = vrot.lane.b32.xlu2 %v5403_v29, %s5160_s18  ;;  %v1122_v36 = vld [vmem:[%s5593_s24 + $0x180] sm:$0xff] }
  0x90   : > { %864 = vmatpush.msra.mxu2 %v5669_v22  ;;  %928 = vmatpush.msra.mxu3 %v1122_v36 }
  0x91   : > { %v5579_v0 = vpop.permute.xlu2 %1146 }
  0x92   : > { %865 = vmatpush.msra.mxu2 %v5674_v25 }
  0x94   : > { %4082 = vmatmul.msk.f32.gmra.mxu0 %vm389_vm0, %v5346_v14  ;;  %866 = vmatpush.msra.mxu2 %v1103_v28 }
  0x95   : > { %4114 = vmatmul.msk.f32.gmra.mxu1 %vm389_vm0, %v5346_v14  ;;  %v1100_v14 = vld [vmem:[%s5593_s24 + $0x20] sm:$0xff] }
  0x96   : > { %1222 = vrot.lane.b32.xlu1 %v5467_v48, %s5160_s18  ;;  %v4441_v21 = vpack.i.bf16 %v1101_v15, %v1100_v14  ;;  %v4476_v48 = vpack.i.bf16 %v5614_v5, %v5605_v4 }
  0x97   : > { %1224 = vrot.lane.b32.xlu0 %v5452_v45, %s5160_s18  ;;  %1226 = vrot.lane.b32.xlu2 %v5435_v38, %s5160_s18  ;;  %v5702_v38 = vld [vmem:[%s5593_s24 + $0x170] sm:$0xff] }
  0x98   : > { %929 = vmatpush.msra.mxu3 %v5702_v38  ;;  %v1099_v45 = vld [vmem:[%s5593_s24 + $0x10] sm:$0xff] }
  0x99   : > { %v5601_v3 = vpop.permute.xlu2 %1152  ;;  %v4436_v50 = vpack.i.bf16 %v1099_v45, %v1098_v43 }
  0x9a   : > { %8208 = vst [vmem:[#allocation16_spill] sm:$0xff] %v5601_v3  ;;  %930 = vmatpush.msra.mxu3 %v5708_v39 }
  0x9c   : > { %4083 = vmatmul.msk.f32.gmra.mxu0 %vm389_vm0, %v5389_v27  ;;  %931 = vmatpush.msra.mxu3 %v5717_v40 }
  0x9d   : > { %4115 = vmatmul.msk.f32.gmra.mxu1 %vm389_vm0, %v5389_v27  ;;  %v1102_v27 = vld [vmem:[%s5593_s24 + $0x40] sm:$0xff] }
  0x9e   : > { %1252 = vrot.lane.b32.xlu1 %v5483_v52, %s5160_s18  ;;  %v4446_v35 = vpack.i.bf16 %v1103_v28, %v1102_v27  ;;  %867 = vmatpush.msra.mxu2 %v1102_v27  ;;  %v5746_v52 = vld [vmem:[%s5593_s24 + $0x120] sm:$0xff] }
  0x9f   : > { %1254 = vrot.lane.b32.xlu0 %v5470_v49, %s5160_s18  ;;  %1256 = vrot.lane.b32.xlu2 %v5455_v46, %s5160_s18  ;;  %v5729_v46 = vld [vmem:[%s5593_s24 + $0x140] sm:$0xff]  ;;  %v4456_v49 = vpack.i.bf16 %v5644_v11, %v1106_v17 }
  0xa0   : > { %868 = vmatpush.msra.mxu2 %v1101_v15  ;;  %932 = vmatpush.msra.mxu3 %v5729_v46  ;;  %v2864_v15 = vld [vmem:[%s5300_s28 + $0x1d8] sm:$0xff] }
  0xa1   : > { %v5630_v8 = vpop.permute.xlu2 %1156 }
  0xa2   : > { %8209 = vst [vmem:[#allocation17_spill] sm:$0xff] %v5630_v8  ;;  %869 = vmatpush.msra.mxu2 %v1100_v14 }
  0xa4   : > { %4084 = vmatmul.msk.f32.gmra.mxu0 %vm389_vm0, %v5344_v13  ;;  %870 = vmatpush.msra.mxu2 %v1099_v45 }
  0xa5   : > { %4116 = vmatmul.msk.f32.gmra.mxu1 %vm389_vm0, %v5344_v13 }
  0xa6   : > { %1246 = vrot.lane.b32.xlu1 %v5516_v61, %s5160_s18  ;;  %871 = vmatpush.msra.mxu2 %v1098_v43 }
  0xa7   : > { %1250 = vrot.lane.b32.xlu0 %v5497_v57, %s5160_s18  ;;  %1220 = vrot.lane.b32.xlu2 %v5480_v51, %s5160_s18  ;;  %v5737_v51 = vld [vmem:[%s5593_s24 + $0x130] sm:$0xff] }
  0xa8   : > { %v5654_v13 = vpop.permute.xlu1 %1150  ;;  %933 = vmatpush.msra.mxu3 %v5737_v51  ;;  %v4506_v25 = vpack.i.bf16 %v5746_v52, %v5737_v51 }
  0xa9   : > { %8210 = vst [vmem:[#allocation18_spill] sm:$0xff] %v5654_v13  ;;  %v5656_v16 = vpop.permute.xlu0 %1148  ;;  %v5663_v19 = vpop.permute.xlu2 %1162 }
  0xaa   : > { %8211 = vst [vmem:[#allocation19_spill] sm:$0xff] %v5663_v19  ;;  %934 = vmatpush.msra.mxu3 %v5746_v52 }
  0xac   : > { %4085 = vmatmul.msk.f32.gmra.mxu0 %vm389_vm0, %v5381_v24  ;;  %935 = vmatpush.msra.mxu3 %v5755_v56 }
  0xad   : > { %4117 = vmatmul.msk.f32.gmra.mxu1 %vm389_vm0, %v5381_v24 }
  0xae   : > { %4442 = vrot.lane.b32.xlu1 %v4441_v21, %s5160_s18  ;;  %936 = vmatpush.msra.mxu3 %v5763_v59 }
  0xaf   : > { %1244 = vrot.lane.b32.xlu0 %v5523_v62, %s5160_s18  ;;  %1248 = vrot.lane.b32.xlu2 %v5505_v58, %s5160_s18  ;;  %v4471_v58 = vpack.i.bf16 %v5596_v1, %v5599_v2  ;;  %v4486_v1 = vpack.i.bf16 %v5678_v26, %v5666_v20  ;;  %v2866_v2 = vld [vmem:[%s5300_s28 + $0x1f8] sm:$0xff]  ;;  %v4501_v20 = vpack.i.bf16 %v5729_v46, %v5717_v40 }
  0xb0   : > { %v5693_v29 = vpop.permute.xlu1 %1158 }
  0xb1   : > { %8212 = vst [vmem:[#allocation20_spill] sm:$0xff] %v5693_v29  ;;  %v5695_v30 = vpop.permute.xlu0 %1154  ;;  %v5698_v24 = vpop.permute.xlu2 %1168 }
  0xb2   : > { %8213 = vst [vmem:[#allocation21_spill] sm:$0xff] %v5695_v30 }
  0xb3   : > { %8214 = vst [vmem:[#allocation22_spill] sm:$0xff] %v5698_v24 }
  0xb4   : > { %4086 = vmatmul.msk.f32.gmra.mxu0 %vm389_vm0, %v5424_v37 }
  0xb5   : > { %4118 = vmatmul.msk.f32.gmra.mxu1 %vm389_vm0, %v5424_v37 }
  0xb6   : > { %4462 = vrot.lane.b32.xlu1 %v4461_v32, %s5160_s18 }
  0xb7   : > { %4447 = vrot.lane.b32.xlu0 %v4446_v35, %s5160_s18  ;;  %1242 = vrot.lane.b32.xlu2 %v5533_v63, %s5160_s18 }
  0xb8   : > { %v5719_v41 = vpop.permute.xlu1 %1164 }
  0xb9   : > { %8215 = vst [vmem:[#allocation23_spill] sm:$0xff] %v5719_v41  ;;  %v5721_v42 = vpop.permute.xlu0 %1160  ;;  %v5726_v37 = vpop.permute.xlu2 %1174 }
  0xba   : > { %8216 = vst [vmem:[#allocation24_spill] sm:$0xff] %v5721_v42 }
  0xbb   : > { %8217 = vst [vmem:[#allocation25_spill] sm:$0xff] %v5726_v37 }
  0xbc   : > { %4087 = vmatmul.msk.f32.gmra.mxu0 %vm389_vm0, %v5379_v23 }
  0xbd   : > { %4119 = vmatmul.msk.f32.gmra.mxu1 %vm389_vm0, %v5379_v23  ;;  %v4491_v23 = vpack.i.bf16 %v1122_v36, %v1123_v31 }
  0xbe   : > { %4477 = vrot.lane.b32.xlu1 %v4476_v48, %s5160_s18 }
  0xbf   : > { %4457 = vrot.lane.b32.xlu0 %v4456_v49, %s5160_s18  ;;  %4437 = vrot.lane.b32.xlu2 %v4436_v50, %s5160_s18 }
  0xc0   : > { %v5750_v53 = vpop.permute.xlu1 %1170 }
  0xc1   : > { %8218 = vst [vmem:[#allocation26_spill] sm:$0xff] %v5750_v53  ;;  %v5752_v54 = vpop.permute.xlu0 %1166  ;;  %v5757_v57 = vpop.permute.xlu2 %1212 }
  0xc2   : > { %8219 = vst [vmem:[#allocation27_spill] sm:$0xff] %v5752_v54 }
  0xc4   : > { %4088 = vmatmul.msk.f32.gmra.mxu0 %vm389_vm0, %v5416_v34 }
  0xc5   : > { %4120 = vmatmul.msk.f32.gmra.mxu1 %vm389_vm0, %v5416_v34  ;;  %v4466_v34 = vpack.i.bf16 %v5622_v6, %v5628_v7  ;;  %v2850_v6 = vld [vmem:[%s5300_s28 + $0xf8] sm:$0xff]  ;;  %v4481_v7 = vpack.i.bf16 %v5661_v18, %v5647_v12  ;;  %v4496_v12 = vpack.i.bf16 %v5708_v39, %v5702_v38 }
  0xc6   : > { %4492 = vrot.lane.b32.xlu1 %v4491_v23, %s5160_s18 }
  0xc7   : > { %4472 = vrot.lane.b32.xlu0 %v4471_v58, %s5160_s18  ;;  %4452 = vrot.lane.b32.xlu2 %v4451_v60, %s5160_s18 }
  0xc8   : > { %v5776_v61 = vpop.permute.xlu1 %1176 }
  0xc9   : > { %8220 = vst [vmem:[#allocation28_spill] sm:$0xff] %v5776_v61  ;;  %v5778_v62 = vpop.permute.xlu0 %1172  ;;  %v5780_v63 = vpop.permute.xlu2 %1218 }
  0xca   : > { %8221 = vst [vmem:[#allocation29_spill] sm:$0xff] %v5778_v62  ;;  %v6106_v62 = vld [vmem:[%s5300_s28 + $0x58] sm:$0xff] }
  0xcc   : > { %4089 = vmatmul.msk.f32.gmra.mxu0 %vm389_vm0, %v5457_v47 }
  0xcd   : > { %4121 = vmatmul.msk.f32.gmra.mxu1 %vm389_vm0, %v5457_v47 }
  0xce   : > { %3041 = vrot.lane.b32.xlu1 %v2866_v2, %s5160_s18 }
  0xcf   : > { %4487 = vrot.lane.b32.xlu0 %v4486_v1, %s5160_s18  ;;  %4467 = vrot.lane.b32.xlu2 %v4466_v34, %s5160_s18 }
  0xd0   : > { %v5794_v4 = vpop.permute.xlu1 %1214 }
  0xd1   : > { %v5796_v5 = vpop.permute.xlu0 %1210  ;;  %v1239_v9 = vpop.permute.xlu2 %1238 }
  0xd4   : > { %4090 = vmatmul.msk.f32.gmra.mxu0 %vm389_vm0, %v5414_v33 }
  0xd5   : > { %4122 = vmatmul.msk.f32.gmra.mxu1 %vm389_vm0, %v5414_v33 }
  0xd6   : > { %3039 = vrot.lane.b32.xlu1 %v2865_v10, %s5160_s18 }
  0xd7   : > { %3009 = vrot.lane.b32.xlu0 %v2850_v6, %s5160_s18  ;;  %4482 = vrot.lane.b32.xlu2 %v4481_v7, %s5160_s18 }
  0xd8   : > { %v1241_v47 = vpop.permute.xlu1 %1240 }
  0xd9   : > { %v5809_v11 = vpop.permute.xlu0 %1216  ;;  %4126 = vmatpush.xpose.msk.msrb.mxu2 %vm389_vm0, %v1241_v47  ;;  %v1269_v14 = vpop.permute.xlu2 %1268 }
  0xdc   : > { %4091 = vmatmul.msk.f32.gmra.mxu0 %vm389_vm0, %v5449_v44 }
  0xdd   : > { %4127 = vmatpush.xpose.msk.msrb.mxu2 %vm389_vm0, %v1239_v9  ;;  %4123 = vmatmul.msk.f32.gmra.mxu1 %vm389_vm0, %v5449_v44 }
  0xde   : > { %3037 = vrot.lane.b32.xlu1 %v2864_v15, %s5160_s18 }
  0xdf   : > { %4497 = vrot.lane.b32.xlu2 %v4496_v12, %s5160_s18 }
  0xe0   : > { %v1271_v33 = vpop.permute.xlu1 %1270 }
  0xe1   : > { %v1273_v17 = vpop.permute.xlu0 %1272  ;;  %v1233_v18 = vpop.permute.xlu2 %1232 }
  0xe2   : > { %4158 = vmatpush.xpose.msk.msrb.mxu3 %vm389_vm0, %v1273_v17 }
  0xe4   : > { %4092 = vmatmul.msk.f32.gmra.mxu0 %vm389_vm0, %v5487_v55 }
  0xe5   : > { %4124 = vmatmul.msk.f32.gmra.mxu1 %vm389_vm0, %v5487_v55 }
  0xe6   : > { %4159 = vmatpush.xpose.msk.msrb.mxu3 %vm389_vm0, %v1271_v33  ;;  %v5890_v33 = vld [vmem:[%s5300_s28 + $0xe8] sm:$0xff] }
  0xe7   : > { %4502 = vrot.lane.b32.xlu2 %v4501_v20, %s5160_s18 }
  0xe8   : > { %v1235_v44 = vpop.permute.xlu1 %1234 }
  0xe9   : > { %v1237_v21 = vpop.permute.xlu0 %1236  ;;  %v1263_v22 = vpop.permute.xlu2 %1262 }
  0xea   : > { %4128 = vmatpush.xpose.msk.msrb.mxu2 %vm389_vm0, %v1237_v21  ;;  %4160 = vmatpush.xpose.msk.msrb.mxu3 %vm389_vm0, %v1269_v14 }
  0xee   : > { %4129 = vmatpush.xpose.msk.msrb.mxu2 %vm389_vm0, %v1235_v44  ;;  %v5907_v44 = vld [vmem:[%s5300_s28 + $0xd8] sm:$0xff] }
  0xef   : > { %4507 = vrot.lane.b32.xlu2 %v4506_v25, %s5160_s18 }
  0xf0   : > { %v1265_v26 = vpop.permute.xlu1 %1264 }
  0xf1   : > { %v1267_v27 = vpop.permute.xlu0 %1266  ;;  %v5838_v55 = vpop.f32.mrf.mxu0 }
  0xf2   : > { %4161 = vmatpush.xpose.msk.msrb.mxu3 %vm389_vm0, %v1267_v27  ;;  %v5840_v28 = vpop.f32.mrf.mxu1  ;;  %4130 = vmatpush.xpose.msk.msrb.mxu2 %vm389_vm0, %v1233_v18  ;;  %v1227_v31 = vpop.permute.xlu2 %1226  ;;  %v5930_v27 = vld [vmem:[%s5300_s28 + $0xa8] sm:$0xff] }
  0xf3   : > { %v664_v40 = vmax.f32 %v5838_v55, %v5840_v28 }
  0xf6   : > { %4162 = vmatpush.xpose.msk.msrb.mxu3 %vm389_vm0, %v1265_v26  ;;  %v5924_v26 = vld [vmem:[%s5300_s28 + $0xc8] sm:$0xff] }
  0xf8   : > { %v1229_v32 = vpop.permute.xlu1 %1228 }
  0xf9   : > { %v1231_v35 = vpop.permute.xlu0 %1230  ;;  %v5845_v36 = vpop.f32.mrf.mxu0 }
  0xfa   : > { %4131 = vmatpush.xpose.msk.msrb.mxu2 %vm389_vm0, %v1231_v35  ;;  %v5847_v38 = vpop.f32.mrf.mxu1  ;;  %4163 = vmatpush.xpose.msk.msrb.mxu3 %vm389_vm0, %v1263_v22  ;;  %v1257_v39 = vpop.permute.xlu2 %1256  ;;  %v5935_v35 = vld [vmem:[%s5300_s28 + $0x1b8] sm:$0xff] }
  0xfb   : > { %v667_v51 = vmax.f32 %v5845_v36, %v5847_v38 }
  0xfe   : > { %4132 = vmatpush.xpose.msk.msrb.mxu2 %vm389_vm0, %v1229_v32 }
 0x100   : > { %v1259_v43 = vpop.permute.xlu1 %1258 }
 0x101   : > { %v1261_v45 = vpop.permute.xlu0 %1260  ;;  %665 = vmax.xlane.f32.xlu0 %v664_v40  ;;  %v5854_v46 = vpop.f32.mrf.mxu0 }
 0x102   : > { %4164 = vmatpush.xpose.msk.msrb.mxu3 %vm389_vm0, %v1261_v45  ;;  %v5856_v48 = vpop.f32.mrf.mxu1  ;;  %4133 = vmatpush.xpose.msk.msrb.mxu2 %vm389_vm0, %v1227_v31  ;;  %v1221_v49 = vpop.permute.xlu2 %1220  ;;  %v4511_v45 = vpack.i.bf16 %v5763_v59, %v5755_v56 }
 0x103   : > { %v670_v50 = vmax.f32 %v5854_v46, %v5856_v48 }
 0x106   : > { %4165 = vmatpush.xpose.msk.msrb.mxu3 %vm389_vm0, %v1259_v43 }
 0x108   : > { %v1223_v52 = vpop.permute.xlu1 %1222  ;;  %671 = vmax.xlane.f32.xlu1 %v670_v50 }
 0x109   : > { %v1225_v23 = vpop.permute.xlu0 %1224  ;;  %668 = vmax.xlane.f32.xlu0 %v667_v51  ;;  %v5865_v58 = vpop.f32.mrf.mxu0 }
 0x10a   : > { %4134 = vmatpush.xpose.msk.msrb.mxu2 %vm389_vm0, %v1225_v23  ;;  %v5867_v60 = vpop.f32.mrf.mxu1  ;;  %4166 = vmatpush.xpose.msk.msrb.mxu3 %vm389_vm0, %v1257_v39  ;;  %v1249_v1 = vpop.permute.xlu2 %1248 }
 0x10b   : > { %v673_v2 = vmax.f32 %v5865_v58, %v5867_v60 }
 0x10e   : > { %4135 = vmatpush.xpose.msk.msrb.mxu2 %vm389_vm0, %v1223_v52 }
 0x110   : > { %v1253_v34 = vpop.permute.xlu1 %1252  ;;  %674 = vmax.xlane.f32.xlu1 %v673_v2 }
 0x111   : > { %v1255_v9 = vpop.permute.xlu0 %1254  ;;  %v5875_v10 = vpop.f32.mrf.mxu0 }
 0x112   : > { %4136 = vmatpush.xpose.msk.msrb.mxu2 %vm389_vm0, %v1221_v49  ;;  %4167 = vmatpush.xpose.msk.msrb.mxu3 %vm389_vm0, %v1255_v9  ;;  %v5877_v6 = vpop.f32.mrf.mxu1  ;;  %v1243_v7 = vpop.permute.xlu2 %1242 }
 0x113   : > { %v676_v47 = vmax.f32 %v5875_v10, %v5877_v6 }
 0x116   : > { %4137 = vmatpush.xpose.msk.msrb.mxu2 %vm389_vm0, %v5780_v63  ;;  %4168 = vmatpush.xpose.msk.msrb.mxu3 %vm389_vm0, %v1253_v34 }
 0x118   : > { %677 = vmax.xlane.f32.xlu2 %v676_v47  ;;  %v1247_v14 = vpop.permute.xlu1 %1246 }
 0x119   : > { %v1251_v15 = vpop.permute.xlu0 %1250  ;;  %v5892_v17 = vpop.f32.mrf.mxu0 }
 0x11a   : > { %4138 = vmatpush.xpose.msk.msrb.mxu2 %vm389_vm0, %v5809_v11  ;;  %4169 = vmatpush.xpose.msk.msrb.mxu3 %vm389_vm0, %v1251_v15  ;;  %v5887_v12 = vpop.f32.mrf.mxu1  ;;  %v5894_v18 = vpop.permute.xlu2 %4437 }
 0x11b   : > { %v679_v63 = vmax.f32 %v5892_v17, %v5887_v12 }
 0x11d   : > { %3007 = vrot.lane.b32.xlu0 %v5890_v33, %s5160_s18 }
 0x11e   : > { %4139 = vmatpush.xpose.msk.msrb.mxu2 %vm389_vm0, %v5794_v4  ;;  %4170 = vmatpush.xpose.msk.msrb.mxu3 %vm389_vm0, %v1249_v1  ;;  %v5919_v4 = vld [vmem:[%s5300_s28 + $0x1c8] sm:$0xff]  ;;  %v5943_v1 = vld [vmem:[%s5300_s28 + $0xb8] sm:$0xff] }
 0x120   : > { %680 = vmax.xlane.f32.xlu2 %v679_v63  ;;  %v5903_v11 = vpop.permute.xlu1 %4442 }
 0x121   : > { %v1245_v20 = vpop.permute.xlu0 %1244 }
 0x122   : > { %4171 = vmatpush.xpose.msk.msrb.mxu3 %vm389_vm0, %v1247_v14  ;;  %4140 = vmatpush.xpose.msk.msrb.mxu2 %vm389_vm0, %v5757_v57  ;;  %v5911_v21 = vpop.permute.xlu2 %4452 }
 0x125   : > { %3005 = vrot.lane.b32.xlu0 %v5907_v44, %s5160_s18 }
 0x126   : > { %4141 = vmatpush.xpose.msk.msrb.mxu2 %vm389_vm0, %v5796_v5  ;;  %4172 = vmatpush.xpose.msk.msrb.mxu3 %vm389_vm0, %v1245_v20 }
 0x128   : > { %v4463_v22 = vpop.permute.xlu1 %4462 }
 0x129   : > { %v4448_v25 = vpop.permute.xlu0 %4447  ;;  %3035 = vrot.lane.b32.xlu1 %v5919_v4, %s5160_s18  ;;  %v4465_v59 = vunpack.i.h.bf16 %v4463_v22  ;;  %v4464_v47 = vunpack.i.l.bf16 %v4463_v22 }
 0x12a   : > { %4173 = vmatpush.xpose.msk.msrb.mxu3 %vm389_vm0, %v1243_v7  ;;  %v4468_v57 = vpop.permute.xlu2 %4467  ;;  %v4450_v22 = vunpack.i.h.bf16 %v4448_v25 }
 0x12b   : > { %v4470_v23 = vunpack.i.h.bf16 %v4468_v57  ;;  %v4469_v2 = vunpack.i.l.bf16 %v4468_v57  ;;  %v4455_v57 = vunpack.i.h.bf16 %v5911_v21 }
 0x12d   : > { %3003 = vrot.lane.b32.xlu0 %v5924_v26, %s5160_s18 }
 0x130   : > { %v4478_v5 = vpop.permute.xlu1 %4477 }
 0x131   : > { %v4458_v31 = vpop.permute.xlu0 %4457  ;;  %2999 = vrot.lane.b32.xlu1 %v5930_v27, %s5160_s18  ;;  %v4479_v32 = vunpack.i.l.bf16 %v4478_v5  ;;  %v4480_v40 = vunpack.i.h.bf16 %v4478_v5  ;;  %v4454_v5 = vunpack.i.l.bf16 %v5911_v21 }
 0x132   : > { %v4483_v39 = vpop.permute.xlu2 %4482  ;;  %v4460_v14 = vunpack.i.h.bf16 %v4458_v31  ;;  %v4459_v63 = vunpack.i.l.bf16 %v4458_v31  ;;  %v4445_v31 = vunpack.i.h.bf16 %v5903_v11 }
 0x133   : > { %1885 = vmatpush.msrb.mxu1 %v4479_v32  ;;  %v4484_v43 = vunpack.i.l.bf16 %v4483_v39  ;;  %v4485_v49 = vunpack.i.h.bf16 %v4483_v39  ;;  %v5949_v32 = vpop.f32.mrf.mxu0  ;;  %v5951_v39 = vpop.f32.mrf.mxu1 }
 0x135   : > { %3033 = vrot.lane.b32.xlu0 %v5935_v35, %s5160_s18  ;;  %1886 = vmatpush.msrb.mxu1 %v4480_v40  ;;  %v4449_v40 = vunpack.i.l.bf16 %v4448_v25  ;;  %v682_v25 = vmax.f32 %v5949_v32, %v5951_v39 }
 0x137   : > { %1887 = vmatpush.msrb.mxu1 %v4484_v43  ;;  %v4444_v43 = vunpack.i.l.bf16 %v5903_v11 }
 0x138   : > { %4512 = vrot.lane.b32.xlu2 %v4511_v45, %s5160_s18  ;;  %v4493_v7 = vpop.permute.xlu1 %4492 }
 0x139   : > { %v4473_v50 = vpop.permute.xlu0 %4472  ;;  %1888 = vmatpush.msrb.mxu1 %v4485_v49  ;;  %v4494_v15 = vunpack.i.l.bf16 %v4493_v7  ;;  %v4495_v20 = vunpack.i.h.bf16 %v4493_v7 }
 0x13a   : > { %v4475_v51 = vunpack.i.h.bf16 %v4473_v50  ;;  %v4474_v52 = vunpack.i.l.bf16 %v4473_v50 }
 0x13b   : > { %v5955_v45 = vpop.f32.mrf.mxu0  ;;  %v5957_v21 = vpop.f32.mrf.mxu1 }
 0x13c   : > { %1820 = vmatpush.msrb.mxu0 %v4475_v51  ;;  %v685_v49 = vmax.f32 %v5955_v45, %v5957_v21 }
 0x13e   : > { %1821 = vmatpush.msrb.mxu0 %v4474_v52 }
 0x140   : > { %1822 = vmatpush.msrb.mxu0 %v4470_v23  ;;  %3001 = vrot.lane.b32.xlu2 %v5943_v1, %s5160_s18  ;;  %v5963_v50 = vpop.permute.xlu1 %3041 }
 0x141   : > { %v4488_v56 = vpop.permute.xlu0 %4487 }
 0x142   : > { %1823 = vmatpush.msrb.mxu0 %v4469_v2  ;;  %v4489_v34 = vunpack.i.l.bf16 %v4488_v56  ;;  %v4490_v9 = vunpack.i.h.bf16 %v4488_v56  ;;  %v5975_v56 = vpop.permute.xlu2 %4497 }
 0x143   : > { %v5965_v51 = vpop.f32.mrf.mxu0  ;;  %v5967_v11 = vpop.f32.mrf.mxu1 }
 0x144   : > { %1824 = vmatpush.msrb.mxu0 %v4465_v59  ;;  %1889 = vmatpush.msrb.mxu1 %v4489_v34  ;;  %v688_v52 = vmax.f32 %v5965_v51, %v5967_v11  ;;  %v5978_v59 = vld [vmem:[%s5300_s28 + $0x98] sm:$0xff] }
 0x145   : > { %v5981_v34 = vld [vmem:[%s5300_s28 + $0x198] sm:$0xff] }
 0x146   : > { %1825 = vmatpush.msrb.mxu0 %v4464_v47  ;;  %1890 = vmatpush.msrb.mxu1 %v4490_v9 }
 0x148   : > { %1826 = vmatpush.msrb.mxu0 %v4460_v14  ;;  %1891 = vmatpush.msrb.mxu1 %v4494_v15  ;;  %v5971_v23 = vpop.permute.xlu1 %3039 }
 0x149   : > { %v5973_v2 = vpop.permute.xlu0 %3009 }
 0x14a   : > { %1827 = vmatpush.msrb.mxu0 %v4459_v63  ;;  %1892 = vmatpush.msrb.mxu1 %v4495_v20  ;;  %v5991_v20 = vpop.permute.xlu2 %4502 }
 0x14c   : > { %1828 = vmatpush.msrb.mxu0 %v4455_v57  ;;  %v5994_v57 = vld [vmem:[%s5300_s28 + $0x188] sm:$0xff] }
 0x14e   : > { %1829 = vmatpush.msrb.mxu0 %v4454_v5  ;;  %v5997_v5 = vld [vmem:[%s5300_s28 + $0x78] sm:$0xff] }
 0x150   : > { %1830 = vmatpush.msrb.mxu0 %v4450_v22  ;;  %v5985_v9 = vpop.permute.xlu1 %3037 }
 0x152   : > { %1831 = vmatpush.msrb.mxu0 %v4449_v40 }
 0x154   : > { %1832 = vmatpush.msrb.mxu0 %v4445_v31 }
 0x156   : > { %1833 = vmatpush.msrb.mxu0 %v4444_v43 }
 0x15b   : > { %686 = vmax.xlane.f32.xlu1 %v685_v49 }
 0x15f   : > { %683 = vmax.xlane.f32.xlu0 %v682_v25  ;;  %v6009_v25 = vld [vmem:[%s5300_s28 + $0x1a8] sm:$0xff] }
 0x169   : > { %689 = vmax.xlane.f32.xlu2 %v688_v52 }
 0x173   : > { %2997 = vrot.lane.b32.xlu0 %v5978_v59, %s5160_s18 }
 0x174   : > { %v666_v7 = vpop.xlane.xlu0 %665  ;;  %3029 = vrot.lane.b32.xlu1 %v5981_v34, %s5160_s18 }
 0x175   : > { %v712_v47 = vsub.f32 %v5838_v55, %v666_v7  ;;  %v713_v14 = vsub.f32 %v5840_v28, %v666_v7  ;;  %v4440_v28 = vunpack.i.h.bf16 %v5894_v18 }
 0x177   : > { %v744_v15 = vmul.f32 1.442695, %v712_v47  ;;  %v746_v63 = vmul.f32 1.442695, %v713_v14  ;;  %1834 = vmatpush.msrb.mxu0 %v4440_v28 }
 0x179   : > { %4596 = vpow2.f32 %v744_v15 }
 0x17a   : > { %4598 = vpow2.f32 %v746_v63 }
 0x17b   : > { %3027 = vrot.lane.b32.xlu0 %v5994_v57, %s5160_s18  ;;  %v672_v22 = vpop.xlane.xlu1 %671 }
 0x17c   : > { %v669_v55 = vpop.xlane.xlu0 %668  ;;  %v716_v43 = vsub.f32 %v5854_v46, %v672_v22  ;;  %v717_v49 = vsub.f32 %v5856_v48, %v672_v22  ;;  %2993 = vrot.lane.b32.xlu1 %v5997_v5, %s5160_s18  ;;  %v6016_v46 = vpop.permute.xlu2 %4507 }
 0x17d   : > { %v714_v40 = vsub.f32 %v5845_v36, %v669_v55  ;;  %v715_v31 = vsub.f32 %v5847_v38, %v669_v55  ;;  %v4439_v36 = vunpack.i.l.bf16 %v5894_v18 }
 0x17e   : > { %v752_v14 = vmul.f32 1.442695, %v716_v43  ;;  %v754_v63 = vmul.f32 1.442695, %v717_v49 }
 0x17f   : > { %v4597_v52 = vpop.eup %4596  ;;  %v748_v7 = vmul.f32 1.442695, %v714_v40  ;;  %v750_v47 = vmul.f32 1.442695, %v715_v31  ;;  %1835 = vmatpush.msrb.mxu0 %v4439_v36  ;;  %v6021_v31 = vld [vmem:[%s5300_s28 + $0x88] sm:$0xff] }
 0x180   : > { %v4599_v15 = vpop.eup %4598  ;;  %872 = vmatmul.f32.vlgmr.msra.gmra.mxu2 %v4597_v52 }
 0x181   : > { %4600 = vpow2.f32 %v748_v7  ;;  %937 = vmatmul.f32.vlgmr.msra.gmra.mxu3 %v4599_v15  ;;  %v6012_v38 = vadd.f32 %v4599_v15, %v4597_v52  ;;  %3031 = vrot.lane.b32.xlu2 %v6009_v25, %s5160_s18  ;;  %v308_v52 = vld [vmem:[%s5290_s9 + $0xf0] sm:$0xff] }
 0x182   : > { %4602 = vpow2.f32 %v750_v47 }
 0x183   : > { %4604 = vpow2.f32 %v752_v14  ;;  %v675_v48 = vpop.xlane.xlu1 %674 }
 0x184   : > { %4606 = vpow2.f32 %v754_v63  ;;  %v718_v55 = vsub.f32 %v5865_v58, %v675_v48  ;;  %v719_v22 = vsub.f32 %v5867_v60, %v675_v48  ;;  %v324_v58 = vmul.f32 0.125, %v308_v52  ;;  %v6038_v52 = vpop.f32.mrf.mxu1 }
 0x186   : > { %v756_v40 = vmul.f32 1.442695, %v718_v55  ;;  %v758_v18 = vmul.f32 1.442695, %v719_v22  ;;  %4093 = vmatmul.msk.f32.gmra.mxu0 %vm389_vm0, %v324_v58  ;;  %4125 = vmatmul.msk.f32.gmra.mxu1 %vm389_vm0, %v324_v58 }
 0x187   : > { %v4601_v28 = vpop.eup %4600 }
 0x188   : > { %v4603_v43 = vpop.eup %4602  ;;  %875 = vmatmul.f32.gmra.mxu2 %v4601_v28  ;;  %4608 = vpow2.f32 %v756_v40 }
 0x189   : > { %v4605_v49 = vpop.eup %4604  ;;  %940 = vmatmul.f32.gmra.mxu3 %v4603_v43  ;;  %v6024_v7 = vadd.f32 %v4603_v43, %v4601_v28  ;;  %4610 = vpow2.f32 %v758_v18  ;;  %2995 = vrot.lane.b32.xlu2 %v6021_v31, %s5160_s18 }
 0x18a   : > { %v4607_v47 = vpop.eup %4606 }
 0x18b   : > { %v6028_v60 = vadd.f32 %v4607_v47, %v4605_v49  ;;  %v678_v14 = vpop.xlane.xlu2 %677 }
 0x18c   : > { %v720_v15 = vsub.f32 %v5875_v10, %v678_v14  ;;  %v721_v63 = vsub.f32 %v5877_v6, %v678_v14  ;;  %v6040_v10 = vpop.f32.mrf.mxu0 }
 0x18e   : > { %v4609_v36 = vpop.eup %4608  ;;  %v760_v48 = vmul.f32 1.442695, %v720_v15  ;;  %v762_v55 = vmul.f32 1.442695, %v721_v63 }
 0x18f   : > { %v4611_v22 = vpop.eup %4610 }
 0x190   : > { %878 = vmatmul.f32.gmra.mxu2 %v4605_v49  ;;  %4612 = vpow2.f32 %v760_v48  ;;  %v6034_v28 = vadd.f32 %v4611_v22, %v4609_v36  ;;  %v4499_v49 = vunpack.i.l.bf16 %v5975_v56 }
 0x191   : > { %943 = vmatmul.f32.gmra.mxu3 %v4607_v47  ;;  %4614 = vpow2.f32 %v762_v55  ;;  %v4500_v55 = vunpack.i.h.bf16 %v5975_v56  ;;  %v6058_v56 = vpop.permute.xlu0 %3007 }
 0x192   : > { %1893 = vmatpush.msrb.mxu1 %v4499_v49  ;;  %v4510_v49 = vunpack.i.h.bf16 %v6016_v46 }
 0x193   : > { %v681_v40 = vpop.xlane.xlu2 %680 }
 0x194   : > { %v722_v18 = vsub.f32 %v5892_v17, %v681_v40  ;;  %v723_v43 = vsub.f32 %v5887_v12, %v681_v40  ;;  %v6045_v12 = vpop.f32.mrf.mxu1  ;;  %v6047_v48 = vpop.f32.mrf.mxu0  ;;  %1894 = vmatpush.msrb.mxu1 %v4500_v55  ;;  %v6078_v55 = vld [vmem:[%s5300_s28 + $0x168] sm:$0xff] }
 0x196   : > { %v4613_v6 = vpop.eup %4612  ;;  %v764_v58 = vmul.f32 1.442695, %v722_v18  ;;  %v766_v14 = vmul.f32 1.442695, %v723_v43  ;;  %v694_v18 = vmax.f32 %v6047_v48, %v6045_v12  ;;  %v4505_v43 = vunpack.i.h.bf16 %v5991_v20 }
 0x197   : > { %v4615_v15 = vpop.eup %4614 }
 0x198   : > { %881 = vmatmul.f32.gmra.mxu2 %v4609_v36  ;;  %4616 = vpow2.f32 %v764_v58  ;;  %v6043_v47 = vadd.f32 %v4615_v15, %v4613_v6  ;;  %v4504_v36 = vunpack.i.l.bf16 %v5991_v20 }
 0x199   : > { %946 = vmatmul.f32.gmra.mxu3 %v4611_v22  ;;  %4618 = vpow2.f32 %v766_v14  ;;  %v691_v22 = vmax.f32 %v6040_v10, %v6038_v52  ;;  %v6068_v20 = vpop.permute.xlu0 %3005 }
 0x19a   : > { %1895 = vmatpush.msrb.mxu1 %v4504_v36  ;;  %v6081_v36 = vld [vmem:[%s5300_s28 + $0x158] sm:$0xff] }
 0x19c   : > { %1896 = vmatpush.msrb.mxu1 %v4505_v43  ;;  %v6061_v58 = vpop.f32.mrf.mxu0  ;;  %v6063_v14 = vpop.f32.mrf.mxu1 }
 0x19e   : > { %v4617_v17 = vpop.eup %4616 }
 0x19f   : > { %v4619_v63 = vpop.eup %4618 }
 0x1a0   : > { %884 = vmatmul.f32.gmra.mxu2 %v4613_v6  ;;  %v6051_v40 = vadd.f32 %v4619_v63, %v4617_v17  ;;  %v4509_v6 = vunpack.i.l.bf16 %v6016_v46  ;;  %v6090_v46 = vld [vmem:[%s5300_s28 + $0x48] sm:$0xff] }
 0x1a1   : > { %949 = vmatmul.f32.gmra.mxu3 %v4615_v15  ;;  %v697_v15 = vmax.f32 %v6061_v58, %v6063_v14 }
 0x1a2   : > { %1897 = vmatpush.msrb.mxu1 %v4509_v6  ;;  %v6099_v6 = vld [vmem:[%s5300_s28 + $0x178] sm:$0xff] }
 0x1a4   : > { %1898 = vmatpush.msrb.mxu1 %v4510_v49 }
 0x1a5   : > { %692 = vmax.xlane.f32.xlu0 %v691_v22  ;;  %v6083_v22 = vpop.permute.xlu0 %3003 }
 0x1a6   : > { %695 = vmax.xlane.f32.xlu1 %v694_v18 }
 0x1a8   : > { %887 = vmatmul.f32.gmra.mxu2 %v4617_v17  ;;  %v6071_v17 = vld [vmem:[%s5300_s28 + $0x68] sm:$0xff] }
 0x1a9   : > { %952 = vmatmul.f32.gmra.mxu3 %v4619_v63  ;;  %v6075_v63 = vpop.permute.xlu1 %3035 }
 0x1ad   : > { %v6096_v43 = vpop.permute.xlu0 %3033 }
 0x1ae   : > { %8223 = vst [vmem:[#allocation31_spill] sm:$0xff] %v6096_v43 }
 0x1b1   : > { %v6092_v18 = vpop.permute.xlu1 %2999 }
 0x1b2   : > { %698 = vmax.xlane.f32.xlu2 %v697_v15  ;;  %8222 = vst [vmem:[#allocation30_spill] sm:$0xff] %v6092_v18  ;;  %v4513_v15 = vpop.permute.xlu2 %4512 }
 0x1b9   : > { %2991 = vrot.lane.b32.xlu0 %v6071_v17, %s5160_s18 }
 0x1ba   : > { %v6112_v42 = vpop.permute.xlu2 %3001 }
 0x1bb   : > { %8224 = vst [vmem:[#allocation32_spill] sm:$0xff] %v6112_v42 }
 0x1bf   : > { %3023 = vrot.lane.b32.xlu1 %v6078_v55, %s5160_s18 }
 0x1c1   : > { %3021 = vrot.lane.b32.xlu0 %v6081_v36, %s5160_s18 }
 0x1c7   : > { %2987 = vrot.lane.b32.xlu1 %v6090_v46, %s5160_s18 }
 0x1ca   : > { %3025 = vrot.lane.b32.xlu2 %v6099_v6, %s5160_s18 }
 0x1ce   : > { %v687_v49 = vpop.xlane.xlu1 %686 }
 0x1cf   : > { %v726_v61 = vsub.f32 %v5955_v45, %v687_v49  ;;  %v727_v37 = vsub.f32 %v5957_v21, %v687_v49 }
 0x1d1   : > { %v772_v53 = vmul.f32 1.442695, %v726_v61  ;;  %v774_v24 = vmul.f32 1.442695, %v727_v37 }
 0x1d2   : > { %v684_v54 = vpop.xlane.xlu0 %683  ;;  %2989 = vrot.lane.b32.xlu2 %v6106_v62, %s5160_s18 }
 0x1d3   : > { %v724_v41 = vsub.f32 %v5949_v32, %v684_v54  ;;  %v725_v19 = vsub.f32 %v5951_v39, %v684_v54  ;;  %4620 = vpow2.f32 %v772_v53 }
 0x1d4   : > { %4622 = vpow2.f32 %v774_v24 }
 0x1d5   : > { %v768_v29 = vmul.f32 1.442695, %v724_v41  ;;  %v770_v45 = vmul.f32 1.442695, %v725_v19  ;;  %v6120_v19 = vpop.f32.mrf.mxu1 }
 0x1d7   : > { %4624 = vpow2.f32 %v768_v29  ;;  %v6122_v29 = vpop.f32.mrf.mxu0 }
 0x1d8   : > { %4626 = vpow2.f32 %v770_v45  ;;  %v700_v53 = vmax.f32 %v6122_v29, %v6120_v19 }
 0x1d9   : > { %v4621_v21 = vpop.eup %4620 }
 0x1da   : > { %v4623_v49 = vpop.eup %4622 }
 0x1db   : > { %v6114_v61 = vadd.f32 %v4623_v49, %v4621_v21 }
 0x1dc   : > { %v690_v8 = vpop.xlane.xlu2 %689 }
 0x1dd   : > { %8225 = vst [vmem:[#allocation33_spill] sm:$0xff] %v6114_v61  ;;  %v4625_v37 = vpop.eup %4624  ;;  %v728_v54 = vsub.f32 %v5965_v51, %v690_v8  ;;  %v729_v39 = vsub.f32 %v5967_v11, %v690_v8  ;;  %v6128_v11 = vpop.f32.mrf.mxu1 }
 0x1de   : > { %v4627_v32 = vpop.eup %4626  ;;  %890 = vmatmul.f32.gmra.mxu2 %v4625_v37 }
 0x1df   : > { %955 = vmatmul.f32.gmra.mxu3 %v4627_v32  ;;  %v6118_v30 = vadd.f32 %v4627_v32, %v4625_v37  ;;  %v776_v24 = vmul.f32 1.442695, %v728_v54  ;;  %v778_v41 = vmul.f32 1.442695, %v729_v39  ;;  %v6130_v37 = vpop.f32.mrf.mxu0  ;;  %v4514_v54 = vunpack.i.l.bf16 %v4513_v15 }
 0x1e0   : > { %v703_v32 = vmax.f32 %v6130_v37, %v6128_v11 }
 0x1e1   : > { %8226 = vst [vmem:[#allocation34_spill] sm:$0xff] %v6118_v30  ;;  %4628 = vpow2.f32 %v776_v24  ;;  %1899 = vmatpush.msrb.mxu1 %v4514_v54  ;;  %v4515_v24 = vunpack.i.h.bf16 %v4513_v15  ;;  %v6162_v54 = vld [vmem:[%s5300_s28 + $0x18] sm:$0xff]  ;;  %v6176_v30 = vld [vmem:[%s5300_s28 + $0x108] sm:$0xff] }
 0x1e2   : > { %4630 = vpow2.f32 %v778_v41  ;;  %v6141_v41 = vld [vmem:[%s5300_s28 + $0x38] sm:$0xff] }
 0x1e3   : > { %1900 = vmatpush.msrb.mxu1 %v4515_v24 }
 0x1e6   : > { %893 = vmatmul.f32.gmra.mxu2 %v4621_v21 }
 0x1e7   : > { %958 = vmatmul.f32.gmra.mxu3 %v4623_v49  ;;  %v4629_v51 = vpop.eup %4628  ;;  %v6134_v21 = vpop.f32.mrf.mxu0 }
 0x1e8   : > { %v4631_v45 = vpop.eup %4630  ;;  %v6136_v49 = vpop.f32.mrf.mxu1 }
 0x1e9   : > { %v6126_v8 = vadd.f32 %v4631_v45, %v4629_v51  ;;  %v706_v39 = vmax.f32 %v6134_v21, %v6136_v49 }
 0x1eb   : > { %8227 = vst [vmem:[#allocation35_spill] sm:$0xff] %v6126_v8  ;;  %701 = vmax.xlane.f32.xlu0 %v700_v53  ;;  %v6146_v53 = vld [vmem:[%s5300_s28 + $0x128] sm:$0xff]  ;;  %v6169_v8 = vpop.permute.xlu2 %3031 }
 0x1ec   : > { %8232 = vst [vmem:[#allocation40_spill] sm:$0xff] %v6169_v8 }
 0x1ee   : > { %896 = vmatmul.f32.gmra.mxu2 %v4629_v51  ;;  %v6148_v51 = vpop.permute.xlu0 %2997 }
 0x1ef   : > { %961 = vmatmul.f32.gmra.mxu3 %v4631_v45  ;;  %8228 = vst [vmem:[#allocation36_spill] sm:$0xff] %v6148_v51  ;;  %v6152_v45 = vpop.permute.xlu1 %3029  ;;  %v6181_v51 = vld [vmem:[%s5300_s28 + $0x28] sm:$0xff] }
 0x1f0   : > { %8229 = vst [vmem:[#allocation37_spill] sm:$0xff] %v6152_v45 }
 0x1f1   : > { %704 = vmax.xlane.f32.xlu1 %v703_v32  ;;  %v6155_v32 = vld [vmem:[%s5300_s28 + $0x138] sm:$0xff] }
 0x1f3   : > { %v6189_v42 = vpop.permute.xlu2 %2995 }
 0x1f4   : > { %8233 = vst [vmem:[#allocation41_spill] sm:$0xff] %v6189_v42 }
 0x1f6   : > { %v6159_v15 = vpop.permute.xlu0 %3027 }
 0x1f7   : > { %8230 = vst [vmem:[#allocation38_spill] sm:$0xff] %v6159_v15  ;;  %v6167_v24 = vpop.permute.xlu1 %2993 }
 0x1f8   : > { %8231 = vst [vmem:[#allocation39_spill] sm:$0xff] %v6167_v24 }
 0x1fb   : > { %707 = vmax.xlane.f32.xlu2 %v706_v39  ;;  %v6165_v39 = vld [vmem:[%s5300_s28 + $0x148] sm:$0xff] }
 0x1ff   : > { %2985 = vrot.lane.b32.xlu0 %v6141_v41, %s5160_s18 }
 0x203   : > { %v6204_v13 = vpop.f32.mrf.mxu1 }
 0x207   : > { %3015 = vrot.lane.b32.xlu0 %v6146_v53, %s5160_s18 }
 0x20a   : > { %3017 = vrot.lane.b32.xlu1 %v6155_v32, %s5160_s18 }
 0x212   : > { %2981 = vrot.lane.b32.xlu1 %v6162_v54, %s5160_s18 }
 0x213   : > { %3019 = vrot.lane.b32.xlu2 %v6165_v39, %s5160_s18 }
 0x218   : > { %v693_v61 = vpop.xlane.xlu0 %692 }
 0x219   : > { %v730_v45 = vsub.f32 %v6040_v10, %v693_v61  ;;  %v731_v15 = vsub.f32 %v6038_v52, %v693_v61  ;;  %v696_v3 = vpop.xlane.xlu1 %695  ;;  %v6192_v61 = vld [vmem:[%s5300_s28 + $0x118] sm:$0xff] }
 0x21a   : > { %v732_v8 = vsub.f32 %v6047_v48, %v696_v3  ;;  %v733_v43 = vsub.f32 %v6045_v12, %v696_v3  ;;  %3011 = vrot.lane.b32.xlu1 %v6176_v30, %s5160_s18 }
 0x21b   : > { %v780_v24 = vmul.f32 1.442695, %v730_v45  ;;  %v782_v18 = vmul.f32 1.442695, %v731_v15  ;;  %2983 = vrot.lane.b32.xlu2 %v6181_v51, %s5160_s18 }
 0x21c   : > { %v784_v52 = vmul.f32 1.442695, %v732_v8  ;;  %v786_v10 = vmul.f32 1.442695, %v733_v43 }
 0x21d   : > { %4632 = vpow2.f32 %v780_v24 }
 0x21e   : > { %4634 = vpow2.f32 %v782_v18 }
 0x21f   : > { %4636 = vpow2.f32 %v784_v52 }
 0x220   : > { %4638 = vpow2.f32 %v786_v10  ;;  %v6202_v10 = vpop.f32.mrf.mxu0 }
 0x223   : > { %v4633_v45 = vpop.eup %4632  ;;  %3013 = vrot.lane.b32.xlu2 %v6192_v61, %s5160_s18 }
 0x224   : > { %v4635_v48 = vpop.eup %4634  ;;  %899 = vmatmul.f32.gmra.mxu2 %v4633_v45 }
 0x225   : > { %v4637_v3 = vpop.eup %4636  ;;  %964 = vmatmul.f32.gmra.mxu3 %v4635_v48  ;;  %v6196_v12 = vadd.f32 %v4635_v48, %v4633_v45  ;;  %v699_v42 = vpop.xlane.xlu2 %698  ;;  %v6211_v48 = vld [vmem:[%s5300_s28 + $0x8] sm:$0xff] }
 0x226   : > { %v4639_v15 = vpop.eup %4638  ;;  %v734_v8 = vsub.f32 %v6061_v58, %v699_v42  ;;  %v735_v18 = vsub.f32 %v6063_v14, %v699_v42  ;;  %v709_v58 = vmax.f32 %v6202_v10, %v6204_v13 }
 0x227   : > { %8234 = vst [vmem:[#allocation42_spill] sm:$0xff] %v6196_v12  ;;  %v6200_v43 = vadd.f32 %v4639_v15, %v4637_v3 }
 0x228   : > { %v788_v24 = vmul.f32 1.442695, %v734_v8  ;;  %v790_v52 = vmul.f32 1.442695, %v735_v18  ;;  %v2807_v18 = vld [vmem:[%s5290_s9 + $0x48] sm:$0xff] }
 0x229   : > { %8235 = vst [vmem:[#allocation43_spill] sm:$0xff] %v6200_v43  ;;  %v2124_v43 = vld [vmem:[%s5300_s28 + $0x1d8] sm:$0xff] }
 0x22a   : > { %4640 = vpow2.f32 %v788_v24  ;;  %v6225_v24 = vmul.f32 0.125, %v2807_v18 }
 0x22b   : > { %4642 = vpow2.f32 %v790_v52  ;;  %v6219_v8 = vpop.permute.xlu0 %2991 }
 0x22c   : > { %902 = vmatmul.f32.gmra.mxu2 %v4637_v3  ;;  %v2804_v3 = vld [vmem:[%s5290_s9 + $0x18] sm:$0xff]  ;;  %8238 = vst [vmem:[#allocation46_spill] sm:$0xff] %v6225_v24 }
 0x22d   : > { %967 = vmatmul.f32.gmra.mxu3 %v4639_v15  ;;  %v6217_v15 = vmul.f32 0.125, %v2804_v3  ;;  %v6242_v3 = vpop.permute.xlu2 %3025 }
 0x22f   : > { %8237 = vst [vmem:[#allocation45_spill] sm:$0xff] %v6217_v15 }
 0x230   : > { %v4641_v45 = vpop.eup %4640 }
 0x231   : > { %710 = vmax.xlane.f32.xlu0 %v709_v58  ;;  %v4643_v42 = vpop.eup %4642  ;;  %v6227_v52 = vpop.permute.xlu1 %3023  ;;  %v2126_v58 = vld [vmem:[%s5300_s28 + $0x1f8] sm:$0xff] }
 0x232   : > { %v6208_v14 = vadd.f32 %v4643_v42, %v4641_v45  ;;  %4222 = vmatpush.xpose.msk.msra.mxu3 %vm389_vm0, %v2126_v58  ;;  %v2803_v58 = vld [vmem:[%s5290_s9 + $0x8] sm:$0xff] }
 0x234   : > { %8236 = vst [vmem:[#allocation44_spill] sm:$0xff] %v6208_v14  ;;  %905 = vmatmul.f32.gmra.mxu2 %v4641_v45  ;;  %v6231_v45 = vpop.permute.xlu0 %3021  ;;  %v6259_v14 = vmul.f32 0.125, %v2803_v58 }
 0x235   : > { %970 = vmatmul.f32.gmra.mxu3 %v4643_v42 }
 0x239   : > { %v6246_v18 = vpop.permute.xlu1 %2987 }
 0x23a   : > { %8239 = vst [vmem:[#allocation47_spill] sm:$0xff] %v6246_v18 }
 0x244   : > { %809 = vadd.xlane.f32.xlu1 %v6012_v38  ;;  %v2110_v38 = vld [vmem:[%s5300_s28 + $0xf8] sm:$0xff] }
 0x245   : > { %2979 = vrot.lane.b32.xlu0 %v6211_v48, %s5160_s18  ;;  %4190 = vmatpush.xpose.msk.msra.mxu2 %vm389_vm0, %v2110_v38  ;;  %v2125_v38 = vld [vmem:[%s5300_s28 + $0x1e8] sm:$0xff] }
 0x246   : > { %4223 = vmatpush.xpose.msk.msra.mxu3 %vm389_vm0, %v2125_v38 }
 0x249   : > { %4191 = vmatpush.xpose.msk.msra.mxu2 %vm389_vm0, %v5890_v33 }
 0x24a   : > { %4224 = vmatpush.xpose.msk.msra.mxu3 %vm389_vm0, %v2124_v43 }
 0x24c   : > { %812 = vadd.xlane.f32.xlu2 %v6024_v7  ;;  %v2805_v7 = vld [vmem:[%s5290_s9 + $0x28] sm:$0xff] }
 0x24d   : > { %2917 = vrot.lane.b32.xlu0 %v6217_v15, %s5160_s18  ;;  %v6240_v42 = vmul.f32 0.125, %v2805_v7  ;;  %4192 = vmatpush.xpose.msk.msra.mxu2 %vm389_vm0, %v5907_v44  ;;  %v2808_v7 = vld [vmem:[%s5290_s9 + $0x58] sm:$0xff] }
 0x24e   : > { %v6261_v18 = vmul.f32 0.125, %v2808_v7  ;;  %4225 = vmatpush.xpose.msk.msra.mxu3 %vm389_vm0, %v5919_v4 }
 0x251   : > { %4193 = vmatpush.xpose.msk.msra.mxu2 %vm389_vm0, %v5924_v26 }
 0x252   : > { %4226 = vmatpush.xpose.msk.msra.mxu3 %vm389_vm0, %v5935_v35 }
 0x255   : > { %2923 = vrot.lane.b32.xlu0 %v6225_v24, %s5160_s18  ;;  %4194 = vmatpush.xpose.msk.msra.mxu2 %vm389_vm0, %v5943_v1 }
 0x256   : > { %4227 = vmatpush.xpose.msk.msra.mxu3 %vm389_vm0, %v6009_v25 }
 0x259   : > { %4195 = vmatpush.xpose.msk.msra.mxu2 %vm389_vm0, %v5930_v27 }
 0x25a   : > { %4228 = vmatpush.xpose.msk.msra.mxu3 %vm389_vm0, %v5981_v34 }
 0x25d   : > { %2919 = vrot.lane.b32.xlu1 %v6240_v42, %s5160_s18  ;;  %4196 = vmatpush.xpose.msk.msra.mxu2 %vm389_vm0, %v5978_v59 }
 0x25e   : > { %v702_v15 = vpop.xlane.xlu0 %701  ;;  %4229 = vmatpush.xpose.msk.msra.mxu3 %vm389_vm0, %v5994_v57 }
 0x25f   : > { %v736_v24 = vsub.f32 %v6122_v29, %v702_v15  ;;  %v737_v33 = vsub.f32 %v6120_v19, %v702_v15  ;;  %v6268_v29 = vpop.permute.xlu2 %2989 }
 0x261   : > { %v792_v44 = vmul.f32 1.442695, %v736_v24  ;;  %v794_v12 = vmul.f32 1.442695, %v737_v33  ;;  %v2806_v24 = vld [vmem:[%s5290_s9 + $0x38] sm:$0xff]  ;;  %4197 = vmatpush.xpose.msk.msra.mxu2 %vm389_vm0, %v6021_v31 }
 0x262   : > { %v6279_v38 = vmul.f32 0.125, %v2806_v24  ;;  %4230 = vmatpush.xpose.msk.msra.mxu3 %vm389_vm0, %v6099_v6 }
 0x263   : > { %4644 = vpow2.f32 %v792_v44 }
 0x264   : > { %4646 = vpow2.f32 %v794_v12  ;;  %2915 = vrot.lane.b32.xlu2 %v6259_v14, %s5160_s18  ;;  %v705_v19 = vpop.xlane.xlu1 %704 }
 0x265   : > { %v738_v26 = vsub.f32 %v6130_v37, %v705_v19  ;;  %v739_v15 = vsub.f32 %v6128_v11, %v705_v19  ;;  %2925 = vrot.lane.b32.xlu1 %v6261_v18, %s5160_s18  ;;  %4198 = vmatpush.xpose.msk.msra.mxu2 %vm389_vm0, %v5997_v5 }
 0x266   : > { %4231 = vmatpush.xpose.msk.msra.mxu3 %vm389_vm0, %v6078_v55 }
 0x267   : > { %v796_v12 = vmul.f32 1.442695, %v738_v26  ;;  %v798_v43 = vmul.f32 1.442695, %v739_v15 }
 0x269   : > { %v4645_v1 = vpop.eup %4644  ;;  %4648 = vpow2.f32 %v796_v12  ;;  %4199 = vmatpush.xpose.msk.msra.mxu2 %vm389_vm0, %v6071_v17 }
 0x26a   : > { %v4647_v58 = vpop.eup %4646  ;;  %908 = vmatmul.f32.gmra.mxu2 %v4645_v1  ;;  %4650 = vpow2.f32 %v798_v43  ;;  %4232 = vmatpush.xpose.msk.msra.mxu3 %vm389_vm0, %v6081_v36 }
 0x26b   : > { %973 = vmatmul.f32.gmra.mxu3 %v4647_v58  ;;  %v6283_v11 = vadd.f32 %v4647_v58, %v4645_v1 }
 0x26c   : > { %2921 = vrot.lane.b32.xlu2 %v6279_v38, %s5160_s18 }
 0x26d   : > { %4200 = vmatpush.xpose.msk.msra.mxu2 %vm389_vm0, %v6106_v62  ;;  %v2810_v62 = vld [vmem:[%s5290_s9 + $0x78] sm:$0xff] }
 0x26e   : > { %v708_v4 = vpop.xlane.xlu2 %707  ;;  %4233 = vmatpush.xpose.msk.msra.mxu3 %vm389_vm0, %v6165_v39  ;;  %v6331_v57 = vmul.f32 0.125, %v2810_v62 }
 0x26f   : > { %v4649_v27 = vpop.eup %4648  ;;  %v740_v37 = vsub.f32 %v6134_v21, %v708_v4  ;;  %v741_v33 = vsub.f32 %v6136_v49, %v708_v4 }
 0x270   : > { %v4651_v35 = vpop.eup %4650 }
 0x271   : > { %v800_v7 = vmul.f32 1.442695, %v740_v37  ;;  %v802_v44 = vmul.f32 1.442695, %v741_v33  ;;  %v6297_v59 = vadd.f32 %v4651_v35, %v4649_v27  ;;  %4201 = vmatpush.xpose.msk.msra.mxu2 %vm389_vm0, %v6090_v46  ;;  %v6334_v5 = vpop.permute.xlu0 %2985  ;;  %v2811_v46 = vld [vmem:[%s5290_s9 + $0x88] sm:$0xff] }
 0x272   : > { %911 = vmatmul.f32.gmra.mxu2 %v4649_v27  ;;  %4234 = vmatpush.xpose.msk.msra.mxu3 %vm389_vm0, %v6155_v32  ;;  %v6359_v49 = vmul.f32 0.125, %v2811_v46  ;;  %v2809_v32 = vld [vmem:[%s5290_s9 + $0x68] sm:$0xff]  ;;  %v8250_v46 = vld [vmem:[#allocation38_spill] sm:$0xff] }
 0x273   : > { %976 = vmatmul.f32.gmra.mxu3 %v4651_v35  ;;  %4652 = vpow2.f32 %v800_v7  ;;  %v6366_v39 = vmul.f32 0.125, %v2809_v32  ;;  %v8245_v35 = vld [vmem:[#allocation16_spill] sm:$0xff] }
 0x274   : > { %4654 = vpow2.f32 %v802_v44  ;;  %v8246_v7 = vld [vmem:[#allocation36_spill] sm:$0xff]  ;;  %v8247_v44 = vld [vmem:[#allocation37_spill] sm:$0xff] }
 0x275   : > { %4202 = vmatpush.xpose.msk.msra.mxu2 %vm389_vm0, %v6141_v41  ;;  %v873_v41 = vpop.f32.mrf.mxu2 }
 0x276   : > { %4235 = vmatpush.xpose.msk.msra.mxu3 %vm389_vm0, %v6146_v53  ;;  %v6354_v36 = vpop.permute.xlu2 %3019 }
 0x279   : > { %v4653_v25 = vpop.eup %4652  ;;  %4203 = vmatpush.xpose.msk.msra.mxu2 %vm389_vm0, %v6181_v51 }
 0x27a   : > { %v4655_v34 = vpop.eup %4654  ;;  %914 = vmatmul.f32.gmra.mxu2 %v4653_v25  ;;  %4236 = vmatpush.xpose.msk.msra.mxu3 %vm389_vm0, %v6192_v61 }
 0x27b   : > { %979 = vmatmul.f32.gmra.mxu3 %v4655_v34  ;;  %v6309_v31 = vadd.f32 %v4655_v34, %v4653_v25  ;;  %v8248_v25 = vld [vmem:[#allocation34_spill] sm:$0xff]  ;;  %v2813_v34 = vld [vmem:[%s5290_s9 + $0xa8] sm:$0xff] }
 0x27c   : > { %v6352_v55 = vpop.permute.xlu1 %3017 }
 0x27d   : > { %4204 = vmatpush.xpose.msk.msra.mxu2 %vm389_vm0, %v6162_v54  ;;  %v938_v54 = vpop.f32.mrf.mxu3  ;;  %v876_v19 = vpop.f32.mrf.mxu2 }
 0x27e   : > { %4237 = vmatpush.xpose.msk.msra.mxu3 %vm389_vm0, %v6176_v30  ;;  %v6368_v61 = vpop.permute.xlu2 %2983  ;;  %v939_v58 = vadd.f32 %v938_v54, %v873_v41  ;;  %v8254_v54 = vld [vmem:[#allocation17_spill] sm:$0xff] }
 0x27f   : > { %815 = vadd.xlane.f32.xlu0 %v6028_v60  ;;  %v2812_v60 = vld [vmem:[%s5290_s9 + $0x98] sm:$0xff] }
 0x280   : > { %v6346_v17 = vmul.f32 0.125, %v2812_v60  ;;  %v8249_v60 = vld [vmem:[#allocation41_spill] sm:$0xff] }
 0x281   : > { %4205 = vmatpush.xpose.msk.msra.mxu2 %vm389_vm0, %v6211_v48 }
 0x284   : > { %v6361_v30 = vpop.permute.xlu1 %2981 }
 0x285   : > { %v941_v15 = vpop.f32.mrf.mxu3  ;;  %v6386_v43 = vpop.f32.mrf.mxu2 }
 0x286   : > { %v6376_v24 = vpop.permute.xlu2 %3013 }
 0x28c   : > { %v6372_v48 = vpop.permute.xlu1 %3011 }
 0x28d   : > { %v6388_v1 = vpop.f32.mrf.mxu3 }
 0x28f   : > { %818 = vadd.xlane.f32.xlu1 %v6034_v28  ;;  %v6348_v28 = vpop.permute.xlu0 %3015 }
 0x293   : > { %2929 = vrot.lane.b32.xlu0 %v6331_v57, %s5160_s18 }
 0x295   : > { %821 = vadd.xlane.f32.xlu2 %v6043_v47 }
 0x29b   : > { %2933 = vrot.lane.b32.xlu0 %v6346_v17, %s5160_s18 }
 0x2a4   : > { %v711_v6 = vpop.xlane.xlu0 %710 }
 0x2a5   : > { %v742_v21 = vsub.f32 %v6202_v10, %v711_v6  ;;  %v743_v47 = vsub.f32 %v6204_v13, %v711_v6  ;;  %v6443_v6 = vmul.f32 0.125, %v2813_v34 }
 0x2a7   : > { %v804_v53 = vmul.f32 1.442695, %v742_v21  ;;  %v806_v51 = vmul.f32 1.442695, %v743_v47  ;;  %v8251_v21 = vld [vmem:[#allocation33_spill] sm:$0xff] }
 0x2a8   : > { %2931 = vrot.lane.b32.xlu1 %v6359_v49, %s5160_s18  ;;  %v8252_v47 = vld [vmem:[#allocation21_spill] sm:$0xff] }
 0x2a9   : > { %4656 = vpow2.f32 %v804_v53  ;;  %v8253_v53 = vld [vmem:[#allocation39_spill] sm:$0xff] }
 0x2aa   : > { %4658 = vpow2.f32 %v806_v51 }
 0x2ad   : > { %2927 = vrot.lane.b32.xlu2 %v6366_v39, %s5160_s18 }
 0x2af   : > { %v4657_v13 = vpop.eup %4656 }
 0x2b0   : > { %v4659_v10 = vpop.eup %4658  ;;  %917 = vmatmul.f32.gmra.mxu2 %v4657_v13 }
 0x2b1   : > { %982 = vmatmul.f32.gmra.mxu3 %v4659_v10  ;;  %v6374_v26 = vadd.f32 %v4659_v10, %v4657_v13  ;;  %v8256_v10 = vld [vmem:[#allocation20_spill] sm:$0xff] }
 0x2b7   : > { %v810_v12 = vpop.xlane.xlu1 %809  ;;  %v2980_v62 = vpop.permute.xlu0 %2979 }
 0x2b8   : > { %4142 = vmatmul.msk.f32.vlgmr.msrb.gmra.mxu2 %vm389_vm0, %v5579_v0  ;;  %4660 = vrcp.f32 %v810_v12 }
 0x2b9   : > { %4174 = vmatmul.msk.f32.vlgmr.msrb.gmra.mxu3 %vm389_vm0, %v5579_v0  ;;  %4254 = vmatpush.xpose.msk.msrb.mxu2 %vm389_vm0, %v5973_v2  ;;  %v6408_v2 = vpop.f32.mrf.mxu3 }
 0x2ba   : > { %4286 = vmatpush.xpose.msk.msrb.mxu3 %vm389_vm0, %v5963_v50  ;;  %v6403_v50 = vpop.f32.mrf.mxu2 }
 0x2bd   : > { %4255 = vmatpush.xpose.msk.msrb.mxu2 %vm389_vm0, %v6058_v56 }
 0x2be   : > { %4287 = vmatpush.xpose.msk.msrb.mxu3 %vm389_vm0, %v5971_v23  ;;  %v4661_v4 = vpop.eup %4660  ;;  %v942_v23 = vadd.f32 %v941_v15, %v876_v19 }
 0x2bf   : > { %v1002_v27 = vmul.f32 %v4661_v4, %v939_v58  ;;  %v813_v0 = vpop.xlane.xlu2 %812  ;;  %v6464_v32 = vpop.permute.xlu0 %2917 }
 0x2c0   : > { %4143 = vmatmul.msk.f32.gmra.mxu2 %vm389_vm0, %v5656_v16  ;;  %4662 = vrcp.f32 %v813_v0 }
 0x2c1   : > { %4175 = vmatmul.msk.f32.gmra.mxu3 %vm389_vm0, %v5656_v16  ;;  %4256 = vmatpush.xpose.msk.msrb.mxu2 %vm389_vm0, %v6068_v20  ;;  %1018 = vst.msk [vmem:[#allocation2] sm:$0xff] %vm389_vm0, %v1002_v27  ;;  %v8240_v20 = vld [vmem:[#allocation18_spill] sm:$0xff]  ;;  %v6427_v33 = vpop.f32.mrf.mxu3  ;;  %v945_v27 = vadd.f32 %v6388_v1, %v6386_v43  ;;  %v8260_v1 = vld [vmem:[#allocation35_spill] sm:$0xff] }
 0x2c2   : > { %4288 = vmatpush.xpose.msk.msrb.mxu3 %vm389_vm0, %v5985_v9  ;;  %v8241_v9 = vld [vmem:[#allocation32_spill] sm:$0xff]  ;;  %v6425_v37 = vpop.f32.mrf.mxu2 }
 0x2c3   : > { %v951_v34 = vadd.f32 %v6427_v33, %v6425_v37  ;;  %v8266_v37 = vld [vmem:[#allocation26_spill] sm:$0xff] }
 0x2c5   : > { %4257 = vmatpush.xpose.msk.msrb.mxu2 %vm389_vm0, %v6083_v22  ;;  %824 = vadd.xlane.f32.xlu0 %v6051_v40  ;;  %v8242_v40 = vld [vmem:[#allocation31_spill] sm:$0xff]  ;;  %v8243_v22 = vld [vmem:[#allocation30_spill] sm:$0xff] }
 0x2c6   : > { %4289 = vmatpush.xpose.msk.msrb.mxu3 %vm389_vm0, %v6075_v63  ;;  %v4663_v16 = vpop.eup %4662  ;;  %v8244_v63 = vld [vmem:[#allocation40_spill] sm:$0xff] }
 0x2c7   : > { %v1003_v56 = vmul.f32 %v4663_v16, %v942_v23  ;;  %v6485_v19 = vpop.permute.xlu0 %2923  ;;  %v6522_v58 = vpop.permute.xlu2 %2915 }
 0x2c8   : > { %4144 = vmatmul.msk.f32.gmra.mxu2 %vm389_vm0, %v8240_v20 }
 0x2c9   : > { %4176 = vmatmul.msk.f32.gmra.mxu3 %vm389_vm0, %v8240_v20  ;;  %4258 = vmatpush.xpose.msk.msrb.mxu2 %vm389_vm0, %v8241_v9  ;;  %1019 = vst.msk [vmem:[#allocation2 + $0x10] sm:$0xff] %vm389_vm0, %v1003_v56  ;;  %v6454_v51 = vpop.f32.mrf.mxu3  ;;  %v8259_v20 = vld [vmem:[#allocation23_spill] sm:$0xff] }
 0x2ca   : > { %4290 = vmatpush.xpose.msk.msrb.mxu3 %vm389_vm0, %v8242_v40  ;;  %v6448_v41 = vpop.f32.mrf.mxu2 }
 0x2cd   : > { %4259 = vmatpush.xpose.msk.msrb.mxu2 %vm389_vm0, %v8243_v22  ;;  %v8261_v22 = vld [vmem:[#allocation27_spill] sm:$0xff] }
 0x2ce   : > { %4291 = vmatpush.xpose.msk.msrb.mxu3 %vm389_vm0, %v8244_v63  ;;  %v948_v63 = vadd.f32 %v6408_v2, %v6403_v50 }
 0x2d0   : > { %4145 = vmatmul.msk.f32.gmra.mxu2 %vm389_vm0, %v8245_v35 }
 0x2d1   : > { %4177 = vmatmul.msk.f32.gmra.mxu3 %vm389_vm0, %v8245_v35  ;;  %4260 = vmatpush.xpose.msk.msrb.mxu2 %vm389_vm0, %v8246_v7 }
 0x2d2   : > { %4292 = vmatpush.xpose.msk.msrb.mxu3 %vm389_vm0, %v8247_v44  ;;  %827 = vadd.xlane.f32.xlu1 %v8248_v25  ;;  %v6468_v13 = vpop.f32.mrf.mxu2  ;;  %v8262_v25 = vld [vmem:[#allocation44_spill] sm:$0xff] }
 0x2d5   : > { %4261 = vmatpush.xpose.msk.msrb.mxu2 %vm389_vm0, %v8249_v60  ;;  %v8263_v60 = vld [vmem:[#allocation22_spill] sm:$0xff] }
 0x2d6   : > { %4293 = vmatpush.xpose.msk.msrb.mxu3 %vm389_vm0, %v8250_v46  ;;  %830 = vadd.xlane.f32.xlu2 %v8251_v21  ;;  %v8264_v21 = vld [vmem:[#allocation42_spill] sm:$0xff] }
 0x2d8   : > { %4146 = vmatmul.msk.f32.gmra.mxu2 %vm389_vm0, %v8252_v47 }
 0x2d9   : > { %4178 = vmatmul.msk.f32.gmra.mxu3 %vm389_vm0, %v8252_v47  ;;  %4262 = vmatpush.xpose.msk.msrb.mxu2 %vm389_vm0, %v8253_v53  ;;  %v8265_v47 = vld [vmem:[#allocation43_spill] sm:$0xff]  ;;  %v2881_v53 = vld [vmem:[%s5593_s24 + $0xe8] sm:$0xff] }
 0x2da   : > { %4294 = vmatpush.xpose.msk.msrb.mxu3 %vm389_vm0, %v6242_v3  ;;  %2935 = vrot.lane.b32.xlu0 %v6443_v6, %s5160_s18  ;;  %v6474_v3 = vpop.f32.mrf.mxu3 }
 0x2dd   : > { %4263 = vmatpush.xpose.msk.msrb.mxu2 %vm389_vm0, %v6219_v8  ;;  %v8255_v8 = vld [vmem:[#allocation47_spill] sm:$0xff] }
 0x2de   : > { %4295 = vmatpush.xpose.msk.msrb.mxu3 %vm389_vm0, %v6227_v52  ;;  %v2815_v52 = vld [vmem:[%s5290_s9 + $0xc8] sm:$0xff] }
 0x2df   : > { %v6487_v15 = vmul.f32 0.125, %v2815_v52 }
 0x2e0   : > { %4147 = vmatmul.msk.f32.gmra.mxu2 %vm389_vm0, %v8254_v54 }
 0x2e1   : > { %4179 = vmatmul.msk.f32.gmra.mxu3 %vm389_vm0, %v8254_v54  ;;  %4264 = vmatpush.xpose.msk.msrb.mxu2 %vm389_vm0, %v6268_v29  ;;  %v2814_v29 = vld [vmem:[%s5290_s9 + $0xb8] sm:$0xff]  ;;  %v2897_v54 = vld [vmem:[%s5593_s24 + $0x1e8] sm:$0xff] }
 0x2e2   : > { %4296 = vmatpush.xpose.msk.msrb.mxu3 %vm389_vm0, %v6231_v45  ;;  %v6496_v45 = vpop.f32.mrf.mxu2  ;;  %v6500_v12 = vpop.f32.mrf.mxu3  ;;  %v4521_v52 = vpack.i.bf16 %v2897_v54, %v2881_v53 }
 0x2e5   : > { %4265 = vmatpush.xpose.msk.msrb.mxu2 %vm389_vm0, %v8255_v8 }
 0x2e6   : > { %4297 = vmatpush.xpose.msk.msrb.mxu3 %vm389_vm0, %v6354_v36  ;;  %v6498_v36 = vmul.f32 0.125, %v2814_v29  ;;  %v2879_v29 = vld [vmem:[%s5593_s24 + $0xc8] sm:$0xff] }
 0x2e8   : > { %4148 = vmatmul.msk.f32.gmra.mxu2 %vm389_vm0, %v8256_v10 }
 0x2e9   : > { %4180 = vmatmul.msk.f32.gmra.mxu3 %vm389_vm0, %v8256_v10  ;;  %4266 = vmatpush.xpose.msk.msrb.mxu2 %vm389_vm0, %v6334_v5  ;;  %v8257_v5 = vld [vmem:[#allocation24_spill] sm:$0xff]  ;;  %v8267_v10 = vld [vmem:[#allocation29_spill] sm:$0xff] }
 0x2ea   : > { %4298 = vmatpush.xpose.msk.msrb.mxu3 %vm389_vm0, %v6352_v55  ;;  %v6512_v55 = vpop.permute.xlu1 %2919  ;;  %v6525_v4 = vpop.f32.mrf.mxu3 }
 0x2eb   : > { %2939 = vrot.lane.b32.xlu1 %v6487_v15, %s5160_s18 }
 0x2ed   : > { %4267 = vmatpush.xpose.msk.msrb.mxu2 %vm389_vm0, %v6368_v61 }
 0x2ee   : > { %4299 = vmatpush.xpose.msk.msrb.mxu3 %vm389_vm0, %v6348_v28  ;;  %2937 = vrot.lane.b32.xlu2 %v6498_v36, %s5160_s18  ;;  %v6520_v28 = vpop.f32.mrf.mxu2 }
 0x2f0   : > { %4149 = vmatmul.msk.f32.gmra.mxu2 %vm389_vm0, %v8257_v5 }
 0x2f1   : > { %4181 = vmatmul.msk.f32.gmra.mxu3 %vm389_vm0, %v8257_v5  ;;  %4268 = vmatpush.xpose.msk.msrb.mxu2 %vm389_vm0, %v6361_v30  ;;  %v8258_v30 = vld [vmem:[#allocation19_spill] sm:$0xff]  ;;  %v2895_v5 = vld [vmem:[%s5593_s24 + $0x1c8] sm:$0xff] }
 0x2f2   : > { %4300 = vmatpush.xpose.msk.msrb.mxu3 %vm389_vm0, %v6376_v24  ;;  %v816_v61 = vpop.xlane.xlu0 %815  ;;  %v6535_v23 = vpop.permute.xlu1 %2925 }
 0x2f3   : > { %4664 = vrcp.f32 %v816_v61  ;;  %v6540_v56 = vpop.f32.mrf.mxu3 }
 0x2f5   : > { %4269 = vmatpush.xpose.msk.msrb.mxu2 %vm389_vm0, %v2980_v62 }
 0x2f6   : > { %4301 = vmatpush.xpose.msk.msrb.mxu3 %vm389_vm0, %v6372_v48  ;;  %v6538_v16 = vpop.f32.mrf.mxu2  ;;  %v6542_v48 = vpop.permute.xlu2 %2921 }
 0x2f8   : > { %4150 = vmatmul.msk.f32.gmra.mxu2 %vm389_vm0, %v8258_v30 }
 0x2f9   : > { %v4665_v24 = vpop.eup %4664  ;;  %4182 = vmatmul.msk.f32.gmra.mxu3 %vm389_vm0, %v8258_v30  ;;  %v4531_v30 = vpack.i.bf16 %v2895_v5, %v2879_v29 }
 0x2fa   : > { %v1004_v0 = vmul.f32 %v4665_v24, %v945_v27 }
 0x2fb   : > { %v6551_v40 = vpop.f32.mrf.mxu3 }
 0x2fc   : > { %1020 = vst.msk [vmem:[#allocation2 + $0x20] sm:$0xff] %vm389_vm0, %v1004_v0  ;;  %v8268_v0 = vld [vmem:[#allocation25_spill] sm:$0xff] }
 0x2fe   : > { %v6549_v9 = vpop.f32.mrf.mxu2 }
 0x300   : > { %4151 = vmatmul.msk.f32.gmra.mxu2 %vm389_vm0, %v8259_v20 }
 0x301   : > { %4183 = vmatmul.msk.f32.gmra.mxu3 %vm389_vm0, %v8259_v20  ;;  %v2818_v20 = vld [vmem:[%s5290_s9 + $0xf8] sm:$0xff] }
 0x302   : > { %v819_v43 = vpop.xlane.xlu1 %818 }
 0x303   : > { %4666 = vrcp.f32 %v819_v43  ;;  %v6569_v46 = vpop.f32.mrf.mxu3  ;;  %v2816_v43 = vld [vmem:[%s5290_s9 + $0xd8] sm:$0xff] }
 0x304   : > { %833 = vadd.xlane.f32.xlu0 %v8260_v1  ;;  %v2877_v1 = vld [vmem:[%s5593_s24 + $0xa8] sm:$0xff] }
 0x305   : > { %v6595_v24 = vpop.permute.xlu0 %2929 }
 0x306   : > { %v6565_v50 = vpop.f32.mrf.mxu2 }
 0x308   : > { %4152 = vmatmul.msk.f32.gmra.mxu2 %vm389_vm0, %v8261_v22  ;;  %v822_v35 = vpop.xlane.xlu2 %821 }
 0x309   : > { %4184 = vmatmul.msk.f32.gmra.mxu3 %vm389_vm0, %v8261_v22  ;;  %v4667_v7 = vpop.eup %4666  ;;  %4668 = vrcp.f32 %v822_v35  ;;  %v2893_v22 = vld [vmem:[%s5593_s24 + $0x1a8] sm:$0xff]  ;;  %v6608_v35 = vmul.f32 0.125, %v2818_v20 }
 0x30a   : > { %v1005_v44 = vmul.f32 %v4667_v7, %v948_v63  ;;  %v8270_v20 = vld [vmem:[#allocation45_spill] sm:$0xff] }
 0x30b   : > { %v6582_v8 = vpop.f32.mrf.mxu3 }
 0x30c   : > { %842 = vadd.xlane.f32.xlu0 %v8262_v25  ;;  %1021 = vst.msk [vmem:[#allocation2 + $0x30] sm:$0xff] %vm389_vm0, %v1005_v44  ;;  %v6612_v44 = vmul.f32 0.125, %v2816_v43  ;;  %v4541_v25 = vpack.i.bf16 %v2893_v22, %v2877_v1  ;;  %v957_v22 = vadd.f32 %v6474_v3, %v6468_v13 }
 0x30e   : > { %v6576_v33 = vpop.f32.mrf.mxu2 }
 0x30f   : > { %v4669_v62 = vpop.eup %4668 }
 0x310   : > { %4153 = vmatmul.msk.f32.gmra.mxu2 %vm389_vm0, %v8263_v60  ;;  %v1006_v2 = vmul.f32 %v4669_v62, %v951_v34  ;;  %v6614_v34 = vpop.permute.xlu0 %2933  ;;  %v8269_v62 = vld [vmem:[#allocation28_spill] sm:$0xff] }
 0x311   : > { %4185 = vmatmul.msk.f32.gmra.mxu3 %vm389_vm0, %v8263_v60  ;;  %v2817_v60 = vld [vmem:[%s5290_s9 + $0xe8] sm:$0xff] }
 0x312   : > { %1022 = vst.msk [vmem:[#allocation2 + $0x40] sm:$0xff] %vm389_vm0, %v1006_v2 }
 0x313   : > { %v6593_v27 = vpop.f32.mrf.mxu3 }
 0x315   : > { %836 = vadd.xlane.f32.xlu1 %v8264_v21 }
 0x316   : > { %v6591_v61 = vpop.f32.mrf.mxu2 }
 0x317   : > { %839 = vadd.xlane.f32.xlu2 %v8265_v47  ;;  %v6626_v47 = vmul.f32 0.125, %v2817_v60 }
 0x318   : > { %4154 = vmatmul.msk.f32.gmra.mxu2 %vm389_vm0, %v8266_v37 }
 0x319   : > { %4186 = vmatmul.msk.f32.gmra.mxu3 %vm389_vm0, %v8266_v37 }
 0x31a   : > { %v6642_v29 = vpop.permute.xlu1 %2931 }
 0x31b   : > { %v6610_v7 = vpop.f32.mrf.mxu3 }
 0x31e   : > { %v6606_v63 = vpop.f32.mrf.mxu2 }
 0x320   : > { %4522 = vrot.lane.b32.xlu0 %v4521_v52, %s5160_s18  ;;  %4155 = vmatmul.msk.f32.gmra.mxu2 %vm389_vm0, %v8267_v10 }
 0x321   : > { %4187 = vmatmul.msk.f32.gmra.mxu3 %vm389_vm0, %v8267_v10  ;;  %v954_v10 = vadd.f32 %v6454_v51, %v6448_v41 }
 0x328   : > { %4532 = vrot.lane.b32.xlu0 %v4531_v30, %s5160_s18  ;;  %4156 = vmatmul.msk.f32.gmra.mxu2 %vm389_vm0, %v8268_v0 }
 0x329   : > { %4188 = vmatmul.msk.f32.gmra.mxu3 %vm389_vm0, %v8268_v0  ;;  %v6644_v0 = vpop.permute.xlu2 %2927 }
 0x32e   : > { %2945 = vrot.lane.b32.xlu1 %v6608_v35, %s5160_s18 }
 0x32f   : > { %2941 = vrot.lane.b32.xlu2 %v6612_v44, %s5160_s18 }
 0x330   : > { %4542 = vrot.lane.b32.xlu0 %v4541_v25, %s5160_s18  ;;  %4157 = vmatmul.msk.f32.gmra.mxu2 %vm389_vm0, %v8269_v62 }
 0x331   : > { %4189 = vmatmul.msk.f32.gmra.mxu3 %vm389_vm0, %v8269_v62 }
 0x333   : > { %v918_v2 = vpop.f32.mrf.mxu2 }
 0x334   : > { %v983_v21 = vpop.f32.mrf.mxu3 }
 0x335   : > { %v6628_v37 = vadd.f32 %v983_v21, %v918_v2  ;;  %v960_v2 = vadd.f32 %v6500_v12, %v6496_v45  ;;  %v2898_v45 = vld [vmem:[%s5593_s24 + $0x1f8] sm:$0xff] }
 0x336   : > { %2690 = vmatpush.msra.mxu1 %v2898_v45 }
 0x337   : > { %2943 = vrot.lane.b32.xlu2 %v6626_v47, %s5160_s18 }
 0x338   : > { %v825_v53 = vpop.xlane.xlu0 %824  ;;  %4206 = vmatmul.msk.f32.vlgmr.msra.gmra.mxu2 %vm389_vm0, %v6259_v14 }
 0x339   : > { %4238 = vmatmul.msk.f32.vlgmr.msra.gmra.mxu3 %vm389_vm0, %v6259_v14  ;;  %4670 = vrcp.f32 %v825_v53  ;;  %v8273_v53 = vld [vmem:[#allocation46_spill] sm:$0xff] }
 0x33b   : > { %v6636_v54 = vpop.f32.mrf.mxu2 }
 0x33c   : > { %v6638_v52 = vpop.f32.mrf.mxu3 }
 0x33f   : > { %v4671_v5 = vpop.eup %4670 }
 0x340   : > { %v1007_v30 = vmul.f32 %v4671_v5, %v954_v10  ;;  %4207 = vmatmul.msk.f32.gmra.mxu2 %vm389_vm0, %v8270_v20  ;;  %v6699_v5 = vld [vmem:[%s5593_s24 + $0x98] sm:$0xff] }
 0x341   : > { %4239 = vmatmul.msk.f32.gmra.mxu3 %vm389_vm0, %v8270_v20  ;;  %8276 = vst [vmem:[#allocation40_spill] sm:$0xff] %v6699_v5 }
 0x342   : > { %1023 = vst.msk [vmem:[#allocation2 + $0x50] sm:$0xff] %vm389_vm0, %v1007_v30  ;;  %v6702_v30 = vld [vmem:[%s5593_s24 + $0x198] sm:$0xff] }
 0x343   : > { %v6651_v14 = vpop.f32.mrf.mxu2  ;;  %8277 = vst [vmem:[#allocation16_spill] sm:$0xff] %v6702_v30 }
 0x344   : > { %v6653_v43 = vpop.f32.mrf.mxu3 }
 0x345   : > { %v828_v1 = vpop.xlane.xlu1 %827 }
 0x346   : > { %4672 = vrcp.f32 %v828_v1  ;;  %v6715_v1 = vld [vmem:[%s5593_s24 + $0xd8] sm:$0xff] }
 0x348   : > { %4208 = vmatmul.msk.f32.gmra.mxu2 %vm389_vm0, %v6240_v42 }
 0x349   : > { %4240 = vmatmul.msk.f32.gmra.mxu3 %vm389_vm0, %v6240_v42  ;;  %v831_v41 = vpop.xlane.xlu2 %830 }
 0x34a   : > { %4674 = vrcp.f32 %v831_v41  ;;  %v6718_v41 = vld [vmem:[%s5593_s24 + $0x1d8] sm:$0xff] }
 0x34b   : > { %v6659_v51 = vpop.f32.mrf.mxu2 }
 0x34c   : > { %8271 = vst [vmem:[#allocation18_spill] sm:$0xff] %v6659_v51  ;;  %v6663_v25 = vpop.f32.mrf.mxu3  ;;  %v4673_v62 = vpop.eup %4672 }
 0x34d   : > { %8272 = vst [vmem:[#allocation32_spill] sm:$0xff] %v6663_v25  ;;  %v1008_v60 = vmul.f32 %v4673_v62, %v957_v22  ;;  %v6720_v22 = vpop.permute.xlu0 %2935  ;;  %v6726_v62 = vld [vmem:[%s5593_s24 + $0x78] sm:$0xff] }
 0x34e   : > { %8278 = vst [vmem:[#allocation36_spill] sm:$0xff] %v6726_v62 }
 0x34f   : > { %1024 = vst.msk [vmem:[#allocation2 + $0x60] sm:$0xff] %vm389_vm0, %v1008_v60  ;;  %v6729_v60 = vld [vmem:[%s5593_s24 + $0x178] sm:$0xff] }
 0x350   : > { %v4675_v21 = vpop.eup %4674  ;;  %4209 = vmatmul.msk.f32.gmra.mxu2 %vm389_vm0, %v6279_v38  ;;  %8279 = vst [vmem:[#allocation37_spill] sm:$0xff] %v6729_v60 }
 0x351   : > { %4241 = vmatmul.msk.f32.gmra.mxu3 %vm389_vm0, %v6279_v38  ;;  %v1009_v42 = vmul.f32 %v4675_v21, %v960_v2  ;;  %v2882_v38 = vld [vmem:[%s5593_s24 + $0xf8] sm:$0xff]  ;;  %v4556_v2 = vpack.i.bf16 %v6729_v60, %v6726_v62  ;;  %v6777_v62 = vpop.permute.xlu2 %2937 }
 0x352   : > { %2625 = vmatpush.msra.mxu0 %v2882_v38 }
 0x353   : > { %v6672_v13 = vpop.f32.mrf.mxu2  ;;  %1025 = vst.msk [vmem:[#allocation2 + $0x70] sm:$0xff] %vm389_vm0, %v1009_v42 }
 0x354   : > { %v6675_v3 = vpop.f32.mrf.mxu3 }
 0x358   : > { %4210 = vmatmul.msk.f32.gmra.mxu2 %vm389_vm0, %v8273_v53  ;;  %845 = vadd.xlane.f32.xlu1 %v6283_v11 }
 0x359   : > { %4242 = vmatmul.msk.f32.gmra.mxu3 %vm389_vm0, %v8273_v53  ;;  %v4516_v53 = vpack.i.bf16 %v2898_v45, %v2882_v38  ;;  %v6757_v38 = vld [vmem:[%s5593_s24 + $0xb8] sm:$0xff] }
 0x35a   : > { %851 = vadd.xlane.f32.xlu0 %v6309_v31  ;;  %v6760_v45 = vld [vmem:[%s5593_s24 + $0x1b8] sm:$0xff] }
 0x35b   : > { %v6685_v12 = vpop.f32.mrf.mxu2 }
 0x35c   : > { %v6687_v10 = vpop.f32.mrf.mxu3 }
 0x35d   : > { %v6771_v60 = vpop.permute.xlu1 %2939 }
 0x360   : > { %848 = vadd.xlane.f32.xlu2 %v6297_v59  ;;  %4211 = vmatmul.msk.f32.gmra.mxu2 %vm389_vm0, %v6261_v18  ;;  %v4546_v59 = vpack.i.bf16 %v6702_v30, %v6699_v5  ;;  %v6744_v30 = vld [vmem:[%s5593_s24 + $0x18] sm:$0xff] }
 0x361   : > { %4243 = vmatmul.msk.f32.gmra.mxu3 %vm389_vm0, %v6261_v18  ;;  %8280 = vst [vmem:[#allocation34_spill] sm:$0xff] %v6744_v30  ;;  %v6747_v5 = vld [vmem:[%s5593_s24 + $0x118] sm:$0xff] }
 0x362   : > { %8281 = vst [vmem:[#allocation41_spill] sm:$0xff] %v6747_v5 }
 0x363   : > { %v6694_v11 = vpop.f32.mrf.mxu2 }
 0x364   : > { %8274 = vst [vmem:[#allocation31_spill] sm:$0xff] %v6694_v11  ;;  %v6696_v31 = vpop.f32.mrf.mxu3 }
 0x365   : > { %8275 = vst [vmem:[#allocation30_spill] sm:$0xff] %v6696_v31 }
 0x368   : > { %4212 = vmatmul.msk.f32.gmra.mxu2 %vm389_vm0, %v6366_v39 }
 0x369   : > { %4244 = vmatmul.msk.f32.gmra.mxu3 %vm389_vm0, %v6366_v39  ;;  %v4526_v39 = vpack.i.bf16 %v6718_v41, %v6715_v1 }
 0x36b   : > { %v6710_v20 = vpop.f32.mrf.mxu2 }
 0x36c   : > { %v6712_v18 = vpop.f32.mrf.mxu3 }
 0x36e   : > { %4547 = vrot.lane.b32.xlu0 %v4546_v59, %s5160_s18 }
 0x370   : > { %4213 = vmatmul.msk.f32.gmra.mxu2 %vm389_vm0, %v6331_v57 }
 0x371   : > { %4245 = vmatmul.msk.f32.gmra.mxu3 %vm389_vm0, %v6331_v57  ;;  %4527 = vrot.lane.b32.xlu1 %v4526_v39, %s5160_s18  ;;  %v4586_v57 = vpack.i.bf16 %v6747_v5, %v6744_v30 }
 0x373   : > { %v6738_v21 = vpop.f32.mrf.mxu2 }
 0x374   : > { %v6740_v42 = vpop.f32.mrf.mxu3 }
 0x376   : > { %4557 = vrot.lane.b32.xlu0 %v4556_v2, %s5160_s18 }
 0x377   : > { %v834_v59 = vpop.xlane.xlu0 %833 }
 0x378   : > { %4676 = vrcp.f32 %v834_v59  ;;  %4517 = vrot.lane.b32.xlu2 %v4516_v53, %s5160_s18  ;;  %4214 = vmatmul.msk.f32.gmra.mxu2 %vm389_vm0, %v6359_v49  ;;  %v963_v53 = vadd.f32 %v6525_v4, %v6520_v28  ;;  %v4536_v59 = vpack.i.bf16 %v6760_v45, %v6757_v38  ;;  %v6782_v28 = vld [vmem:[%s5593_s24 + $0x28] sm:$0xff] }
 0x379   : > { %4246 = vmatmul.msk.f32.gmra.mxu3 %vm389_vm0, %v6359_v49  ;;  %8284 = vst [vmem:[#allocation21_spill] sm:$0xff] %v6782_v28  ;;  %v6785_v4 = vld [vmem:[%s5593_s24 + $0x128] sm:$0xff] }
 0x37a   : > { %8285 = vst [vmem:[#allocation39_spill] sm:$0xff] %v6785_v4 }
 0x37b   : > { %v6762_v39 = vpop.f32.mrf.mxu2 }
 0x37c   : > { %8282 = vst [vmem:[#allocation38_spill] sm:$0xff] %v6762_v39  ;;  %v6764_v2 = vpop.f32.mrf.mxu3 }
 0x37d   : > { %8283 = vst [vmem:[#allocation33_spill] sm:$0xff] %v6764_v2 }
 0x37e   : > { %v4677_v49 = vpop.eup %4676  ;;  %4587 = vrot.lane.b32.xlu0 %v4586_v57, %s5160_s18 }
 0x37f   : > { %v1010_v5 = vmul.f32 %v4677_v49, %v963_v53  ;;  %v843_v30 = vpop.xlane.xlu0 %842  ;;  %v4581_v53 = vpack.i.bf16 %v6785_v4, %v6782_v28 }
 0x380   : > { %4678 = vrcp.f32 %v843_v30  ;;  %4537 = vrot.lane.b32.xlu2 %v4536_v59, %s5160_s18  ;;  %4215 = vmatmul.msk.f32.gmra.mxu2 %vm389_vm0, %v6346_v17 }
 0x381   : > { %1026 = vst.msk [vmem:[#allocation2 + $0x80] sm:$0xff] %vm389_vm0, %v1010_v5  ;;  %4247 = vmatmul.msk.f32.gmra.mxu3 %vm389_vm0, %v6346_v17  ;;  %v972_v5 = vadd.f32 %v6569_v46, %v6565_v50  ;;  %v6805_v50 = vld [vmem:[%s5593_s24 + $0x108] sm:$0xff] }
 0x382   : > { %8288 = vst [vmem:[#allocation20_spill] sm:$0xff] %v6805_v50 }
 0x383   : > { %v6787_v30 = vpop.f32.mrf.mxu2 }
 0x384   : > { %8286 = vst [vmem:[#allocation17_spill] sm:$0xff] %v6787_v30  ;;  %v6789_v57 = vpop.f32.mrf.mxu3  ;;  %v6802_v30 = vld [vmem:[%s5593_s24 + $0x8] sm:$0xff] }
 0x385   : > { %8287 = vst [vmem:[#allocation47_spill] sm:$0xff] %v6802_v30 }
 0x386   : > { %v4679_v59 = vpop.eup %4678 }
 0x387   : > { %v1013_v49 = vmul.f32 %v4679_v59, %v972_v5  ;;  %v966_v59 = vadd.f32 %v6540_v56, %v6538_v16 }
 0x388   : > { %4582 = vrot.lane.b32.xlu2 %v4581_v53, %s5160_s18  ;;  %4216 = vmatmul.msk.f32.gmra.mxu2 %vm389_vm0, %v6443_v6  ;;  %v837_v17 = vpop.xlane.xlu1 %836  ;;  %v4591_v53 = vpack.i.bf16 %v6805_v50, %v6802_v30 }
 0x389   : > { %1029 = vst.msk [vmem:[#allocation2 + $0xb0] sm:$0xff] %vm389_vm0, %v1013_v49  ;;  %4248 = vmatmul.msk.f32.gmra.mxu3 %vm389_vm0, %v6443_v6  ;;  %4680 = vrcp.f32 %v837_v17  ;;  %v969_v6 = vadd.f32 %v6551_v40, %v6549_v9 }
 0x38a   : > { %v840_v46 = vpop.xlane.xlu2 %839 }
 0x38b   : > { %v6807_v4 = vpop.f32.mrf.mxu2  ;;  %4682 = vrcp.f32 %v840_v46 }
 0x38c   : > { %v6809_v5 = vpop.f32.mrf.mxu3 }
 0x38f   : > { %v4681_v49 = vpop.eup %4680 }
 0x390   : > { %v1011_v17 = vmul.f32 %v4681_v49, %v966_v59  ;;  %4592 = vrot.lane.b32.xlu2 %v4591_v53, %s5160_s18  ;;  %4217 = vmatmul.msk.f32.gmra.mxu2 %vm389_vm0, %v6498_v36  ;;  %v6860_v59 = vld [vmem:[%s5593_s24 + $0x88] sm:$0xff] }
 0x391   : > { %v4683_v28 = vpop.eup %4682  ;;  %4249 = vmatmul.msk.f32.gmra.mxu3 %vm389_vm0, %v6498_v36  ;;  %v6863_v49 = vld [vmem:[%s5593_s24 + $0x188] sm:$0xff] }
 0x392   : > { %1027 = vst.msk [vmem:[#allocation2 + $0x90] sm:$0xff] %vm389_vm0, %v1011_v17  ;;  %v1012_v46 = vmul.f32 %v4683_v28, %v969_v6  ;;  %v6857_v53 = vpop.permute.xlu0 %4522 }
 0x393   : > { %v6823_v50 = vpop.f32.mrf.mxu2 }
 0x394   : > { %8289 = vst [vmem:[#allocation24_spill] sm:$0xff] %v6823_v50  ;;  %v6825_v16 = vpop.f32.mrf.mxu3 }
 0x395   : > { %8290 = vst [vmem:[#allocation19_spill] sm:$0xff] %v6825_v16 }
 0x396   : > { %1028 = vst.msk [vmem:[#allocation2 + $0xa0] sm:$0xff] %vm389_vm0, %v1012_v46  ;;  %v1521_v46 = vmax.f32 %v6738_v21, %v6740_v42 }
 0x398   : > { %4218 = vmatmul.msk.f32.gmra.mxu2 %vm389_vm0, %v6487_v15 }
 0x399   : > { %4250 = vmatmul.msk.f32.gmra.mxu3 %vm389_vm0, %v6487_v15  ;;  %v1503_v15 = vmax.f32 %v6651_v14, %v6653_v43 }
 0x39b   : > { %v6832_v56 = vpop.f32.mrf.mxu2  ;;  %854 = vadd.xlane.f32.xlu1 %v6374_v26 }
 0x39c   : > { %8291 = vst [vmem:[#allocation23_spill] sm:$0xff] %v6832_v56  ;;  %v6834_v36 = vpop.f32.mrf.mxu3 }
 0x39d   : > { %8292 = vst [vmem:[#allocation35_spill] sm:$0xff] %v6834_v36 }
 0x3a0   : > { %4219 = vmatmul.msk.f32.gmra.mxu2 %vm389_vm0, %v6612_v44  ;;  %v6919_v36 = vpop.permute.xlu1 %2945 }
 0x3a1   : > { %4251 = vmatmul.msk.f32.gmra.mxu3 %vm389_vm0, %v6612_v44  ;;  %v1512_v44 = vmax.f32 %v6685_v12, %v6687_v10 }
 0x3a3   : > { %v6841_v9 = vpop.f32.mrf.mxu2 }
 0x3a4   : > { %v6843_v40 = vpop.f32.mrf.mxu3 }
 0x3a8   : > { %1504 = vmax.xlane.f32.xlu0 %v1503_v15  ;;  %4220 = vmatmul.msk.f32.gmra.mxu2 %vm389_vm0, %v6626_v47  ;;  %v6879_v15 = vld [vmem:[%s5593_s24 + $0x68] sm:$0xff] }
 0x3a9   : > { %4252 = vmatmul.msk.f32.gmra.mxu3 %vm389_vm0, %v6626_v47  ;;  %v4551_v47 = vpack.i.bf16 %v6863_v49, %v6860_v59  ;;  %8295 = vst [vmem:[#allocation22_spill] sm:$0xff] %v6879_v15 }
 0x3ab   : > { %v6851_v26 = vpop.f32.mrf.mxu2 }
 0x3ac   : > { %v6853_v28 = vpop.f32.mrf.mxu3 }
 0x3b0   : > { %1513 = vmax.xlane.f32.xlu0 %v1512_v44  ;;  %4221 = vmatmul.msk.f32.gmra.mxu2 %vm389_vm0, %v6608_v35  ;;  %v6882_v44 = vld [vmem:[%s5593_s24 + $0x168] sm:$0xff] }
 0x3b1   : > { %4253 = vmatmul.msk.f32.gmra.mxu3 %vm389_vm0, %v6608_v35  ;;  %8296 = vst [vmem:[#allocation42_spill] sm:$0xff] %v6882_v44  ;;  %v1506_v35 = vmax.f32 %v6659_v51, %v6663_v25  ;;  %v6902_v25 = vld [vmem:[%s5593_s24 + $0x58] sm:$0xff] }
 0x3b2   : > { %8299 = vst [vmem:[#allocation29_spill] sm:$0xff] %v6902_v25  ;;  %v6905_v51 = vld [vmem:[%s5593_s24 + $0x158] sm:$0xff] }
 0x3b3   : > { %v6871_v6 = vpop.f32.mrf.mxu2  ;;  %8300 = vst [vmem:[#allocation25_spill] sm:$0xff] %v6905_v51 }
 0x3b4   : > { %8293 = vst [vmem:[#allocation27_spill] sm:$0xff] %v6871_v6  ;;  %v6873_v17 = vpop.f32.mrf.mxu3  ;;  %4552 = vrot.lane.b32.xlu1 %v4551_v47, %s5160_s18  ;;  %v6888_v6 = vpop.permute.xlu0 %4532  ;;  %v4561_v47 = vpack.i.bf16 %v6882_v44, %v6879_v15 }
 0x3b5   : > { %8294 = vst [vmem:[#allocation44_spill] sm:$0xff] %v6873_v17  ;;  %v1530_v17 = vmax.f32 %v6807_v4, %v6809_v5 }
 0x3b8   : > { %1522 = vmax.xlane.f32.xlu0 %v1521_v46  ;;  %4270 = vmatmul.msk.f32.vlgmr.msrb.gmra.mxu2 %vm389_vm0, %v6522_v58 }
 0x3b9   : > { %4302 = vmatmul.msk.f32.vlgmr.msrb.gmra.mxu3 %vm389_vm0, %v6522_v58  ;;  %1507 = vmax.xlane.f32.xlu2 %v1506_v35  ;;  %v1515_v58 = vmax.f32 %v6694_v11, %v6696_v31  ;;  %v6909_v35 = vpop.permute.xlu2 %2941  ;;  %v1539_v31 = vmax.f32 %v6841_v9, %v6843_v40  ;;  %v6928_v11 = vld [vmem:[%s5593_s24 + $0x148] sm:$0xff] }
 0x3bb   : > { %v6896_v30 = vpop.f32.mrf.mxu2 }
 0x3bc   : > { %8297 = vst [vmem:[#allocation43_spill] sm:$0xff] %v6896_v30  ;;  %4562 = vrot.lane.b32.xlu1 %v4561_v47, %s5160_s18  ;;  %v6899_v46 = vpop.f32.mrf.mxu3  ;;  %v4566_v47 = vpack.i.bf16 %v6905_v51, %v6902_v25  ;;  %v6917_v56 = vpop.permute.xlu0 %4542 }
 0x3bd   : > { %8298 = vst [vmem:[#allocation26_spill] sm:$0xff] %v6899_v46 }
 0x3c0   : > { %1531 = vmax.xlane.f32.xlu0 %v1530_v17  ;;  %4271 = vmatmul.msk.f32.gmra.mxu2 %vm389_vm0, %v6464_v32  ;;  %v6925_v17 = vld [vmem:[%s5593_s24 + $0x48] sm:$0xff] }
 0x3c1   : > { %4303 = vmatmul.msk.f32.gmra.mxu3 %vm389_vm0, %v6464_v32  ;;  %1516 = vmax.xlane.f32.xlu2 %v1515_v58  ;;  %v1524_v32 = vmax.f32 %v6762_v39, %v6764_v2  ;;  %v4571_v25 = vpack.i.bf16 %v6928_v11, %v6925_v17 }
 0x3c3   : > { %v6932_v58 = vpop.f32.mrf.mxu2 }
 0x3c4   : > { %4567 = vrot.lane.b32.xlu1 %v4566_v47, %s5160_s18  ;;  %8301 = vst [vmem:[#allocation28_spill] sm:$0xff] %v6932_v58  ;;  %v6934_v51 = vpop.f32.mrf.mxu3  ;;  %v6940_v47 = vpop.permute.xlu2 %2943 }
 0x3c5   : > { %8302 = vst [vmem:[#allocation45_spill] sm:$0xff] %v6934_v51 }
 0x3c8   : > { %1540 = vmax.xlane.f32.xlu0 %v1539_v31  ;;  %4272 = vmatmul.msk.f32.gmra.mxu2 %vm389_vm0, %v6512_v55  ;;  %v1533_v31 = vmax.f32 %v6823_v50, %v6825_v16 }
 0x3c9   : > { %4304 = vmatmul.msk.f32.gmra.mxu3 %vm389_vm0, %v6512_v55  ;;  %1525 = vmax.xlane.f32.xlu2 %v1524_v32  ;;  %v975_v55 = vadd.f32 %v6582_v8, %v6576_v33  ;;  %v978_v33 = vadd.f32 %v6593_v27, %v6591_v61  ;;  %v8149_v61 = vunpack.i.l.bf16 %v6857_v53 }
 0x3cb   : > { %v846_v44 = vpop.xlane.xlu1 %845  ;;  %v6949_v2 = vpop.f32.mrf.mxu2 }
 0x3cc   : > { %4684 = vrcp.f32 %v846_v44  ;;  %4572 = vrot.lane.b32.xlu1 %v4571_v25, %s5160_s18  ;;  %v6955_v32 = vpop.f32.mrf.mxu3  ;;  %v981_v25 = vadd.f32 %v6610_v7, %v6606_v63 }
 0x3cd   : > { %v852_v15 = vpop.xlane.xlu0 %851 }
 0x3ce   : > { %4686 = vrcp.f32 %v852_v15 }
 0x3d0   : > { %4273 = vmatmul.msk.f32.gmra.mxu2 %vm389_vm0, %v6542_v48 }
 0x3d1   : > { %4305 = vmatmul.msk.f32.gmra.mxu3 %vm389_vm0, %v6542_v48  ;;  %1534 = vmax.xlane.f32.xlu2 %v1533_v31  ;;  %v1542_v48 = vmax.f32 %v6851_v26, %v6853_v28 }
 0x3d2   : > { %v4685_v44 = vpop.eup %4684 }
 0x3d3   : > { %v849_v15 = vpop.xlane.xlu2 %848  ;;  %v1014_v50 = vmul.f32 %v4685_v44, %v975_v55  ;;  %v6969_v7 = vpop.f32.mrf.mxu2  ;;  %v8145_v44 = vunpack.i.l.bf16 %v6888_v6 }
 0x3d4   : > { %v4687_v16 = vpop.eup %4686  ;;  %4688 = vrcp.f32 %v849_v15  ;;  %v6974_v31 = vpop.f32.mrf.mxu3 }
 0x3d5   : > { %v1016_v39 = vmul.f32 %v4687_v16, %v981_v25  ;;  %1030 = vst.msk [vmem:[#allocation2 + $0xc0] sm:$0xff] %vm389_vm0, %v1014_v50  ;;  %v8148_v16 = vunpack.i.h.bf16 %v6857_v53 }
 0x3d7   : > { %1032 = vst.msk [vmem:[#allocation2 + $0xe0] sm:$0xff] %vm389_vm0, %v1016_v39 }
 0x3d8   : > { %4274 = vmatmul.msk.f32.gmra.mxu2 %vm389_vm0, %v6485_v19 }
 0x3d9   : > { %4306 = vmatmul.msk.f32.gmra.mxu3 %vm389_vm0, %v6485_v19  ;;  %1543 = vmax.xlane.f32.xlu2 %v1542_v48  ;;  %v2433_v19 = vmax.f32 %v6896_v30, %v6899_v46 }
 0x3da   : > { %v4689_v8 = vpop.eup %4688 }
 0x3db   : > { %v1015_v63 = vmul.f32 %v4689_v8, %v978_v33  ;;  %v6971_v50 = vpop.permute.xlu2 %4517  ;;  %v6997_v25 = vpop.f32.mrf.mxu2  ;;  %v8144_v33 = vunpack.i.h.bf16 %v6888_v6 }
 0x3dc   : > { %v8150_v39 = vunpack.i.h.bf16 %v6971_v50  ;;  %v8157_v55 = vunpack.i.l.bf16 %v6971_v50  ;;  %v7002_v8 = vpop.f32.mrf.mxu3 }
 0x3dd   : > { %1031 = vst.msk [vmem:[#allocation2 + $0xd0] sm:$0xff] %vm389_vm0, %v1015_v63 }
 0x3de   : > { %4327 = vmatpush.msra.mxu2 %v8157_v55  ;;  %4343 = vmatpush.msra.mxu3 %v8150_v39 }
 0x3e0   : > { %4275 = vmatmul.msk.f32.gmra.mxu2 %vm389_vm0, %v6535_v23  ;;  %4344 = vmatpush.msra.mxu3 %v8148_v16 }
 0x3e1   : > { %4307 = vmatmul.msk.f32.gmra.mxu3 %vm389_vm0, %v6535_v23  ;;  %4328 = vmatpush.msra.mxu2 %v8149_v61 }
 0x3e2   : > { %2434 = vmax.xlane.f32.xlu2 %v2433_v19  ;;  %v1500_v19 = vmax.f32 %v6636_v54, %v6638_v52 }
 0x3e3   : > { %v6994_v27 = vpop.permute.xlu1 %4527  ;;  %v7016_v23 = vpop.f32.mrf.mxu2 }
 0x3e4   : > { %v8146_v15 = vunpack.i.h.bf16 %v6994_v27  ;;  %v8147_v48 = vunpack.i.l.bf16 %v6994_v27  ;;  %8303 = vst [vmem:[#allocation46_spill] sm:$0xff] %v7016_v23  ;;  %v7018_v63 = vpop.f32.mrf.mxu3 }
 0x3e6   : > { %4329 = vmatpush.msra.mxu2 %v8147_v48  ;;  %4345 = vmatpush.msra.mxu3 %v8146_v15 }
 0x3e8   : > { %4276 = vmatmul.msk.f32.gmra.mxu2 %vm389_vm0, %v6644_v0  ;;  %4346 = vmatpush.msra.mxu3 %v8144_v33  ;;  %v8155_v33 = vunpack.i.h.bf16 %v6917_v56 }
 0x3e9   : > { %4308 = vmatmul.msk.f32.gmra.mxu3 %vm389_vm0, %v6644_v0  ;;  %4330 = vmatpush.msra.mxu2 %v8145_v44  ;;  %v7028_v0 = vpop.permute.xlu2 %4537  ;;  %v8152_v44 = vunpack.i.l.bf16 %v6917_v56 }
 0x3ea   : > { %v8156_v48 = vunpack.i.l.bf16 %v7028_v0 }
 0x3eb   : > { %v7032_v15 = vpop.f32.mrf.mxu2 }
 0x3ec   : > { %8304 = vst [vmem:[#allocation48_spill] sm:$0xff] %v7032_v15  ;;  %v7038_v16 = vpop.f32.mrf.mxu3  ;;  %4331 = vmatpush.msra.mxu2 %v8156_v48 }
 0x3ed   : > { %8305 = vst [vmem:[#allocation49_spill] sm:$0xff] %v7038_v16 }
 0x3ee   : > { %4332 = vmatpush.msra.mxu2 %v8152_v44 }
 0x3f0   : > { %4277 = vmatmul.msk.f32.gmra.mxu2 %vm389_vm0, %v6595_v24 }
 0x3f1   : > { %4309 = vmatmul.msk.f32.gmra.mxu3 %vm389_vm0, %v6595_v24  ;;  %v8151_v24 = vunpack.i.h.bf16 %v7028_v0 }
 0x3f3   : > { %4347 = vmatpush.msra.mxu3 %v8151_v24 }
 0x3f4   : > { %v7062_v24 = vpop.f32.mrf.mxu3 }
 0x3f5   : > { %4348 = vmatpush.msra.mxu3 %v8155_v33  ;;  %8307 = vst [vmem:[#allocation51_spill] sm:$0xff] %v7062_v24 }
 0x3f6   : > { %1501 = vmax.xlane.f32.xlu1 %v1500_v19  ;;  %v7040_v19 = vpop.permute.xlu0 %4547 }
 0x3f7   : > { %v8154_v61 = vunpack.i.h.bf16 %v7040_v19  ;;  %v8153_v39 = vunpack.i.l.bf16 %v7040_v19 }
 0x3f8   : > { %4278 = vmatmul.msk.f32.gmra.mxu2 %vm389_vm0, %v6642_v29 }
 0x3f9   : > { %4310 = vmatmul.msk.f32.gmra.mxu3 %vm389_vm0, %v6642_v29  ;;  %4333 = vmatpush.msra.mxu2 %v8153_v39  ;;  %v7060_v29 = vpop.f32.mrf.mxu2  ;;  %v7071_v39 = vld [vmem:[%s5593_s24 + $0x38] sm:$0xff] }
 0x3fa   : > { %4349 = vmatpush.msra.mxu3 %v8154_v61  ;;  %8306 = vst [vmem:[#allocation50_spill] sm:$0xff] %v7060_v29  ;;  %v7074_v61 = vld [vmem:[%s5593_s24 + $0x138] sm:$0xff] }
 0x3fb   : > { %v4576_v33 = vpack.i.bf16 %v7074_v61, %v7071_v39 }
 0x3fc   : > { %v7080_v48 = vpop.f32.mrf.mxu3 }
 0x3fd   : > { %8309 = vst [vmem:[#allocation53_spill] sm:$0xff] %v7080_v48 }
 0x3fe   : > { %v7064_v44 = vpop.permute.xlu0 %4557 }
 0x400   : > { %4279 = vmatmul.msk.f32.gmra.mxu2 %vm389_vm0, %v6614_v34 }
 0x401   : > { %4311 = vmatmul.msk.f32.gmra.mxu3 %vm389_vm0, %v6614_v34  ;;  %v7078_v34 = vpop.f32.mrf.mxu2 }
 0x402   : > { %8308 = vst [vmem:[#allocation52_spill] sm:$0xff] %v7078_v34 }
 0x404   : > { %v7092_v34 = vpop.f32.mrf.mxu3 }
 0x406   : > { %v7085_v46 = vpop.permute.xlu0 %4587 }
 0x408   : > { %4280 = vmatmul.msk.f32.gmra.mxu2 %vm389_vm0, %v6720_v22 }
 0x409   : > { %4312 = vmatmul.msk.f32.gmra.mxu3 %vm389_vm0, %v6720_v22  ;;  %v7089_v30 = vpop.f32.mrf.mxu2 }
 0x40e   : > { %v855_v55 = vpop.xlane.xlu1 %854 }
 0x40f   : > { %4690 = vrcp.f32 %v855_v55  ;;  %4577 = vrot.lane.b32.xlu1 %v4576_v33, %s5160_s18 }
 0x410   : > { %4281 = vmatmul.msk.f32.gmra.mxu2 %vm389_vm0, %v6777_v62 }
 0x411   : > { %4313 = vmatmul.msk.f32.gmra.mxu3 %vm389_vm0, %v6777_v62 }
 0x415   : > { %v4691_v22 = vpop.eup %4690 }
 0x416   : > { %v1017_v15 = vmul.f32 %v4691_v22, %v6628_v37  ;;  %v7103_v37 = vpop.f32.mrf.mxu2 }
 0x417   : > { %8310 = vst [vmem:[#allocation54_spill] sm:$0xff] %v7103_v37  ;;  %v8167_v37 = vunpack.i.l.bf16 %v7064_v44 }
 0x418   : > { %4282 = vmatmul.msk.f32.gmra.mxu2 %vm389_vm0, %v6771_v60  ;;  %1033 = vst.msk [vmem:[#allocation2 + $0xf0] sm:$0xff] %vm389_vm0, %v1017_v15  ;;  %v7107_v15 = vpop.f32.mrf.mxu3 }
 0x419   : > { %4314 = vmatmul.msk.f32.gmra.mxu3 %vm389_vm0, %v6771_v60  ;;  %8311 = vst [vmem:[#allocation55_spill] sm:$0xff] %v7107_v15  ;;  %v2141_v15 = vld [vmem:[%s5593_s24 + $0xe8] sm:$0xff] }
 0x41a   : > { %2626 = vmatpush.msra.mxu0 %v2141_v15 }
 0x41b   : > { %v1505_v55 = vpop.xlane.xlu0 %1504 }
 0x41c   : > { %v1550_v33 = vsub.f32 %v6651_v14, %v1505_v55  ;;  %v1551_v62 = vsub.f32 %v6653_v43, %v1505_v55  ;;  %2627 = vmatpush.msra.mxu0 %v6715_v1 }
 0x41e   : > { %v1584_v48 = vmul.f32 1.442695, %v1550_v33  ;;  %v1586_v16 = vmul.f32 1.442695, %v1551_v62  ;;  %v8169_v33 = vunpack.i.h.bf16 %v7064_v44 }
 0x420   : > { %4692 = vpow2.f32 %v1584_v48  ;;  %4283 = vmatmul.msk.f32.gmra.mxu2 %vm389_vm0, %v6909_v35 }
 0x421   : > { %4694 = vpow2.f32 %v1586_v16  ;;  %4315 = vmatmul.msk.f32.gmra.mxu3 %vm389_vm0, %v6909_v35 }
 0x423   : > { %v1514_v60 = vpop.xlane.xlu0 %1513 }
 0x424   : > { %v1556_v22 = vsub.f32 %v6685_v12, %v1514_v60  ;;  %v1557_v14 = vsub.f32 %v6687_v10, %v1514_v60 }
 0x426   : > { %v7111_v43 = vpop.eup %4692  ;;  %v1596_v55 = vmul.f32 1.442695, %v1556_v22  ;;  %v1598_v48 = vmul.f32 1.442695, %v1557_v14  ;;  %v7116_v62 = vpop.permute.xlu1 %4552 }
 0x427   : > { %v7113_v16 = vpop.eup %4694  ;;  %v8165_v12 = vunpack.i.h.bf16 %v7116_v62  ;;  %v8166_v10 = vunpack.i.l.bf16 %v7116_v62  ;;  %v7131_v22 = vpop.f32.mrf.mxu2 }
 0x428   : > { %4696 = vpow2.f32 %v1596_v55  ;;  %v1647_v35 = vadd.f32 %v7113_v16, %v7111_v43  ;;  %4284 = vmatmul.msk.f32.gmra.mxu2 %vm389_vm0, %v6940_v47  ;;  %8312 = vst [vmem:[#allocation56_spill] sm:$0xff] %v7131_v22  ;;  %v7133_v14 = vpop.f32.mrf.mxu3 }
 0x429   : > { %4698 = vpow2.f32 %v1598_v48  ;;  %4316 = vmatmul.msk.f32.gmra.mxu3 %vm389_vm0, %v6940_v47  ;;  %4334 = vmatpush.msra.mxu2 %v8166_v10  ;;  %8313 = vst [vmem:[#allocation57_spill] sm:$0xff] %v7133_v14 }
 0x42a   : > { %1648 = vadd.xlane.f32.xlu2 %v1647_v35  ;;  %4350 = vmatpush.msra.mxu3 %v8165_v12 }
 0x42b   : > { %v1523_v60 = vpop.xlane.xlu0 %1522  ;;  %4335 = vmatpush.msra.mxu2 %v8167_v37 }
 0x42c   : > { %4351 = vmatpush.msra.mxu3 %v8169_v33  ;;  %v1562_v47 = vsub.f32 %v6738_v21, %v1523_v60  ;;  %v1563_v35 = vsub.f32 %v6740_v42, %v1523_v60  ;;  %v2454_v60 = vmax.f32 %v7060_v29, %v7062_v24 }
 0x42e   : > { %v7139_v55 = vpop.eup %4696  ;;  %v7145_v12 = vpop.permute.xlu1 %4562  ;;  %v1608_v33 = vmul.f32 1.442695, %v1562_v47  ;;  %v1610_v21 = vmul.f32 1.442695, %v1563_v35  ;;  %v2157_v47 = vld [vmem:[%s5593_s24 + $0x1e8] sm:$0xff] }
 0x42f   : > { %v7142_v48 = vpop.eup %4698  ;;  %v8173_v37 = vunpack.i.h.bf16 %v7145_v12  ;;  %v8174_v22 = vunpack.i.l.bf16 %v7145_v12  ;;  %v7164_v23 = vpop.f32.mrf.mxu2  ;;  %2691 = vmatpush.msra.mxu1 %v2157_v47 }
 0x430   : > { %v1656_v10 = vadd.f32 %v7142_v48, %v7139_v55  ;;  %4285 = vmatmul.msk.f32.gmra.mxu2 %vm389_vm0, %v6919_v36  ;;  %4700 = vpow2.f32 %v1608_v33  ;;  %8314 = vst [vmem:[#allocation58_spill] sm:$0xff] %v7164_v23 }
 0x431   : > { %4317 = vmatmul.msk.f32.gmra.mxu3 %vm389_vm0, %v6919_v36  ;;  %4336 = vmatpush.msra.mxu2 %v8174_v22  ;;  %v7166_v36 = vpop.f32.mrf.mxu3  ;;  %4702 = vpow2.f32 %v1610_v21  ;;  %v2139_v22 = vld [vmem:[%s5593_s24 + $0xc8] sm:$0xff] }
 0x432   : > { %1657 = vadd.xlane.f32.xlu2 %v1656_v10  ;;  %4352 = vmatpush.msra.mxu3 %v8173_v37  ;;  %8315 = vst [vmem:[#allocation59_spill] sm:$0xff] %v7166_v36  ;;  %v1509_v37 = vmax.f32 %v6672_v13, %v6675_v3  ;;  %v8342_v36 = vld [vmem:[#allocation20_spill] sm:$0xff] }
 0x433   : > { %v1532_v42 = vpop.xlane.xlu0 %1531  ;;  %2692 = vmatpush.msra.mxu1 %v6718_v41  ;;  %v2155_v41 = vld [vmem:[%s5593_s24 + $0x1c8] sm:$0xff]  ;;  %2628 = vmatpush.msra.mxu0 %v2139_v22 }
 0x434   : > { %v1568_v14 = vsub.f32 %v6807_v4, %v1532_v42  ;;  %v1569_v10 = vsub.f32 %v6809_v5, %v1532_v42  ;;  %v2137_v22 = vld [vmem:[%s5593_s24 + $0xa8] sm:$0xff] }
 0x435   : > { %2693 = vmatpush.msra.mxu1 %v2155_v41  ;;  %2629 = vmatpush.msra.mxu0 %v6757_v38  ;;  %v2153_v41 = vld [vmem:[%s5593_s24 + $0x1a8] sm:$0xff]  ;;  %v8318_v38 = vld [vmem:[#allocation40_spill] sm:$0xff] }
 0x436   : > { %v7169_v35 = vpop.permute.xlu1 %4567  ;;  %v1620_v21 = vmul.f32 1.442695, %v1568_v14  ;;  %v1622_v5 = vmul.f32 1.442695, %v1569_v10  ;;  %v7179_v42 = vpop.eup %4700 }
 0x437   : > { %v8175_v33 = vunpack.i.h.bf16 %v7169_v35  ;;  %v8176_v4 = vunpack.i.l.bf16 %v7169_v35  ;;  %v7183_v47 = vpop.eup %4702  ;;  %v7189_v14 = vpop.permute.xlu2 %4582  ;;  %2694 = vmatpush.msra.mxu1 %v6760_v45  ;;  %2630 = vmatpush.msra.mxu0 %v2137_v22  ;;  %v8319_v45 = vld [vmem:[#allocation16_spill] sm:$0xff] }
 0x438   : > { %4704 = vpow2.f32 %v1620_v21  ;;  %v1665_v10 = vadd.f32 %v7183_v47, %v7179_v42  ;;  %v1518_v21 = vmax.f32 %v6710_v20, %v6712_v18  ;;  %v8321_v22 = vld [vmem:[#allocation36_spill] sm:$0xff] }
 0x439   : > { %1510 = vmax.xlane.f32.xlu1 %v1509_v37  ;;  %4337 = vmatpush.msra.mxu2 %v8176_v4  ;;  %4706 = vpow2.f32 %v1622_v5 }
 0x43a   : > { %2455 = vmax.xlane.f32.xlu2 %v2454_v60  ;;  %4353 = vmatpush.msra.mxu3 %v8175_v33  ;;  %v7199_v33 = vpop.f32.mrf.mxu3 }
 0x43b   : > { %v1541_v15 = vpop.xlane.xlu0 %1540  ;;  %8317 = vst [vmem:[#allocation61_spill] sm:$0xff] %v7199_v33  ;;  %2695 = vmatpush.msra.mxu1 %v2153_v41  ;;  %2631 = vmatpush.msra.mxu0 %v8318_v38  ;;  %v8322_v41 = vld [vmem:[#allocation37_spill] sm:$0xff]  ;;  %v8335_v33 = vld [vmem:[#allocation34_spill] sm:$0xff] }
 0x43c   : > { %v1574_v1 = vsub.f32 %v6841_v9, %v1541_v15  ;;  %v1575_v37 = vsub.f32 %v6843_v40, %v1541_v15  ;;  %v7197_v9 = vpop.f32.mrf.mxu2 }
 0x43d   : > { %8316 = vst [vmem:[#allocation60_spill] sm:$0xff] %v7197_v9  ;;  %2696 = vmatpush.msra.mxu1 %v8319_v45  ;;  %2632 = vmatpush.msra.mxu0 %v6860_v59  ;;  %v8324_v59 = vld [vmem:[#allocation22_spill] sm:$0xff]  ;;  %v8334_v9 = vld [vmem:[#allocation39_spill] sm:$0xff] }
 0x43e   : > { %v7191_v60 = vpop.permute.xlu1 %4572  ;;  %v1632_v15 = vmul.f32 1.442695, %v1574_v1  ;;  %v1634_v4 = vmul.f32 1.442695, %v1575_v37  ;;  %v7209_v24 = vpop.eup %4704  ;;  %v8320_v37 = vld [vmem:[#allocation17_spill] sm:$0xff] }
 0x43f   : > { %v8179_v5 = vunpack.i.h.bf16 %v7191_v60  ;;  %v8180_v40 = vunpack.i.l.bf16 %v7191_v60  ;;  %v7213_v29 = vpop.eup %4706  ;;  %2697 = vmatpush.msra.mxu1 %v6863_v49  ;;  %2633 = vmatpush.msra.mxu0 %v8321_v22  ;;  %v8327_v49 = vld [vmem:[#allocation29_spill] sm:$0xff] }
 0x440   : > { %4708 = vpow2.f32 %v1632_v15  ;;  %v1674_v1 = vadd.f32 %v7213_v29, %v7209_v24 }
 0x441   : > { %1519 = vmax.xlane.f32.xlu1 %v1518_v21  ;;  %4338 = vmatpush.msra.mxu2 %v8180_v40  ;;  %4710 = vpow2.f32 %v1634_v4  ;;  %v7223_v21 = vpop.permute.xlu2 %4592  ;;  %v8330_v40 = vld [vmem:[#allocation23_spill] sm:$0xff] }
 0x442   : > { %1666 = vadd.xlane.f32.xlu2 %v1665_v10  ;;  %4354 = vmatpush.msra.mxu3 %v8179_v5  ;;  %v1527_v10 = vmax.f32 %v8320_v37, %v6789_v57  ;;  %v7228_v4 = vpop.f32.mrf.mxu3  ;;  %v8326_v5 = vld [vmem:[#allocation42_spill] sm:$0xff] }
 0x443   : > { %2698 = vmatpush.msra.mxu1 %v8322_v41  ;;  %2634 = vmatpush.msra.mxu0 %v8324_v59  ;;  %v8331_v59 = vld [vmem:[#allocation21_spill] sm:$0xff] }
 0x444   : > { %v7226_v15 = vpop.f32.mrf.mxu2 }
 0x445   : > { %2699 = vmatpush.msra.mxu1 %v8326_v5  ;;  %2635 = vmatpush.msra.mxu0 %v8327_v49 }
 0x446   : > { %v7231_v38 = vpop.eup %4708 }
 0x447   : > { %8323 = vst [vmem:[#allocation40_spill] sm:$0xff] %v7231_v38  ;;  %v7234_v45 = vpop.eup %4710  ;;  %2636 = vmatpush.msra.mxu0 %v6925_v17 }
 0x448   : > { %8325 = vst [vmem:[#allocation16_spill] sm:$0xff] %v7234_v45  ;;  %v1683_v22 = vadd.f32 %v7234_v45, %v7231_v38  ;;  %v8339_v45 = vld [vmem:[#allocation47_spill] sm:$0xff] }
 0x449   : > { %1528 = vmax.xlane.f32.xlu1 %v1527_v10  ;;  %v8329_v10 = vld [vmem:[#allocation35_spill] sm:$0xff]  ;;  %2637 = vmatpush.msra.mxu0 %v7071_v39  ;;  %v1508_v5 = vpop.xlane.xlu2 %1507  ;;  %v8337_v39 = vld [vmem:[#allocation41_spill] sm:$0xff] }
 0x44a   : > { %1675 = vadd.xlane.f32.xlu2 %v1674_v1  ;;  %v8328_v1 = vld [vmem:[#allocation25_spill] sm:$0xff]  ;;  %v1536_v41 = vmax.f32 %v8330_v40, %v8329_v10  ;;  %v8341_v38 = vld [vmem:[#allocation27_spill] sm:$0xff] }
 0x44b   : > { %2700 = vmatpush.msra.mxu1 %v8328_v1  ;;  %2638 = vmatpush.msra.mxu0 %v8331_v59  ;;  %v7250_v1 = vpop.f32.mrf.mxu3  ;;  %v8340_v59 = vld [vmem:[#allocation44_spill] sm:$0xff] }
 0x44c   : > { %v7248_v49 = vpop.f32.mrf.mxu2  ;;  %8333 = vst [vmem:[#allocation36_spill] sm:$0xff] %v7250_v1  ;;  %v1545_v23 = vmax.f32 %v8341_v38, %v8340_v59 }
 0x44d   : > { %2701 = vmatpush.msra.mxu1 %v6928_v11  ;;  %8332 = vst [vmem:[#allocation17_spill] sm:$0xff] %v7248_v49  ;;  %v2478_v17 = vmax.f32 %v7248_v49, %v7250_v1  ;;  %2639 = vmatpush.msra.mxu0 %v8335_v33  ;;  %v8336_v11 = vld [vmem:[#allocation18_spill] sm:$0xff]  ;;  %v2436_v33 = vmax.f32 %v6932_v58, %v6934_v51  ;;  %v8346_v58 = vld [vmem:[#allocation33_spill] sm:$0xff] }
 0x44e   : > { %v8344_v1 = vld [vmem:[#allocation30_spill] sm:$0xff] }
 0x44f   : > { %2702 = vmatpush.msra.mxu1 %v7074_v61  ;;  %2640 = vmatpush.msra.mxu0 %v8339_v45  ;;  %v8343_v45 = vld [vmem:[#allocation31_spill] sm:$0xff] }
 0x451   : > { %1537 = vmax.xlane.f32.xlu1 %v1536_v41  ;;  %2703 = vmatpush.msra.mxu1 %v8334_v9  ;;  %v8338_v41 = vld [vmem:[#allocation32_spill] sm:$0xff] }
 0x452   : > { %1684 = vadd.xlane.f32.xlu2 %v1683_v22  ;;  %v1552_v22 = vsub.f32 %v8336_v11, %v1508_v5  ;;  %v1553_v61 = vsub.f32 %v8338_v41, %v1508_v5  ;;  %v1517_v11 = vpop.xlane.xlu2 %1516 }
 0x453   : > { %2704 = vmatpush.msra.mxu1 %v8337_v39  ;;  %v1558_v41 = vsub.f32 %v8343_v45, %v1517_v11  ;;  %v1559_v49 = vsub.f32 %v8344_v1, %v1517_v11  ;;  %v2442_v45 = vmax.f32 %v6969_v7, %v6974_v31  ;;  %v8345_v1 = vld [vmem:[#allocation38_spill] sm:$0xff] }
 0x454   : > { %v1588_v9 = vmul.f32 1.442695, %v1552_v22  ;;  %v1590_v10 = vmul.f32 1.442695, %v1553_v61 }
 0x455   : > { %2705 = vmatpush.msra.mxu1 %v8342_v36 }
 0x456   : > { %4712 = vpow2.f32 %v1588_v9 }
 0x457   : > { %4714 = vpow2.f32 %v1590_v10 }
 0x459   : > { %1546 = vmax.xlane.f32.xlu1 %v1545_v23  ;;  %v1600_v23 = vmul.f32 1.442695, %v1558_v41 }
 0x45a   : > { %2479 = vmax.xlane.f32.xlu2 %v2478_v17  ;;  %v1602_v17 = vmul.f32 1.442695, %v1559_v49  ;;  %v1526_v61 = vpop.xlane.xlu2 %1525 }
 0x45b   : > { %4716 = vpow2.f32 %v1600_v23  ;;  %v1564_v11 = vsub.f32 %v8345_v1, %v1526_v61  ;;  %v1565_v59 = vsub.f32 %v8346_v58, %v1526_v61  ;;  %v8348_v58 = vunpack.i.h.bf16 %v6971_v50 }
 0x45c   : > { %v7265_v39 = vpop.eup %4712  ;;  %4718 = vpow2.f32 %v1602_v17  ;;  %v8347_v17 = vunpack.i.l.bf16 %v6971_v50  ;;  %v8350_v61 = vunpack.i.h.bf16 %v6857_v53 }
 0x45d   : > { %v7267_v5 = vpop.eup %4714  ;;  %v1612_v49 = vmul.f32 1.442695, %v1564_v11  ;;  %v8353_v11 = vunpack.i.l.bf16 %v6888_v6 }
 0x45e   : > { %v1650_v36 = vadd.f32 %v7267_v5, %v7265_v39 }
 0x461   : > { %2437 = vmax.xlane.f32.xlu1 %v2436_v33  ;;  %v7279_v41 = vpop.eup %4716 }
 0x462   : > { %v1535_v1 = vpop.xlane.xlu2 %1534 }
 0x469   : > { %1651 = vadd.xlane.f32.xlu1 %v1650_v36  ;;  %v1502_v22 = vpop.xlane.xlu1 %1501  ;;  %v7281_v36 = vpop.eup %4718 }
 0x46a   : > { %v1548_v10 = vsub.f32 %v6636_v54, %v1502_v22  ;;  %v1549_v9 = vsub.f32 %v6638_v52, %v1502_v22  ;;  %v1614_v54 = vmul.f32 1.442695, %v1565_v59  ;;  %v8349_v59 = vunpack.i.l.bf16 %v6857_v53 }
 0x46b   : > { %v8354_v53 = vunpack.i.h.bf16 %v6888_v6  ;;  %v8359_v6 = vunpack.i.l.bf16 %v6917_v56 }
 0x46c   : > { %v1580_v33 = vmul.f32 1.442695, %v1548_v10  ;;  %v1582_v51 = vmul.f32 1.442695, %v1549_v9  ;;  %v8351_v10 = vunpack.i.l.bf16 %v6994_v27 }
 0x46e   : > { %4720 = vpow2.f32 %v1580_v33  ;;  %v8352_v33 = vunpack.i.h.bf16 %v6994_v27  ;;  %v8356_v27 = vld [vmem:[#allocation24_spill] sm:$0xff] }
 0x46f   : > { %4722 = vpow2.f32 %v1582_v51  ;;  %v1659_v51 = vadd.f32 %v7281_v36, %v7279_v41 }
 0x470   : > { %4724 = vpow2.f32 %v1612_v49  ;;  %v8355_v49 = vunpack.i.l.bf16 %v7028_v0 }
 0x471   : > { %2443 = vmax.xlane.f32.xlu1 %v2442_v45  ;;  %4726 = vpow2.f32 %v1614_v54  ;;  %v2439_v45 = vmax.f32 %v6949_v2, %v6955_v32  ;;  %v1570_v54 = vsub.f32 %v8356_v27, %v1535_v1  ;;  %v8369_v27 = vunpack.i.l.bf16 %v7169_v35 }
 0x474   : > { %v4721_v52 = vpop.eup %4720 }
 0x475   : > { %v4723_v23 = vpop.eup %4722  ;;  %1836 = vmatmul.f32.vlgmr.msrb.gmra.mxu0 %v4721_v52 }
 0x476   : > { %1901 = vmatmul.f32.vlgmr.msrb.gmra.mxu1 %v4723_v23  ;;  %3589 = vmatpush.msrb.mxu0 %v8347_v17  ;;  %v1644_v22 = vadd.f32 %v4723_v23, %v4721_v52  ;;  %v7295_v9 = vpop.eup %4724  ;;  %v8357_v52 = vunpack.i.h.bf16 %v7028_v0  ;;  %v8358_v17 = vld [vmem:[#allocation19_spill] sm:$0xff]  ;;  %v1624_v0 = vmul.f32 1.442695, %v1570_v54  ;;  %v8370_v54 = vunpack.i.h.bf16 %v7169_v35 }
 0x477   : > { %3654 = vmatpush.msrb.mxu1 %v8348_v58  ;;  %v7299_v50 = vpop.eup %4726 }
 0x478   : > { %1645 = vadd.xlane.f32.xlu0 %v1644_v22  ;;  %3590 = vmatpush.msrb.mxu0 %v8349_v59  ;;  %v1668_v23 = vadd.f32 %v7299_v50, %v7295_v9  ;;  %v1571_v22 = vsub.f32 %v8358_v17, %v1535_v1  ;;  %v8361_v59 = vunpack.i.l.bf16 %v7040_v19  ;;  %v4584_v1 = vunpack.i.l.bf16 %v7189_v14 }
 0x479   : > { %3655 = vmatpush.msrb.mxu1 %v8350_v61  ;;  %1660 = vadd.xlane.f32.xlu1 %v1659_v51  ;;  %v8362_v61 = vunpack.i.h.bf16 %v7040_v19  ;;  %v2460_v19 = vmax.f32 %v7089_v30, %v7092_v34  ;;  %4728 = vpow2.f32 %v1624_v0  ;;  %v8372_v17 = vunpack.i.h.bf16 %v7191_v60 }
 0x47a   : > { %3591 = vmatpush.msrb.mxu0 %v8351_v10  ;;  %v1626_v10 = vmul.f32 1.442695, %v1571_v22 }
 0x47b   : > { %3656 = vmatpush.msrb.mxu1 %v8352_v33  ;;  %v8363_v33 = vunpack.i.l.bf16 %v7116_v62 }
 0x47c   : > { %3592 = vmatpush.msrb.mxu0 %v8353_v11  ;;  %v8365_v11 = vunpack.i.l.bf16 %v7064_v44  ;;  %4730 = vpow2.f32 %v1626_v10 }
 0x47d   : > { %3657 = vmatpush.msrb.mxu1 %v8354_v53  ;;  %1839 = vmatmul.f32.gmra.mxu0 %v7111_v43  ;;  %v8360_v43 = vunpack.i.h.bf16 %v6917_v56  ;;  %v4585_v56 = vunpack.i.h.bf16 %v7189_v14  ;;  %v8366_v53 = vunpack.i.h.bf16 %v7064_v44  ;;  %v8367_v14 = vunpack.i.l.bf16 %v7145_v12 }
 0x47e   : > { %1904 = vmatmul.f32.gmra.mxu1 %v7113_v16  ;;  %3593 = vmatpush.msrb.mxu0 %v8355_v49  ;;  %v4589_v49 = vunpack.i.l.bf16 %v7085_v46  ;;  %v4595_v44 = vunpack.i.h.bf16 %v7223_v21 }
 0x47f   : > { %3658 = vmatpush.msrb.mxu1 %v8357_v52  ;;  %v7351_v52 = vpop.eup %4728 }
 0x480   : > { %2440 = vmax.xlane.f32.xlu0 %v2439_v45  ;;  %3594 = vmatpush.msrb.mxu0 %v8359_v6  ;;  %v8364_v45 = vunpack.i.h.bf16 %v7116_v62  ;;  %v4590_v62 = vunpack.i.h.bf16 %v7085_v46  ;;  %v1544_v46 = vpop.xlane.xlu2 %1543 }
 0x481   : > { %3659 = vmatpush.msrb.mxu1 %v8360_v43  ;;  %1669 = vadd.xlane.f32.xlu1 %v1668_v23  ;;  %v4578_v16 = vpop.permute.xlu1 %4577  ;;  %v1577_v22 = vsub.f32 %v6853_v28, %v1544_v46 }
 0x482   : > { %v4580_v58 = vunpack.i.h.bf16 %v4578_v16  ;;  %v4579_v51 = vunpack.i.l.bf16 %v4578_v16  ;;  %3595 = vmatpush.msrb.mxu0 %v8361_v59  ;;  %v7355_v23 = vpop.eup %4730 }
 0x483   : > { %3660 = vmatpush.msrb.mxu1 %v8362_v61  ;;  %v1677_v35 = vadd.f32 %v7355_v23, %v7351_v52  ;;  %v1638_v43 = vmul.f32 1.442695, %v1577_v22  ;;  %v8379_v22 = vld [vmem:[#allocation54_spill] sm:$0xff] }
 0x484   : > { %3596 = vmatpush.msrb.mxu0 %v8363_v33  ;;  %4339 = vmatpush.msra.mxu2 %v4579_v51 }
 0x485   : > { %3661 = vmatpush.msrb.mxu1 %v8364_v45  ;;  %4355 = vmatpush.msra.mxu3 %v4580_v58 }
 0x486   : > { %1842 = vmatmul.f32.gmra.mxu0 %v7265_v39  ;;  %1907 = vmatmul.f32.gmra.mxu1 %v7267_v5  ;;  %v8368_v39 = vunpack.i.h.bf16 %v7145_v12  ;;  %v4594_v5 = vunpack.i.l.bf16 %v7223_v21  ;;  %v8371_v12 = vunpack.i.l.bf16 %v7191_v60  ;;  %v1576_v21 = vsub.f32 %v6851_v26, %v1544_v46  ;;  %v8377_v46 = vld [vmem:[#allocation52_spill] sm:$0xff] }
 0x487   : > { %3597 = vmatpush.msrb.mxu0 %v8365_v11  ;;  %3662 = vmatpush.msrb.mxu1 %v8366_v53  ;;  %v2475_v60 = vmax.f32 %v7226_v15, %v7228_v4  ;;  %v8373_v53 = vld [vmem:[#allocation46_spill] sm:$0xff] }
 0x488   : > { %4340 = vmatpush.msra.mxu2 %v4584_v1  ;;  %4356 = vmatpush.msra.mxu3 %v4585_v56  ;;  %v1636_v6 = vmul.f32 1.442695, %v1576_v21  ;;  %v8378_v21 = vld [vmem:[#allocation55_spill] sm:$0xff] }
 0x489   : > { %3598 = vmatpush.msrb.mxu0 %v8367_v14  ;;  %3663 = vmatpush.msrb.mxu1 %v8368_v39 }
 0x48a   : > { %4341 = vmatpush.msra.mxu2 %v4589_v49  ;;  %4357 = vmatpush.msra.mxu3 %v4590_v62  ;;  %4732 = vpow2.f32 %v1636_v6  ;;  %v8380_v6 = vld [vmem:[#allocation35_spill] sm:$0xff] }
 0x48b   : > { %2461 = vmax.xlane.f32.xlu1 %v2460_v19  ;;  %3599 = vmatpush.msrb.mxu0 %v8369_v27  ;;  %4734 = vpow2.f32 %v1638_v43  ;;  %v8376_v27 = vld [vmem:[#allocation53_spill] sm:$0xff] }
 0x48c   : > { %3664 = vmatpush.msrb.mxu1 %v8370_v54  ;;  %4342 = vmatpush.msra.mxu2 %v4594_v5  ;;  %v2457_v54 = vmax.f32 %v8377_v46, %v8376_v27 }
 0x48d   : > { %4358 = vmatpush.msra.mxu3 %v4595_v44  ;;  %3600 = vmatpush.msrb.mxu0 %v8371_v12 }
 0x48e   : > { %3665 = vmatpush.msrb.mxu1 %v8372_v17 }
 0x48f   : > { %3601 = vmatpush.msrb.mxu0 %v4579_v51 }
 0x490   : > { %3666 = vmatpush.msrb.mxu1 %v4580_v58  ;;  %v7365_v26 = vpop.eup %4732 }
 0x491   : > { %3602 = vmatpush.msrb.mxu0 %v4584_v1  ;;  %v7367_v28 = vpop.eup %4734  ;;  %v2445_v1 = vmax.f32 %v6997_v25, %v7002_v8 }
 0x492   : > { %3667 = vmatpush.msrb.mxu1 %v4585_v56  ;;  %v1686_v16 = vadd.f32 %v7367_v28, %v7365_v26 }
 0x493   : > { %1678 = vadd.xlane.f32.xlu1 %v1677_v35  ;;  %3603 = vmatpush.msrb.mxu0 %v4589_v49  ;;  %v8374_v49 = vld [vmem:[#allocation49_spill] sm:$0xff]  ;;  %v2463_v35 = vmax.f32 %v8379_v22, %v8378_v21 }
 0x494   : > { %3668 = vmatpush.msrb.mxu1 %v4590_v62  ;;  %v2448_v62 = vmax.f32 %v8373_v53, %v7018_v63 }
 0x495   : > { %3604 = vmatpush.msrb.mxu0 %v4594_v5 }
 0x496   : > { %3669 = vmatpush.msrb.mxu1 %v4595_v44 }
 0x49b   : > { %2476 = vmax.xlane.f32.xlu1 %v2475_v60 }
 0x4a3   : > { %1687 = vadd.xlane.f32.xlu1 %v1686_v16 }
 0x4ac   : > { %v1511_v58 = vpop.xlane.xlu1 %1510 }
 0x4ad   : > { %v1554_v51 = vsub.f32 %v6672_v13, %v1511_v58  ;;  %v1555_v59 = vsub.f32 %v6675_v3, %v1511_v58 }
 0x4af   : > { %v1592_v0 = vmul.f32 1.442695, %v1554_v51  ;;  %v1594_v61 = vmul.f32 1.442695, %v1555_v59 }
 0x4b1   : > { %4736 = vpow2.f32 %v1592_v0 }
 0x4b2   : > { %4738 = vpow2.f32 %v1594_v61 }
 0x4b4   : > { %v1520_v56 = vpop.xlane.xlu1 %1519 }
 0x4b5   : > { %v1560_v13 = vsub.f32 %v6710_v20, %v1520_v56  ;;  %v1561_v3 = vsub.f32 %v6712_v18, %v1520_v56  ;;  %v8375_v20 = vld [vmem:[#allocation48_spill] sm:$0xff] }
 0x4b6   : > { %v2451_v14 = vmax.f32 %v8375_v20, %v8374_v49 }
 0x4b7   : > { %v4737_v10 = vpop.eup %4736  ;;  %v1604_v19 = vmul.f32 1.442695, %v1560_v13  ;;  %v1606_v11 = vmul.f32 1.442695, %v1561_v3  ;;  %v8383_v3 = vld [vmem:[#allocation59_spill] sm:$0xff] }
 0x4b8   : > { %v4739_v33 = vpop.eup %4738  ;;  %1845 = vmatmul.f32.gmra.mxu0 %v4737_v10 }
 0x4b9   : > { %1910 = vmatmul.f32.gmra.mxu1 %v4739_v33  ;;  %v1653_v45 = vadd.f32 %v4739_v33, %v4737_v10  ;;  %4740 = vpow2.f32 %v1604_v19  ;;  %v8381_v10 = vld [vmem:[#allocation57_spill] sm:$0xff]  ;;  %v8382_v33 = vld [vmem:[#allocation56_spill] sm:$0xff]  ;;  %v8384_v19 = vld [vmem:[#allocation58_spill] sm:$0xff] }
 0x4ba   : > { %4742 = vpow2.f32 %v1606_v11  ;;  %v2469_v11 = vmax.f32 %v8384_v19, %v8383_v3 }
 0x4bb   : > { %1654 = vadd.xlane.f32.xlu0 %v1653_v45  ;;  %v2466_v45 = vmax.f32 %v8382_v33, %v8381_v10 }
 0x4bc   : > { %v1529_v18 = vpop.xlane.xlu1 %1528 }
 0x4bd   : > { %v1566_v39 = vsub.f32 %v8320_v37, %v1529_v18  ;;  %v1567_v5 = vsub.f32 %v6789_v57, %v1529_v18 }
 0x4bf   : > { %v1618_v44 = vmul.f32 1.442695, %v1567_v5  ;;  %v8387_v5 = vld [vmem:[#allocation16_spill] sm:$0xff] }
 0x4c0   : > { %1848 = vmatmul.f32.gmra.mxu0 %v7139_v55  ;;  %v4741_v55 = vpop.eup %4740 }
 0x4c1   : > { %1913 = vmatmul.f32.gmra.mxu1 %v7142_v48  ;;  %v4743_v48 = vpop.eup %4742 }
 0x4c3   : > { %2446 = vmax.xlane.f32.xlu0 %v2445_v1 }
 0x4c4   : > { %v1538_v17 = vpop.xlane.xlu1 %1537 }
 0x4c5   : > { %v1573_v43 = vsub.f32 %v8380_v6, %v1538_v17 }
 0x4c7   : > { %v1630_v61 = vmul.f32 1.442695, %v1573_v43 }
 0x4c8   : > { %1851 = vmatmul.f32.gmra.mxu0 %v7279_v41  ;;  %v1662_v41 = vadd.f32 %v4743_v48, %v4741_v55 }
 0x4c9   : > { %1916 = vmatmul.f32.gmra.mxu1 %v7281_v36  ;;  %v1616_v36 = vmul.f32 1.442695, %v1566_v39  ;;  %v8386_v39 = vld [vmem:[#allocation40_spill] sm:$0xff] }
 0x4cb   : > { %2449 = vmax.xlane.f32.xlu0 %v2448_v62  ;;  %4744 = vpow2.f32 %v1616_v36 }
 0x4cc   : > { %4746 = vpow2.f32 %v1618_v44 }
 0x4d0   : > { %1854 = vmatmul.f32.gmra.mxu0 %v4741_v55  ;;  %v1547_v55 = vpop.xlane.xlu1 %1546 }
 0x4d1   : > { %1919 = vmatmul.f32.gmra.mxu1 %v4743_v48  ;;  %v4745_v37 = vpop.eup %4744  ;;  %v8385_v48 = vld [vmem:[#allocation44_spill] sm:$0xff] }
 0x4d2   : > { %v4747_v57 = vpop.eup %4746  ;;  %v1579_v18 = vsub.f32 %v8385_v48, %v1547_v55 }
 0x4d3   : > { %2452 = vmax.xlane.f32.xlu0 %v2451_v14  ;;  %v1578_v14 = vsub.f32 %v8341_v38, %v1547_v55  ;;  %v8389_v38 = vld [vmem:[#allocation60_spill] sm:$0xff] }
 0x4d4   : > { %v1642_v44 = vmul.f32 1.442695, %v1579_v18 }
 0x4d5   : > { %v1640_v36 = vmul.f32 1.442695, %v1578_v14 }
 0x4d8   : > { %1857 = vmatmul.f32.gmra.mxu0 %v7179_v42  ;;  %v7393_v42 = vpop.xlane.xlu2 %2434 }
 0x4d9   : > { %1922 = vmatmul.f32.gmra.mxu1 %v7183_v47  ;;  %v1671_v47 = vadd.f32 %v4747_v57, %v4745_v37 }
 0x4db   : > { %1663 = vadd.xlane.f32.xlu0 %v1662_v41 }
 0x4e0   : > { %1860 = vmatmul.f32.gmra.mxu0 %v7295_v9  ;;  %v1572_v9 = vsub.f32 %v8330_v40, %v1538_v17  ;;  %v1649_v16 = vpop.xlane.xlu2 %1648 }
 0x4e1   : > { %1925 = vmatmul.f32.gmra.mxu1 %v7299_v50 }
 0x4e2   : > { %v1628_v59 = vmul.f32 1.442695, %v1572_v9  ;;  %v8391_v9 = vld [vmem:[#allocation26_spill] sm:$0xff] }
 0x4e3   : > { %2458 = vmax.xlane.f32.xlu0 %v2457_v54 }
 0x4e8   : > { %1863 = vmatmul.f32.gmra.mxu0 %v4745_v37  ;;  %v7441_v14 = vpop.xlane.xlu2 %1657 }
 0x4e9   : > { %1928 = vmatmul.f32.gmra.mxu1 %v4747_v57  ;;  %v8388_v57 = vld [vmem:[#allocation61_spill] sm:$0xff] }
 0x4eb   : > { %1672 = vadd.xlane.f32.xlu0 %v1671_v47  ;;  %v1646_v12 = vpop.xlane.xlu0 %1645  ;;  %v2472_v47 = vmax.f32 %v8389_v38, %v8388_v57 }
 0x4ec   : > { %4748 = vrcp.f32 %v1646_v12  ;;  %v8390_v12 = vld [vmem:[#allocation43_spill] sm:$0xff] }
 0x4ed   : > { %4750 = vrcp.f32 %v1649_v16  ;;  %v2481_v17 = vsub.f32 %v8390_v12, %v7393_v42 }
 0x4ee   : > { %4752 = vpow2.f32 %v1628_v59 }
 0x4ef   : > { %4754 = vpow2.f32 %v1630_v61  ;;  %v2513_v43 = vmul.f32 1.442695, %v2481_v17 }
 0x4f0   : > { %1866 = vmatmul.f32.gmra.mxu0 %v7209_v24  ;;  %4756 = vpow2.f32 %v1640_v36 }
 0x4f1   : > { %1931 = vmatmul.f32.gmra.mxu1 %v7213_v29  ;;  %4758 = vpow2.f32 %v1642_v44 }
 0x4f2   : > { %v1837_v50 = vpop.f32.mrf.mxu0  ;;  %v4749_v51 = vpop.eup %4748  ;;  %4760 = vpow2.f32 %v2513_v43 }
 0x4f3   : > { %v1902_v60 = vpop.f32.mrf.mxu1  ;;  %2464 = vmax.xlane.f32.xlu0 %v2463_v35  ;;  %v4751_v56 = vpop.eup %4750 }
 0x4f4   : > { %v1903_v58 = vadd.f32 %v1902_v60, %v1837_v50  ;;  %v4753_v13 = vpop.eup %4752  ;;  %v2438_v35 = vpop.xlane.xlu1 %2437  ;;  %v2482_v50 = vsub.f32 %v8391_v9, %v7393_v42  ;;  %v8392_v60 = vld [vmem:[#allocation28_spill] sm:$0xff] }
 0x4f5   : > { %v4755_v62 = vpop.eup %4754  ;;  %v2483_v16 = vsub.f32 %v8392_v60, %v2438_v35  ;;  %v7451_v9 = vpop.xlane.xlu2 %2455 }
 0x4f6   : > { %v1966_v0 = vmul.f32 %v4749_v51, %v1903_v58  ;;  %v1680_v41 = vadd.f32 %v4755_v62, %v4753_v13  ;;  %v4757_v6 = vpop.eup %4756  ;;  %v2515_v51 = vmul.f32 1.442695, %v2482_v50 }
 0x4f7   : > { %v4759_v58 = vpop.eup %4758 }
 0x4f8   : > { %1998 = vrot.lane.b32.xlu1 %v1966_v0, %s5160_s18  ;;  %1869 = vmatmul.f32.gmra.mxu0 %v7351_v52  ;;  %v7409_v52 = vpop.f32.mrf.mxu2  ;;  %4762 = vpow2.f32 %v2515_v51 }
 0x4f9   : > { %1934 = vmatmul.f32.gmra.mxu1 %v7355_v23  ;;  %v7411_v23 = vpop.f32.mrf.mxu3 }
 0x4fa   : > { %v1840_v24 = vpop.f32.mrf.mxu0  ;;  %v3269_v55 = vmax.f32 %v7409_v52, %v7411_v23 }
 0x4fb   : > { %v1905_v29 = vpop.f32.mrf.mxu1  ;;  %2467 = vmax.xlane.f32.xlu0 %v2466_v45  ;;  %v2517_v45 = vmul.f32 1.442695, %v2483_v16 }
 0x4fc   : > { %v1906_v40 = vadd.f32 %v1905_v29, %v1840_v24  ;;  %v1689_v24 = vadd.f32 %v4759_v58, %v4757_v6  ;;  %v1652_v29 = vpop.xlane.xlu1 %1651 }
 0x4fd   : > { %4764 = vpow2.f32 %v2517_v45 }
 0x4fe   : > { %v1967_v1 = vmul.f32 %v4751_v56, %v1906_v40 }
 0x500   : > { %2000 = vrot.lane.b32.xlu2 %v1967_v1, %s5160_s18  ;;  %1872 = vmatmul.f32.gmra.mxu0 %v4753_v13  ;;  %v7417_v54 = vpop.f32.mrf.mxu2  ;;  %v4761_v1 = vpop.eup %4760 }
 0x501   : > { %1937 = vmatmul.f32.gmra.mxu1 %v4755_v62  ;;  %v7419_v37 = vpop.f32.mrf.mxu3 }
 0x502   : > { %v3272_v13 = vmax.f32 %v7417_v54, %v7419_v37 }
 0x503   : > { %2470 = vmax.xlane.f32.xlu0 %v2469_v11  ;;  %v4763_v11 = vpop.eup %4762  ;;  %v1843_v60 = vpop.f32.mrf.mxu0 }
 0x508   : > { %1875 = vmatmul.f32.gmra.mxu0 %v8386_v39  ;;  %v7431_v0 = vpop.f32.mrf.mxu2 }
 0x509   : > { %1940 = vmatmul.f32.gmra.mxu1 %v8387_v5  ;;  %v7433_v61 = vpop.f32.mrf.mxu3  ;;  %v2444_v5 = vpop.xlane.xlu1 %2443 }
 0x50a   : > { %v2487_v44 = vsub.f32 %v6969_v7, %v2444_v5  ;;  %v2488_v17 = vsub.f32 %v6974_v31, %v2444_v5  ;;  %v7463_v31 = vpop.xlane.xlu2 %1666 }
 0x50b   : > { %1681 = vadd.xlane.f32.xlu0 %v1680_v41  ;;  %v3275_v41 = vmax.f32 %v7431_v0, %v7433_v61 }
 0x50c   : > { %v2525_v43 = vmul.f32 1.442695, %v2487_v44  ;;  %v2527_v16 = vmul.f32 1.442695, %v2488_v17 }
 0x510   : > { %1878 = vmatmul.f32.gmra.mxu0 %v7365_v26  ;;  %v8393_v26 = vld [vmem:[#allocation45_spill] sm:$0xff] }
 0x511   : > { %1943 = vmatmul.f32.gmra.mxu1 %v7367_v28  ;;  %v2484_v59 = vsub.f32 %v8393_v26, %v2438_v35  ;;  %v2441_v28 = vpop.xlane.xlu0 %2440  ;;  %v7445_v18 = vpop.f32.mrf.mxu3 }
 0x512   : > { %v2485_v40 = vsub.f32 %v6949_v2, %v2441_v28  ;;  %v2486_v56 = vsub.f32 %v6955_v32, %v2441_v28  ;;  %v7443_v2 = vpop.f32.mrf.mxu2  ;;  %v4765_v32 = vpop.eup %4764 }
 0x513   : > { %2473 = vmax.xlane.f32.xlu0 %v2472_v47  ;;  %v2519_v42 = vmul.f32 1.442695, %v2484_v59  ;;  %v2577_v47 = vadd.f32 %v4763_v11, %v4761_v1  ;;  %v7461_v59 = vpop.xlane.xlu1 %1660  ;;  %v7479_v5 = vpop.xlane.xlu2 %1675 }
 0x514   : > { %v2521_v62 = vmul.f32 1.442695, %v2485_v40  ;;  %v2523_v48 = vmul.f32 1.442695, %v2486_v56 }
 0x515   : > { %4766 = vpow2.f32 %v2519_v42 }
 0x516   : > { %4768 = vpow2.f32 %v2521_v62 }
 0x517   : > { %4770 = vpow2.f32 %v2523_v48 }
 0x518   : > { %1881 = vmatmul.f32.gmra.mxu0 %v4757_v6  ;;  %4772 = vpow2.f32 %v2525_v43 }
 0x519   : > { %1946 = vmatmul.f32.gmra.mxu1 %v4759_v58  ;;  %v7455_v6 = vpop.f32.mrf.mxu3  ;;  %v1908_v58 = vpop.f32.mrf.mxu1  ;;  %4774 = vpow2.f32 %v2527_v16 }
 0x51a   : > { %v7453_v50 = vpop.f32.mrf.mxu2  ;;  %4776 = vrcp.f32 %v1652_v29 }
 0x51b   : > { %1690 = vadd.xlane.f32.xlu0 %v1689_v24  ;;  %v4767_v39 = vpop.eup %4766  ;;  %v3281_v26 = vmax.f32 %v7453_v50, %v7455_v6 }
 0x51c   : > { %v2580_v36 = vadd.f32 %v4767_v39, %v4765_v32  ;;  %v4769_v12 = vpop.eup %4768 }
 0x51d   : > { %v4771_v35 = vpop.eup %4770 }
 0x51e   : > { %v2583_v7 = vadd.f32 %v4771_v35, %v4769_v12  ;;  %v7469_v42 = vpop.eup %4772 }
 0x520   : > { %2641 = vmatmul.f32.vlgmr.msra.gmra.mxu0 %v4761_v1  ;;  %v7473_v1 = vpop.eup %4774 }
 0x521   : > { %2706 = vmatmul.f32.vlgmr.msra.gmra.mxu1 %v4763_v11  ;;  %v1909_v11 = vadd.f32 %v1908_v58, %v1843_v60  ;;  %v4777_v29 = vpop.eup %4776 }
 0x522   : > { %3273 = vmax.xlane.f32.xlu1 %v3272_v13  ;;  %v7476_v13 = vpop.xlane.xlu1 %1669 }
 0x523   : > { %3270 = vmax.xlane.f32.xlu0 %v3269_v55  ;;  %v1968_v48 = vmul.f32 %v4777_v29, %v1909_v11 }
 0x528   : > { %2644 = vmatmul.f32.gmra.mxu0 %v4765_v32 }
 0x529   : > { %3276 = vmax.xlane.f32.xlu2 %v3275_v41  ;;  %2709 = vmatmul.f32.gmra.mxu1 %v4767_v39 }
 0x52a   : > { %2581 = vadd.xlane.f32.xlu1 %v2580_v36  ;;  %v7484_v17 = vpop.xlane.xlu1 %2461 }
 0x52b   : > { %2578 = vadd.xlane.f32.xlu0 %v2577_v47 }
 0x52e   : > { %v7457_v51 = vpop.xlane.xlu0 %1654 }
 0x530   : > { %2647 = vmatmul.f32.gmra.mxu0 %v4769_v12 }
 0x531   : > { %2584 = vadd.xlane.f32.xlu2 %v2583_v7  ;;  %2712 = vmatmul.f32.gmra.mxu1 %v4771_v35  ;;  %v7488_v7 = vpop.xlane.xlu2 %1684 }
 0x532   : > { %3282 = vmax.xlane.f32.xlu1 %v3281_v26 }
 0x535   : > { %v7465_v45 = vpop.f32.mrf.mxu0 }
 0x536   : > { %v7467_v28 = vpop.f32.mrf.mxu1  ;;  %v2447_v24 = vpop.xlane.xlu0 %2446 }
 0x537   : > { %v2489_v40 = vsub.f32 %v6997_v25, %v2447_v24  ;;  %v2490_v56 = vsub.f32 %v7002_v8, %v2447_v24 }
 0x538   : > { %2650 = vmatmul.f32.gmra.mxu0 %v7469_v42 }
 0x539   : > { %v2529_v62 = vmul.f32 1.442695, %v2489_v40  ;;  %v2531_v55 = vmul.f32 1.442695, %v2490_v56  ;;  %2715 = vmatmul.f32.gmra.mxu1 %v7473_v1  ;;  %v8394_v56 = vld [vmem:[#allocation50_spill] sm:$0xff] }
 0x53a   : > { %v2495_v11 = vsub.f32 %v8394_v56, %v7451_v9 }
 0x53b   : > { %4778 = vpow2.f32 %v2529_v62 }
 0x53c   : > { %4780 = vpow2.f32 %v2531_v55  ;;  %v8395_v55 = vld [vmem:[#allocation51_spill] sm:$0xff] }
 0x53d   : > { %v1849_v32 = vpop.f32.mrf.mxu0  ;;  %v2496_v29 = vsub.f32 %v8395_v55, %v7451_v9 }
 0x53e   : > { %v1914_v39 = vpop.f32.mrf.mxu1  ;;  %v2450_v25 = vpop.xlane.xlu0 %2449 }
 0x53f   : > { %v2491_v8 = vsub.f32 %v8373_v53, %v2450_v25  ;;  %v2492_v41 = vsub.f32 %v7018_v63, %v2450_v25  ;;  %2002 = vrot.lane.b32.xlu0 %v1968_v48, %s5160_s18 }
 0x541   : > { %v4779_v36 = vpop.eup %4778  ;;  %v2533_v44 = vmul.f32 1.442695, %v2491_v8  ;;  %v2535_v47 = vmul.f32 1.442695, %v2492_v41  ;;  %v2541_v8 = vmul.f32 1.442695, %v2495_v11 }
 0x542   : > { %v4781_v12 = vpop.eup %4780  ;;  %2653 = vmatmul.f32.gmra.mxu0 %v4779_v36  ;;  %v2543_v41 = vmul.f32 1.442695, %v2496_v29 }
 0x543   : > { %4782 = vpow2.f32 %v2533_v44  ;;  %2718 = vmatmul.f32.gmra.mxu1 %v4781_v12  ;;  %v2589_v35 = vadd.f32 %v4781_v12, %v4779_v36  ;;  %v7502_v44 = vpop.xlane.xlu2 %2479 }
 0x544   : > { %4784 = vpow2.f32 %v2535_v47 }
 0x545   : > { %2590 = vadd.xlane.f32.xlu1 %v2589_v35  ;;  %v1852_v43 = vpop.f32.mrf.mxu0 }
 0x546   : > { %v1917_v60 = vpop.f32.mrf.mxu1  ;;  %v2453_v16 = vpop.xlane.xlu0 %2452 }
 0x547   : > { %v2493_v53 = vsub.f32 %v8375_v20, %v2453_v16  ;;  %v2494_v63 = vsub.f32 %v8374_v49, %v2453_v16  ;;  %v7494_v20 = vpop.xlane.xlu1 %1678 }
 0x549   : > { %v4783_v58 = vpop.eup %4782  ;;  %v2537_v26 = vmul.f32 1.442695, %v2493_v53  ;;  %v2539_v24 = vmul.f32 1.442695, %v2494_v63 }
 0x54a   : > { %v4785_v40 = vpop.eup %4784  ;;  %2656 = vmatmul.f32.gmra.mxu0 %v4783_v58 }
 0x54b   : > { %4786 = vpow2.f32 %v2537_v26  ;;  %2721 = vmatmul.f32.gmra.mxu1 %v4785_v40  ;;  %v2592_v62 = vadd.f32 %v4785_v40, %v4783_v58  ;;  %v1915_v26 = vadd.f32 %v1914_v39, %v1849_v32 }
 0x54c   : > { %4788 = vpow2.f32 %v2539_v24 }
 0x54d   : > { %2593 = vadd.xlane.f32.xlu2 %v2592_v62  ;;  %v7496_v49 = vpop.f32.mrf.mxu0  ;;  %4790 = vpow2.f32 %v2541_v8  ;;  %v1918_v8 = vadd.f32 %v1917_v60, %v1852_v43 }
 0x54e   : > { %v7498_v48 = vpop.f32.mrf.mxu1  ;;  %v7500_v25 = vpop.xlane.xlu0 %1663  ;;  %4792 = vpow2.f32 %v2543_v41 }
 0x54f   : > { %4794 = vrcp.f32 %v7441_v14  ;;  %v7511_v53 = vpop.xlane.xlu1 %2476 }
 0x550   : > { %4796 = vrcp.f32 %v7461_v59 }
 0x551   : > { %v4787_v36 = vpop.eup %4786 }
 0x552   : > { %v4789_v47 = vpop.eup %4788  ;;  %2659 = vmatmul.f32.gmra.mxu0 %v4787_v36 }
 0x553   : > { %2724 = vmatmul.f32.gmra.mxu1 %v4789_v47  ;;  %v7504_v9 = vadd.f32 %v4789_v47, %v4787_v36  ;;  %v7515_v24 = vpop.eup %4790  ;;  %v7536_v47 = vpop.f32.mrf.mxu2 }
 0x554   : > { %v7517_v62 = vpop.eup %4792 }
 0x555   : > { %v7507_v12 = vpop.f32.mrf.mxu0  ;;  %v4795_v14 = vpop.eup %4794 }
 0x556   : > { %v7509_v35 = vpop.f32.mrf.mxu1  ;;  %v2459_v16 = vpop.xlane.xlu0 %2458  ;;  %v1970_v32 = vmul.f32 %v4795_v14, %v1915_v26 }
 0x557   : > { %v2497_v63 = vsub.f32 %v8377_v46, %v2459_v16  ;;  %v2498_v58 = vsub.f32 %v8376_v27, %v2459_v16  ;;  %v2499_v46 = vsub.f32 %v7089_v30, %v7484_v17  ;;  %v2500_v27 = vsub.f32 %v7092_v34, %v7484_v17  ;;  %v4797_v30 = vpop.eup %4796  ;;  %v7538_v34 = vpop.xlane.xlu1 %1687 }
 0x558   : > { %8397 = vst [vmem:[#allocation22_spill] sm:$0xff] %v7538_v34  ;;  %v1971_v43 = vmul.f32 %v4797_v30, %v1918_v8  ;;  %v2510_v34 = vsub.f32 %v7228_v4, %v7511_v53 }
 0x559   : > { %v2545_v40 = vmul.f32 1.442695, %v2497_v63  ;;  %v2547_v56 = vmul.f32 1.442695, %v2498_v58  ;;  %v2549_v29 = vmul.f32 1.442695, %v2499_v46  ;;  %v7548_v63 = vpop.f32.mrf.mxu3 }
 0x55a   : > { %v2001_v11 = vpop.permute.xlu2 %2000  ;;  %2662 = vmatmul.f32.gmra.mxu0 %v7515_v24  ;;  %v2551_v41 = vmul.f32 1.442695, %v2500_v27 }
 0x55b   : > { %2048 = vst.msk [vmem:[#allocation2 + $0x10] sm:$0xff] %vm2046_vm1, %v2001_v11  ;;  %4798 = vpow2.f32 %v2545_v40  ;;  %2727 = vmatmul.f32.gmra.mxu1 %v7517_v62  ;;  %v3278_v40 = vmax.f32 %v7443_v2, %v7445_v18  ;;  %v7566_v8 = vpop.f32.mrf.mxu2 }
 0x55c   : > { %4800 = vpow2.f32 %v2547_v56 }
 0x55d   : > { %v7527_v39 = vpop.f32.mrf.mxu0  ;;  %4802 = vpow2.f32 %v2549_v29 }
 0x55e   : > { %2006 = vrot.lane.b32.xlu1 %v1970_v32, %s5160_s18  ;;  %v7530_v59 = vpop.f32.mrf.mxu1  ;;  %v7532_v55 = vpop.xlane.xlu0 %1672  ;;  %4804 = vpow2.f32 %v2551_v41 }
 0x55f   : > { %8396 = vst [vmem:[#allocation37_spill] sm:$0xff] %v7532_v55 }
 0x561   : > { %v7534_v36 = vpop.eup %4798 }
 0x562   : > { %v3833_v17 = vld [vmem:[#allocation2 + $0x10] sm:$0xff]  ;;  %v7540_v16 = vpop.eup %4800  ;;  %2665 = vmatmul.f32.gmra.mxu0 %v7534_v36 }
 0x563   : > { %3865 = vst [vmem:[%s7544_s29 + $0x10] sm:$0xff] %v3833_v17  ;;  %2730 = vmatmul.f32.gmra.mxu1 %v7540_v16  ;;  %v7560_v14 = vpop.eup %4802 }
 0x564   : > { %v7562_v29 = vpop.eup %4804 }
 0x565   : > { %2008 = vrot.lane.b32.xlu2 %v1971_v43, %s5160_s18  ;;  %v7552_v60 = vpop.f32.mrf.mxu0 }
 0x566   : > { %8398 = vst [vmem:[#allocation42_spill] sm:$0xff] %v7552_v60  ;;  %v7554_v58 = vpop.f32.mrf.mxu1  ;;  %v2465_v26 = vpop.xlane.xlu0 %2464 }
 0x567   : > { %8399 = vst [vmem:[#allocation29_spill] sm:$0xff] %v7554_v58  ;;  %v2501_v56 = vsub.f32 %v8379_v22, %v2465_v26  ;;  %v2502_v11 = vsub.f32 %v8378_v21, %v2465_v26  ;;  %v7569_v21 = vpop.f32.mrf.mxu3  ;;  %v2586_v26 = vadd.f32 %v7473_v1, %v7469_v42  ;;  %v7582_v58 = vpop.f32.mrf.mxu2 }
 0x569   : > { %v2553_v46 = vmul.f32 1.442695, %v2501_v56  ;;  %v2555_v27 = vmul.f32 1.442695, %v2502_v11  ;;  %3279 = vmax.xlane.f32.xlu0 %v3278_v40 }
 0x56a   : > { %v1999_v32 = vpop.permute.xlu1 %1998  ;;  %2668 = vmatmul.f32.gmra.mxu0 %v7560_v14 }
 0x56b   : > { %2047 = vst.msk [vmem:[#allocation2] sm:$0xff] %vm2046_vm1, %v1999_v32  ;;  %4806 = vpow2.f32 %v2553_v46  ;;  %2733 = vmatmul.f32.gmra.mxu1 %v7562_v29 }
 0x56c   : > { %4808 = vpow2.f32 %v2555_v27 }
 0x56d   : > { %v7571_v22 = vpop.f32.mrf.mxu0 }
 0x56e   : > { %v7573_v30 = vpop.f32.mrf.mxu1  ;;  %v2468_v41 = vpop.xlane.xlu0 %2467 }
 0x56f   : > { %v2503_v17 = vsub.f32 %v8382_v33, %v2468_v41  ;;  %v2504_v43 = vsub.f32 %v8381_v10, %v2468_v41  ;;  %v7588_v1 = vpop.f32.mrf.mxu3 }
 0x570   : > { %8400 = vst [vmem:[#allocation25_spill] sm:$0xff] %v7588_v1 }
 0x571   : > { %v4807_v40 = vpop.eup %4806  ;;  %v2557_v11 = vmul.f32 1.442695, %v2503_v17  ;;  %v2559_v46 = vmul.f32 1.442695, %v2504_v43  ;;  %2587 = vadd.xlane.f32.xlu0 %v2586_v26 }
 0x572   : > { %v3831_v56 = vld [vmem:[#allocation2] sm:$0xff]  ;;  %v4809_v27 = vpop.eup %4808  ;;  %2671 = vmatmul.f32.gmra.mxu0 %v4807_v40 }
 0x573   : > { %3863 = vst [vmem:[%s7544_s29] sm:$0xff] %v3831_v56  ;;  %4810 = vpow2.f32 %v2557_v11  ;;  %2736 = vmatmul.f32.gmra.mxu1 %v4809_v27  ;;  %v7580_v32 = vadd.f32 %v4809_v27, %v4807_v40 }
 0x574   : > { %4812 = vpow2.f32 %v2559_v46 }
 0x575   : > { %v7584_v33 = vpop.f32.mrf.mxu0  ;;  %4814 = vrcp.f32 %v7457_v51 }
 0x576   : > { %v7586_v10 = vpop.f32.mrf.mxu1  ;;  %v2471_v42 = vpop.xlane.xlu0 %2470 }
 0x577   : > { %v2505_v41 = vsub.f32 %v8384_v19, %v2471_v42  ;;  %v2506_v17 = vsub.f32 %v8383_v3, %v2471_v42  ;;  %v1912_v3 = vadd.f32 %v7467_v28, %v7465_v45  ;;  %v7607_v42 = vpop.f32.mrf.mxu2  ;;  %v7609_v51 = vpop.f32.mrf.mxu3 }
 0x578   : > { %8404 = vst [vmem:[#allocation34_spill] sm:$0xff] %v7607_v42 }
 0x579   : > { %v7592_v43 = vpop.eup %4810  ;;  %v2561_v26 = vmul.f32 1.442695, %v2505_v41  ;;  %v2563_v56 = vmul.f32 1.442695, %v2506_v17  ;;  %8405 = vst [vmem:[#allocation18_spill] sm:$0xff] %v7609_v51 }
 0x57a   : > { %v7594_v40 = vpop.eup %4812  ;;  %2674 = vmatmul.f32.gmra.mxu0 %v7592_v43 }
 0x57b   : > { %4816 = vpow2.f32 %v2561_v26  ;;  %2739 = vmatmul.f32.gmra.mxu1 %v7594_v40  ;;  %v4815_v27 = vpop.eup %4814 }
 0x57c   : > { %4818 = vpow2.f32 %v2563_v56  ;;  %v1969_v26 = vmul.f32 %v4815_v27, %v1912_v3 }
 0x57d   : > { %v7599_v11 = vpop.f32.mrf.mxu0 }
 0x57e   : > { %8401 = vst [vmem:[#allocation23_spill] sm:$0xff] %v7599_v11  ;;  %v7601_v46 = vpop.f32.mrf.mxu1  ;;  %v7603_v19 = vpop.xlane.xlu0 %1681  ;;  %v3284_v11 = vmax.f32 %v7536_v47, %v7548_v63 }
 0x57f   : > { %8402 = vst [vmem:[#allocation21_spill] sm:$0xff] %v7601_v46  ;;  %v7622_v27 = vpop.f32.mrf.mxu2 }
 0x580   : > { %8403 = vst [vmem:[#allocation39_spill] sm:$0xff] %v7603_v19 }
 0x581   : > { %v4817_v41 = vpop.eup %4816 }
 0x582   : > { %v4819_v17 = vpop.eup %4818  ;;  %2677 = vmatmul.f32.gmra.mxu0 %v4817_v41 }
 0x583   : > { %2742 = vmatmul.f32.gmra.mxu1 %v4819_v17  ;;  %v7611_v56 = vadd.f32 %v4819_v17, %v4817_v41  ;;  %v7624_v41 = vpop.f32.mrf.mxu3  ;;  %v2509_v17 = vsub.f32 %v7226_v15, %v7511_v53  ;;  %v8408_v15 = vld [vmem:[#allocation17_spill] sm:$0xff] }
 0x585   : > { %2004 = vrot.lane.b32.xlu0 %v1969_v26, %s5160_s18  ;;  %v7614_v46 = vpop.f32.mrf.mxu0  ;;  %v3293_v26 = vmax.f32 %v7607_v42, %v7609_v51  ;;  %v8409_v51 = vld [vmem:[#allocation36_spill] sm:$0xff] }
 0x586   : > { %v7618_v45 = vpop.f32.mrf.mxu1  ;;  %v2474_v28 = vpop.xlane.xlu0 %2473  ;;  %v2512_v42 = vsub.f32 %v8409_v51, %v7502_v44 }
 0x587   : > { %v2507_v19 = vsub.f32 %v8389_v38, %v2474_v28  ;;  %v2508_v60 = vsub.f32 %v8388_v57, %v2474_v28  ;;  %v3287_v57 = vmax.f32 %v7566_v8, %v7569_v21  ;;  %v2571_v28 = vmul.f32 1.442695, %v2510_v34 }
 0x588   : > { %3285 = vmax.xlane.f32.xlu1 %v3284_v11  ;;  %v2601_v34 = vadd.f32 %v7540_v16, %v7534_v36 }
 0x589   : > { %v2565_v55 = vmul.f32 1.442695, %v2507_v19  ;;  %v2567_v3 = vmul.f32 1.442695, %v2508_v60  ;;  %v2569_v19 = vmul.f32 1.442695, %v2509_v17 }
 0x58a   : > { %v2575_v17 = vmul.f32 1.442695, %v2512_v42 }
 0x58b   : > { %4820 = vpow2.f32 %v2565_v55  ;;  %v2511_v55 = vsub.f32 %v8408_v15, %v7502_v44  ;;  %v7654_v44 = vpop.f32.mrf.mxu3 }
 0x58c   : > { %4822 = vpow2.f32 %v2567_v3  ;;  %8411 = vst [vmem:[#allocation27_spill] sm:$0xff] %v7654_v44 }
 0x58d   : > { %v7632_v38 = vpop.f32.mrf.mxu0  ;;  %4824 = vpow2.f32 %v2569_v19  ;;  %v2573_v3 = vmul.f32 1.442695, %v2511_v55  ;;  %v3290_v19 = vmax.f32 %v7582_v58, %v7588_v1 }
 0x58e   : > { %3294 = vmax.xlane.f32.xlu2 %v3293_v26  ;;  %v7636_v60 = vpop.f32.mrf.mxu1  ;;  %v7638_v11 = vpop.xlane.xlu0 %1690  ;;  %4826 = vpow2.f32 %v2571_v28 }
 0x58f   : > { %8406 = vst [vmem:[#allocation41_spill] sm:$0xff] %v7636_v60  ;;  %v7650_v26 = vpop.f32.mrf.mxu2  ;;  %4828 = vpow2.f32 %v2573_v3 }
 0x590   : > { %8407 = vst [vmem:[#allocation32_spill] sm:$0xff] %v7638_v11  ;;  %3288 = vmax.xlane.f32.xlu1 %v3287_v57  ;;  %4830 = vpow2.f32 %v2575_v17 }
 0x591   : > { %v7644_v4 = vpop.eup %4820  ;;  %8410 = vst [vmem:[#allocation47_spill] sm:$0xff] %v7650_v26 }
 0x592   : > { %v7646_v53 = vpop.eup %4822  ;;  %2680 = vmatmul.f32.gmra.mxu0 %v7644_v4 }
 0x593   : > { %2745 = vmatmul.f32.gmra.mxu1 %v7646_v53 }
 0x595   : > { %v3274_v15 = vpop.xlane.xlu1 %3273  ;;  %v7658_v11 = vpop.f32.mrf.mxu0 }
 0x596   : > { %v3319_v51 = vsub.f32 %v7417_v54, %v3274_v15  ;;  %v3320_v57 = vsub.f32 %v7419_v37, %v3274_v15  ;;  %8412 = vst [vmem:[#allocation20_spill] sm:$0xff] %v7658_v11  ;;  %2602 = vadd.xlane.f32.xlu2 %v2601_v34  ;;  %v7662_v55 = vpop.f32.mrf.mxu1  ;;  %v3271_v28 = vpop.xlane.xlu0 %3270 }
 0x597   : > { %8413 = vst [vmem:[#allocation31_spill] sm:$0xff] %v7662_v55  ;;  %v3317_v36 = vsub.f32 %v7409_v52, %v3271_v28  ;;  %v3318_v16 = vsub.f32 %v7411_v23, %v3271_v28  ;;  %v7666_v54 = vpop.eup %4824  ;;  %v3299_v52 = vmax.f32 %v7650_v26, %v7654_v44 }
 0x598   : > { %v3353_v42 = vmul.f32 1.442695, %v3319_v51  ;;  %v3355_v60 = vmul.f32 1.442695, %v3320_v57  ;;  %3291 = vmax.xlane.f32.xlu1 %v3290_v19  ;;  %v7668_v15 = vpop.eup %4826 }
 0x599   : > { %v3349_v37 = vmul.f32 1.442695, %v3317_v36  ;;  %v3351_v34 = vmul.f32 1.442695, %v3318_v16  ;;  %v7676_v57 = vpop.eup %4828 }
 0x59a   : > { %4832 = vpow2.f32 %v3353_v42  ;;  %2683 = vmatmul.f32.gmra.mxu0 %v7666_v54  ;;  %8414 = vst [vmem:[#allocation30_spill] sm:$0xff] %v7676_v57 }
 0x59b   : > { %4834 = vpow2.f32 %v3355_v60  ;;  %2748 = vmatmul.f32.gmra.mxu1 %v7668_v15  ;;  %v7678_v60 = vpop.eup %4830 }
 0x59c   : > { %4836 = vpow2.f32 %v3349_v37  ;;  %v3277_v3 = vpop.xlane.xlu2 %3276  ;;  %8415 = vst [vmem:[#allocation38_spill] sm:$0xff] %v7678_v60  ;;  %v2598_v37 = vadd.f32 %v7517_v62, %v7515_v24 }
 0x59d   : > { %4838 = vpow2.f32 %v3351_v34  ;;  %v3321_v23 = vsub.f32 %v7431_v0, %v3277_v3  ;;  %v3322_v17 = vsub.f32 %v7433_v61, %v3277_v3  ;;  %v2582_v51 = vpop.xlane.xlu1 %2581  ;;  %v2642_v19 = vpop.f32.mrf.mxu0 }
 0x59e   : > { %3300 = vmax.xlane.f32.xlu2 %v3299_v52  ;;  %v2707_v36 = vpop.f32.mrf.mxu1  ;;  %v2579_v16 = vpop.xlane.xlu0 %2578 }
 0x59f   : > { %v3357_v28 = vmul.f32 1.442695, %v3321_v23  ;;  %v3359_v42 = vmul.f32 1.442695, %v3322_v17  ;;  %v7682_v34 = vpop.f32.mrf.mxu2  ;;  %v7684_v0 = vpop.f32.mrf.mxu3  ;;  %4840 = vrcp.f32 %v2579_v16  ;;  %v2708_v62 = vadd.f32 %v2707_v36, %v2642_v19 }
 0x5a0   : > { %v4833_v55 = vpop.eup %4832  ;;  %2599 = vadd.xlane.f32.xlu1 %v2598_v37  ;;  %v2610_v17 = vadd.f32 %v7594_v40, %v7592_v43 }
 0x5a1   : > { %v4835_v61 = vpop.eup %4834  ;;  %4842 = vpow2.f32 %v3357_v28 }
 0x5a2   : > { %v4837_v3 = vpop.eup %4836  ;;  %4844 = vpow2.f32 %v3359_v42  ;;  %v7686_v11 = vadd.f32 %v4835_v61, %v4833_v55  ;;  %2686 = vmatmul.f32.gmra.mxu0 %v7676_v57 }
 0x5a3   : > { %v4839_v23 = vpop.eup %4838  ;;  %4846 = vrcp.f32 %v2582_v51  ;;  %2751 = vmatmul.f32.gmra.mxu1 %v7678_v60  ;;  %v3296_v51 = vmax.f32 %v7622_v27, %v7624_v41 }
 0x5a4   : > { %8416 = vst [vmem:[#allocation33_spill] sm:$0xff] %v7686_v11  ;;  %v7690_v24 = vadd.f32 %v4839_v23, %v4837_v3  ;;  %v2585_v28 = vpop.xlane.xlu2 %2584 }
 0x5a5   : > { %v3283_v52 = vpop.xlane.xlu1 %3282  ;;  %v4841_v16 = vpop.eup %4840  ;;  %4848 = vrcp.f32 %v2585_v28 }
 0x5a6   : > { %8417 = vst [vmem:[#allocation24_spill] sm:$0xff] %v7690_v24  ;;  %v3325_v37 = vsub.f32 %v7453_v50, %v3283_v52  ;;  %v3326_v42 = vsub.f32 %v7455_v6, %v3283_v52  ;;  %v2645_v11 = vpop.f32.mrf.mxu0  ;;  %v2771_v57 = vmul.f32 %v4841_v16, %v2708_v62  ;;  %2611 = vadd.xlane.f32.xlu2 %v2610_v17  ;;  %v2710_v60 = vpop.f32.mrf.mxu1 }
 0x5a7   : > { %v4843_v44 = vpop.eup %4842  ;;  %v2711_v26 = vadd.f32 %v2710_v60, %v2645_v11  ;;  %v7701_v6 = vpop.f32.mrf.mxu2 }
 0x5a8   : > { %v4845_v24 = vpop.eup %4844  ;;  %v3365_v19 = vmul.f32 1.442695, %v3325_v37  ;;  %v3367_v36 = vmul.f32 1.442695, %v3326_v42  ;;  %2787 = vst.msk [vmem:[#allocation2 + $0x8] sm:$0xff] %vm389_vm0, %v2771_v57  ;;  %3297 = vmax.xlane.f32.xlu1 %v3296_v51  ;;  %v7703_v43 = vpop.f32.mrf.mxu3 }
 0x5a9   : > { %v4847_v1 = vpop.eup %4846  ;;  %v7699_v50 = vadd.f32 %v4845_v24, %v4843_v44  ;;  %v3305_v11 = vmax.f32 %v7701_v6, %v7703_v43 }
 0x5aa   : > { %4850 = vpow2.f32 %v3365_v19  ;;  %v2772_v40 = vmul.f32 %v4847_v1, %v2711_v26  ;;  %3605 = vmatmul.f32.vlgmr.msrb.gmra.mxu0 %v4837_v3  ;;  %v1921_v19 = vadd.f32 %v7498_v48, %v7496_v49 }
 0x5ab   : > { %4852 = vpow2.f32 %v3367_v36  ;;  %3670 = vmatmul.f32.vlgmr.msrb.gmra.mxu1 %v4839_v23  ;;  %v4849_v57 = vpop.eup %4848 }
 0x5ac   : > { %2788 = vst.msk [vmem:[#allocation2 + $0x18] sm:$0xff] %vm389_vm0, %v2772_v40  ;;  %4854 = vrcp.f32 %v7500_v25  ;;  %v1927_v25 = vadd.f32 %v7530_v59, %v7527_v39  ;;  %v1936_v39 = vadd.f32 %v7586_v10, %v7584_v33 }
 0x5ae   : > { %v2648_v60 = vpop.f32.mrf.mxu0  ;;  %3306 = vmax.xlane.f32.xlu2 %v3305_v11  ;;  %v2713_v62 = vpop.f32.mrf.mxu1 }
 0x5af   : > { %v2714_v17 = vadd.f32 %v2713_v62, %v2648_v60  ;;  %2596 = vadd.xlane.f32.xlu0 %v7504_v9  ;;  %v7719_v23 = vpop.f32.mrf.mxu2 }
 0x5b0   : > { %v7708_v52 = vpop.eup %4850  ;;  %2608 = vadd.xlane.f32.xlu1 %v7580_v32  ;;  %v7721_v28 = vpop.f32.mrf.mxu3 }
 0x5b1   : > { %v7711_v16 = vpop.eup %4852  ;;  %v2773_v1 = vmul.f32 %v4849_v57, %v2714_v17  ;;  %v2003_v26 = vpop.permute.xlu0 %2002  ;;  %v3308_v32 = vmax.f32 %v7719_v23, %v7721_v28 }
 0x5b2   : > { %v7716_v3 = vadd.f32 %v7711_v16, %v7708_v52  ;;  %2049 = vst.msk [vmem:[#allocation2 + $0x20] sm:$0xff] %vm2046_vm1, %v2003_v26  ;;  %3608 = vmatmul.f32.gmra.mxu0 %v4833_v55  ;;  %v4855_v55 = vpop.eup %4854 }
 0x5b3   : > { %2789 = vst.msk [vmem:[#allocation2 + $0x28] sm:$0xff] %vm389_vm0, %v2773_v1  ;;  %3673 = vmatmul.f32.gmra.mxu1 %v4835_v61  ;;  %v2616_v61 = vadd.f32 %v7646_v53, %v7644_v4 }
 0x5b6   : > { %v7724_v9 = vpop.f32.mrf.mxu0  ;;  %v7728_v37 = vpop.f32.mrf.mxu1 }
 0x5b7   : > { %v7739_v62 = vpop.f32.mrf.mxu2 }
 0x5b8   : > { %3309 = vmax.xlane.f32.xlu1 %v3308_v32  ;;  %v2591_v51 = vpop.xlane.xlu1 %2590 }
 0x5b9   : > { %v3835_v42 = vld [vmem:[#allocation2 + $0x20] sm:$0xff]  ;;  %4856 = vrcp.f32 %v2591_v51 }
 0x5ba   : > { %3867 = vst [vmem:[%s7544_s29 + $0x20] sm:$0xff] %v3835_v42  ;;  %3611 = vmatmul.f32.gmra.mxu0 %v4843_v44  ;;  %4858 = vrcp.f32 %v7476_v13  ;;  %v1972_v44 = vmul.f32 %v4855_v55, %v1921_v19  ;;  %v7741_v13 = vpop.f32.mrf.mxu3 }
 0x5bb   : > { %3676 = vmatmul.f32.gmra.mxu1 %v4845_v24  ;;  %v3311_v49 = vmax.f32 %v7739_v62, %v7741_v13 }
 0x5bf   : > { %v2654_v36 = vpop.f32.mrf.mxu0  ;;  %v4857_v24 = vpop.eup %4856 }
 0x5c0   : > { %v2719_v40 = vpop.f32.mrf.mxu1  ;;  %v2594_v11 = vpop.xlane.xlu2 %2593  ;;  %2617 = vadd.xlane.f32.xlu1 %v2616_v61 }
 0x5c1   : > { %v2720_v60 = vadd.f32 %v2719_v40, %v2654_v36  ;;  %v4859_v57 = vpop.eup %4858  ;;  %4860 = vrcp.f32 %v2594_v11 }
 0x5c2   : > { %v1974_v4 = vmul.f32 %v4859_v57, %v1927_v25  ;;  %4862 = vrcp.f32 %v7494_v20  ;;  %v1924_v25 = vadd.f32 %v7509_v35, %v7507_v12  ;;  %v1933_v12 = vadd.f32 %v7573_v30, %v7571_v22 }
 0x5c3   : > { %v2775_v17 = vmul.f32 %v4857_v24, %v2720_v60  ;;  %2010 = vrot.lane.b32.xlu0 %v1972_v44, %s5160_s18  ;;  %4864 = vrcp.f32 %v7463_v31  ;;  %v2717_v22 = vadd.f32 %v7728_v37, %v7724_v9 }
 0x5c4   : > { %4866 = vrcp.f32 %v7479_v5 }
 0x5c5   : > { %2791 = vst.msk [vmem:[#allocation2 + $0x48] sm:$0xff] %vm389_vm0, %v2775_v17 }
 0x5c6   : > { %2014 = vrot.lane.b32.xlu2 %v1974_v4, %s5160_s18 }
 0x5c7   : > { %v2657_v48 = vpop.f32.mrf.mxu0  ;;  %v4861_v26 = vpop.eup %4860 }
 0x5c8   : > { %v2722_v59 = vpop.f32.mrf.mxu1  ;;  %v2009_v53 = vpop.permute.xlu2 %2008  ;;  %3312 = vmax.xlane.f32.xlu1 %v3311_v49 }
 0x5c9   : > { %v2723_v1 = vadd.f32 %v2722_v59, %v2657_v48  ;;  %2052 = vst.msk [vmem:[#allocation2 + $0x50] sm:$0xff] %vm2046_vm1, %v2009_v53  ;;  %v4863_v20 = vpop.eup %4862 }
 0x5ca   : > { %v1977_v42 = vmul.f32 %v4863_v20, %v1936_v39  ;;  %v4865_v44 = vpop.eup %4864 }
 0x5cb   : > { %v2776_v32 = vmul.f32 %v4861_v26, %v2723_v1  ;;  %v1973_v24 = vmul.f32 %v4865_v44, %v1924_v25  ;;  %v1942_v1 = vadd.f32 %v7618_v45, %v7614_v46  ;;  %v2604_v26 = vadd.f32 %v7562_v29, %v7560_v14 }
 0x5cc   : > { %v3302_v46 = vmax.f32 %v7682_v34, %v7684_v0  ;;  %v2619_v14 = vadd.f32 %v7668_v15, %v7666_v54 }
 0x5cd   : > { %2792 = vst.msk [vmem:[#allocation2 + $0x58] sm:$0xff] %vm389_vm0, %v2776_v32 }
 0x5ce   : > { %2020 = vrot.lane.b32.xlu2 %v1977_v42, %s5160_s18 }
 0x5cf   : > { %v7754_v51 = vpop.f32.mrf.mxu0 }
 0x5d0   : > { %v3841_v55 = vld [vmem:[#allocation2 + $0x50] sm:$0xff]  ;;  %v2007_v33 = vpop.permute.xlu1 %2006  ;;  %v7756_v10 = vpop.f32.mrf.mxu1 }
 0x5d1   : > { %3873 = vst [vmem:[%s7544_s29 + $0x50] sm:$0xff] %v3841_v55 }
 0x5d2   : > { %2051 = vst.msk [vmem:[#allocation2 + $0x40] sm:$0xff] %vm2046_vm1, %v2007_v33 }
 0x5d7   : > { %v7760_v61 = vpop.f32.mrf.mxu0 }
 0x5d8   : > { %v7763_v19 = vpop.f32.mrf.mxu1 }
 0x5d9   : > { %v3839_v36 = vld [vmem:[#allocation2 + $0x40] sm:$0xff] }
 0x5da   : > { %3871 = vst [vmem:[%s7544_s29 + $0x40] sm:$0xff] %v3839_v36 }
 0x5dc   : > { %v3280_v40 = vpop.xlane.xlu0 %3279 }
 0x5dd   : > { %v3323_v11 = vsub.f32 %v7443_v2, %v3280_v40  ;;  %v3324_v60 = vsub.f32 %v7445_v18, %v3280_v40  ;;  %v4867_v18 = vpop.eup %4866 }
 0x5de   : > { %v1976_v49 = vmul.f32 %v4867_v18, %v1933_v12  ;;  %v8419_v12 = vld [vmem:[#allocation37_spill] sm:$0xff]  ;;  %v8421_v18 = vld [vmem:[#allocation42_spill] sm:$0xff] }
 0x5df   : > { %v3361_v57 = vmul.f32 1.442695, %v3323_v11  ;;  %v3363_v17 = vmul.f32 1.442695, %v3324_v60  ;;  %v7770_v4 = vpop.f32.mrf.mxu0 }
 0x5e0   : > { %v7773_v31 = vpop.f32.mrf.mxu1 }
 0x5e1   : > { %4868 = vpow2.f32 %v3361_v57  ;;  %2012 = vrot.lane.b32.xlu1 %v1973_v24, %s5160_s18 }
 0x5e2   : > { %4870 = vpow2.f32 %v3363_v17 }
 0x5e4   : > { %v2588_v2 = vpop.xlane.xlu0 %2587 }
 0x5e5   : > { %4872 = vrcp.f32 %v2588_v2  ;;  %v8420_v2 = vld [vmem:[#allocation41_spill] sm:$0xff] }
 0x5e6   : > { %4874 = vrcp.f32 %v7488_v7 }
 0x5e7   : > { %v4869_v35 = vpop.eup %4868  ;;  %v2669_v48 = vpop.f32.mrf.mxu0 }
 0x5e8   : > { %v4871_v39 = vpop.eup %4870  ;;  %v2734_v59 = vpop.f32.mrf.mxu1  ;;  %3614 = vmatmul.f32.gmra.mxu0 %v4869_v35 }
 0x5e9   : > { %v7779_v5 = vadd.f32 %v2734_v59, %v2669_v48  ;;  %2018 = vrot.lane.b32.xlu1 %v1976_v49, %s5160_s18  ;;  %3679 = vmatmul.f32.gmra.mxu1 %v4871_v39  ;;  %v7782_v53 = vadd.f32 %v4871_v39, %v4869_v35  ;;  %v8422_v35 = vld [vmem:[#allocation29_spill] sm:$0xff] }
 0x5ea   : > { %v1930_v49 = vadd.f32 %v8422_v35, %v8421_v18  ;;  %v2729_v18 = vadd.f32 %v7763_v19, %v7760_v61 }
 0x5eb   : > { %v4873_v30 = vpop.eup %4872 }
 0x5ec   : > { %v2774_v7 = vmul.f32 %v4873_v30, %v2717_v22  ;;  %v4875_v20 = vpop.eup %4874  ;;  %v8423_v22 = vld [vmem:[#allocation25_spill] sm:$0xff] }
 0x5ed   : > { %2605 = vadd.xlane.f32.xlu0 %v2604_v26  ;;  %v1979_v32 = vmul.f32 %v4875_v20, %v1942_v1 }
 0x5ee   : > { %2790 = vst.msk [vmem:[#allocation2 + $0x38] sm:$0xff] %vm389_vm0, %v2774_v7 }
 0x5ef   : > { %v7791_v42 = vpop.f32.mrf.mxu0 }
 0x5f0   : > { %v7793_v55 = vpop.f32.mrf.mxu1  ;;  %3617 = vmatmul.f32.gmra.mxu0 %v7708_v52 }
 0x5f1   : > { %2024 = vrot.lane.b32.xlu1 %v1979_v32, %s5160_s18  ;;  %3682 = vmatmul.f32.gmra.mxu1 %v7711_v16 }
 0x5f5   : > { %3303 = vmax.xlane.f32.xlu0 %v3302_v46 }
 0x5f7   : > { %2620 = vadd.xlane.f32.xlu2 %v2619_v14  ;;  %v7802_v29 = vpop.f32.mrf.mxu0  ;;  %v2005_v45 = vpop.permute.xlu0 %2004  ;;  %v2732_v14 = vadd.f32 %v7773_v31, %v7770_v4  ;;  %v8426_v4 = vld [vmem:[#allocation47_spill] sm:$0xff] }
 0x5f8   : > { %v7804_v9 = vpop.f32.mrf.mxu1  ;;  %2050 = vst.msk [vmem:[#allocation2 + $0x30] sm:$0xff] %vm2046_vm1, %v2005_v45 }
 0x5fb   : > { %v3286_v52 = vpop.xlane.xlu1 %3285 }
 0x5fc   : > { %v3327_v37 = vsub.f32 %v7536_v47, %v3286_v52  ;;  %v3328_v16 = vsub.f32 %v7548_v63, %v3286_v52  ;;  %v8418_v63 = vld [vmem:[#allocation22_spill] sm:$0xff] }
 0x5fd   : > { %2614 = vadd.xlane.f32.xlu0 %v7611_v56  ;;  %v8424_v52 = vld [vmem:[#allocation34_spill] sm:$0xff] }
 0x5fe   : > { %v3369_v33 = vmul.f32 1.442695, %v3327_v37  ;;  %v3371_v36 = vmul.f32 1.442695, %v3328_v16 }
 0x5ff   : > { %v3837_v25 = vld [vmem:[#allocation2 + $0x30] sm:$0xff]  ;;  %v2678_v40 = vpop.f32.mrf.mxu0 }
 0x600   : > { %3869 = vst [vmem:[%s7544_s29 + $0x30] sm:$0xff] %v3837_v25  ;;  %4876 = vpow2.f32 %v3369_v33  ;;  %v2743_v54 = vpop.f32.mrf.mxu1  ;;  %v8425_v33 = vld [vmem:[#allocation18_spill] sm:$0xff] }
 0x601   : > { %4878 = vpow2.f32 %v3371_v36  ;;  %v7811_v15 = vadd.f32 %v2743_v54, %v2678_v40  ;;  %v3295_v11 = vpop.xlane.xlu2 %3294  ;;  %v8427_v54 = vld [vmem:[#allocation27_spill] sm:$0xff] }
 0x602   : > { %4880 = vrcp.f32 %v8418_v63  ;;  %v3333_v37 = vsub.f32 %v8424_v52, %v3295_v11  ;;  %v3334_v36 = vsub.f32 %v8425_v33, %v3295_v11 }
 0x603   : > { %v3289_v60 = vpop.xlane.xlu1 %3288  ;;  %4882 = vrcp.f32 %v8419_v12 }
 0x604   : > { %v3329_v44 = vsub.f32 %v7566_v8, %v3289_v60  ;;  %v3330_v47 = vsub.f32 %v7569_v21, %v3289_v60  ;;  %v1945_v8 = vadd.f32 %v8420_v2, %v7632_v38 }
 0x606   : > { %v7815_v24 = vpop.eup %4876  ;;  %v3373_v56 = vmul.f32 1.442695, %v3329_v44  ;;  %v3375_v57 = vmul.f32 1.442695, %v3330_v47  ;;  %v3381_v47 = vmul.f32 1.442695, %v3333_v37 }
 0x607   : > { %v7818_v17 = vpop.eup %4878  ;;  %3620 = vmatmul.f32.gmra.mxu0 %v7815_v24 }
 0x608   : > { %4884 = vpow2.f32 %v3373_v56  ;;  %3685 = vmatmul.f32.gmra.mxu1 %v7818_v17  ;;  %v4881_v39 = vpop.eup %4880  ;;  %v3428_v37 = vadd.f32 %v7818_v17, %v7815_v24 }
 0x609   : > { %4886 = vpow2.f32 %v3375_v57  ;;  %v2603_v21 = vpop.xlane.xlu2 %2602  ;;  %v4883_v1 = vpop.eup %4882  ;;  %v1980_v26 = vmul.f32 %v4881_v39, %v1945_v8  ;;  %v3383_v57 = vmul.f32 1.442695, %v3334_v36 }
 0x60a   : > { %4888 = vrcp.f32 %v2603_v21  ;;  %v1975_v38 = vmul.f32 %v4883_v1, %v1930_v49 }
 0x60b   : > { %v3292_v48 = vpop.xlane.xlu1 %3291 }
 0x60c   : > { %v3331_v59 = vsub.f32 %v7582_v58, %v3292_v48  ;;  %v3332_v30 = vsub.f32 %v8423_v22, %v3292_v48 }
 0x60e   : > { %v7829_v7 = vpop.eup %4884  ;;  %v3377_v20 = vmul.f32 1.442695, %v3331_v59  ;;  %v3379_v32 = vmul.f32 1.442695, %v3332_v30 }
 0x60f   : > { %v7831_v46 = vpop.eup %4886  ;;  %2026 = vrot.lane.b32.xlu2 %v1980_v26, %s5160_s18  ;;  %3623 = vmatmul.f32.gmra.mxu0 %v7829_v7  ;;  %v7837_v45 = vpop.f32.mrf.mxu0 }
 0x610   : > { %v4889_v58 = vpop.eup %4888  ;;  %4890 = vpow2.f32 %v3377_v20  ;;  %3688 = vmatmul.f32.gmra.mxu1 %v7831_v46  ;;  %v7841_v16 = vpop.f32.mrf.mxu1 }
 0x611   : > { %v2779_v25 = vmul.f32 %v4889_v58, %v2732_v14  ;;  %4892 = vpow2.f32 %v3379_v32  ;;  %v3301_v40 = vpop.xlane.xlu2 %3300  ;;  %2016 = vrot.lane.b32.xlu0 %v1975_v38, %s5160_s18  ;;  %v2741_v38 = vadd.f32 %v7804_v9, %v7802_v29 }
 0x612   : > { %v3337_v31 = vsub.f32 %v8426_v4, %v3301_v40  ;;  %v3338_v60 = vsub.f32 %v8427_v54, %v3301_v40  ;;  %v2726_v40 = vadd.f32 %v7756_v10, %v7754_v51  ;;  %v2738_v4 = vadd.f32 %v7793_v55, %v7791_v42 }
 0x613   : > { %2795 = vst.msk [vmem:[#allocation2 + $0x88] sm:$0xff] %vm389_vm0, %v2779_v25  ;;  %v2600_v44 = vpop.xlane.xlu1 %2599 }
 0x614   : > { %v3389_v63 = vmul.f32 1.442695, %v3337_v31  ;;  %v3391_v56 = vmul.f32 1.442695, %v3338_v60  ;;  %4894 = vrcp.f32 %v2600_v44 }
 0x616   : > { %v4891_v12 = vpop.eup %4890  ;;  %4896 = vpow2.f32 %v3389_v63 }
 0x617   : > { %v4893_v11 = vpop.eup %4892  ;;  %4898 = vpow2.f32 %v3391_v56  ;;  %3626 = vmatmul.f32.gmra.mxu0 %v4891_v12  ;;  %v7848_v2 = vpop.f32.mrf.mxu0 }
 0x618   : > { %4900 = vpow2.f32 %v3381_v47  ;;  %3691 = vmatmul.f32.gmra.mxu1 %v4893_v11  ;;  %v7850_v8 = vpop.f32.mrf.mxu1  ;;  %v7852_v21 = vadd.f32 %v4893_v11, %v4891_v12  ;;  %v7894_v11 = vpop.f32.mrf.mxu2 }
 0x619   : > { %4902 = vpow2.f32 %v3383_v57  ;;  %v2612_v35 = vpop.xlane.xlu2 %2611 }
 0x61a   : > { %v4895_v49 = vpop.eup %4894  ;;  %4904 = vrcp.f32 %v2612_v35 }
 0x61b   : > { %v2778_v48 = vmul.f32 %v4895_v49, %v2729_v18  ;;  %v3298_v39 = vpop.xlane.xlu1 %3297  ;;  %3420 = vadd.xlane.f32.xlu1 %v7699_v50  ;;  %v7896_v18 = vpop.f32.mrf.mxu3  ;;  %v8428_v49 = vld [vmem:[#allocation24_spill] sm:$0xff] }
 0x61c   : > { %v4897_v59 = vpop.eup %4896  ;;  %v3335_v22 = vsub.f32 %v7622_v27, %v3298_v39  ;;  %v3336_v30 = vsub.f32 %v7624_v41, %v3298_v39  ;;  %v3314_v39 = vmax.f32 %v7894_v11, %v7896_v18 }
 0x61d   : > { %v4899_v1 = vpop.eup %4898  ;;  %2794 = vst.msk [vmem:[#allocation2 + $0x78] sm:$0xff] %vm389_vm0, %v2778_v48 }
 0x61e   : > { %v4901_v26 = vpop.eup %4900  ;;  %v3385_v20 = vmul.f32 1.442695, %v3335_v22  ;;  %v3387_v32 = vmul.f32 1.442695, %v3336_v30  ;;  %v7860_v61 = vadd.f32 %v4899_v1, %v4897_v59 }
 0x61f   : > { %v4903_v19 = vpop.eup %4902  ;;  %3629 = vmatmul.f32.gmra.mxu0 %v4901_v26  ;;  %v2687_v14 = vpop.f32.mrf.mxu0 }
 0x620   : > { %v4905_v50 = vpop.eup %4904  ;;  %4906 = vpow2.f32 %v3385_v20  ;;  %3694 = vmatmul.f32.gmra.mxu1 %v4903_v19  ;;  %v2752_v27 = vpop.f32.mrf.mxu1  ;;  %v3437_v54 = vadd.f32 %v4903_v19, %v4901_v26 }
 0x621   : > { %v2782_v58 = vmul.f32 %v4905_v50, %v2741_v38  ;;  %4908 = vpow2.f32 %v3387_v32  ;;  %v7864_v41 = vadd.f32 %v2752_v27, %v2687_v14  ;;  %v7866_v52 = vpop.xlane.xlu2 %3306 }
 0x622   : > { %v2597_v33 = vpop.xlane.xlu0 %2596 }
 0x623   : > { %2798 = vst.msk [vmem:[#allocation2 + $0xb8] sm:$0xff] %vm389_vm0, %v2782_v58  ;;  %v2609_v36 = vpop.xlane.xlu1 %2608  ;;  %3429 = vadd.xlane.f32.xlu1 %v3428_v37  ;;  %4910 = vrcp.f32 %v2597_v33 }
 0x624   : > { %4912 = vrcp.f32 %v2609_v36  ;;  %v8430_v36 = vld [vmem:[#allocation23_spill] sm:$0xff] }
 0x626   : > { %v7871_v29 = vpop.eup %4906 }
 0x627   : > { %v7873_v9 = vpop.eup %4908  ;;  %3632 = vmatmul.f32.gmra.mxu0 %v7871_v29  ;;  %v7876_v25 = vpop.f32.mrf.mxu0 }
 0x628   : > { %3697 = vmatmul.f32.gmra.mxu1 %v7873_v9  ;;  %v7881_v24 = vpop.f32.mrf.mxu1 }
 0x629   : > { %v4911_v17 = vpop.eup %4910  ;;  %v2015_v31 = vpop.permute.xlu2 %2014 }
 0x62a   : > { %v4913_v60 = vpop.eup %4912  ;;  %v2777_v44 = vmul.f32 %v4911_v17, %v2726_v40  ;;  %2055 = vst.msk [vmem:[#allocation2 + $0x80] sm:$0xff] %vm2046_vm1, %v2015_v31 }
 0x62b   : > { %v2781_v47 = vmul.f32 %v4913_v60, %v2738_v4  ;;  %v7886_v63 = vpop.xlane.xlu1 %3309  ;;  %3438 = vadd.xlane.f32.xlu1 %v3437_v54 }
 0x62c   : > { %2793 = vst.msk [vmem:[#allocation2 + $0x68] sm:$0xff] %vm389_vm0, %v2777_v44 }
 0x62d   : > { %2797 = vst.msk [vmem:[#allocation2 + $0xa8] sm:$0xff] %vm389_vm0, %v2781_v47 }
 0x62f   : > { %3635 = vmatmul.f32.gmra.mxu0 %v4897_v59  ;;  %v3609_v51 = vpop.f32.mrf.mxu0  ;;  %v2747_v59 = vadd.f32 %v7841_v16, %v7837_v45  ;;  %v8429_v45 = vld [vmem:[#allocation39_spill] sm:$0xff]  ;;  %v3341_v16 = vsub.f32 %v7701_v6, %v7866_v52  ;;  %v8431_v6 = vld [vmem:[#allocation21_spill] sm:$0xff] }
 0x630   : > { %3700 = vmatmul.f32.gmra.mxu1 %v4899_v1  ;;  %v3674_v10 = vpop.f32.mrf.mxu1  ;;  %v1939_v40 = vadd.f32 %v8431_v6, %v8430_v36 }
 0x631   : > { %v3847_v42 = vld [vmem:[#allocation2 + $0x80] sm:$0xff]  ;;  %v7890_v55 = vadd.f32 %v3674_v10, %v3609_v51  ;;  %v2021_v56 = vpop.permute.xlu2 %2020  ;;  %v3397_v37 = vmul.f32 1.442695, %v3341_v16 }
 0x632   : > { %3879 = vst [vmem:[%s7544_s29 + $0x80] sm:$0xff] %v3847_v42 }
 0x633   : > { %2058 = vst.msk [vmem:[#allocation2 + $0xb0] sm:$0xff] %vm2046_vm1, %v2021_v56  ;;  %v2618_v57 = vpop.xlane.xlu1 %2617 }
 0x634   : > { %4914 = vrcp.f32 %v2618_v57 }
 0x635   : > { %v2011_v12 = vpop.permute.xlu0 %2010 }
 0x636   : > { %2053 = vst.msk [vmem:[#allocation2 + $0x60] sm:$0xff] %vm2046_vm1, %v2011_v12 }
 0x637   : > { %v3612_v35 = vpop.f32.mrf.mxu0 }
 0x638   : > { %3414 = vadd.xlane.f32.xlu2 %v8428_v49  ;;  %v3677_v48 = vpop.f32.mrf.mxu1 }
 0x639   : > { %v7904_v22 = vadd.f32 %v3677_v48, %v3612_v35 }
 0x63a   : > { %v4915_v30 = vpop.eup %4914  ;;  %v3853_v1 = vld [vmem:[#allocation2 + $0xb0] sm:$0xff] }
 0x63b   : > { %3885 = vst [vmem:[%s7544_s29 + $0xb0] sm:$0xff] %v3853_v1  ;;  %v2784_v26 = vmul.f32 %v4915_v30, %v2747_v59  ;;  %v3313_v20 = vpop.xlane.xlu1 %3312  ;;  %3315 = vmax.xlane.f32.xlu0 %v3314_v39 }
 0x63c   : > { %v3345_v32 = vsub.f32 %v7739_v62, %v3313_v20  ;;  %v3346_v19 = vsub.f32 %v7741_v13, %v3313_v20  ;;  %v3342_v62 = vsub.f32 %v7703_v43, %v7866_v52  ;;  %v3431_v13 = vadd.f32 %v7831_v46, %v7829_v7 }
 0x63d   : > { %2800 = vst.msk [vmem:[#allocation2 + $0xd8] sm:$0xff] %vm389_vm0, %v2784_v26  ;;  %v3843_v38 = vld [vmem:[#allocation2 + $0x60] sm:$0xff]  ;;  %v3440_v7 = vadd.f32 %v7873_v9, %v7871_v29 }
 0x63e   : > { %3875 = vst [vmem:[%s7544_s29 + $0x60] sm:$0xff] %v3843_v38  ;;  %v3405_v14 = vmul.f32 1.442695, %v3345_v32  ;;  %v3407_v50 = vmul.f32 1.442695, %v3346_v19  ;;  %v3343_v19 = vsub.f32 %v7719_v23, %v7886_v63 }
 0x640   : > { %4916 = vpow2.f32 %v3405_v14  ;;  %3423 = vadd.xlane.f32.xlu2 %v7782_v53  ;;  %v3399_v53 = vmul.f32 1.442695, %v3342_v62  ;;  %v8432_v14 = vld [vmem:[#allocation30_spill] sm:$0xff]  ;;  %v3401_v62 = vmul.f32 1.442695, %v3343_v19 }
 0x641   : > { %4918 = vpow2.f32 %v3407_v50  ;;  %v8433_v50 = vld [vmem:[#allocation38_spill] sm:$0xff] }
 0x642   : > { %4920 = vrcp.f32 %v8429_v45  ;;  %v2622_v45 = vadd.f32 %v8433_v50, %v8432_v14 }
 0x643   : > { %4922 = vpow2.f32 %v3397_v37 }
 0x644   : > { %4924 = vpow2.f32 %v3399_v53  ;;  %v8434_v53 = vld [vmem:[#allocation32_spill] sm:$0xff] }
 0x646   : > { %v7917_v27 = vpop.eup %4916 }
 0x647   : > { %v7921_v58 = vpop.eup %4918  ;;  %3647 = vmatmul.f32.vlgmr.msra.gmra.mxu2 %v7917_v27 }
 0x648   : > { %3712 = vmatmul.f32.vlgmr.msra.gmra.mxu3 %v7921_v58  ;;  %3432 = vadd.xlane.f32.xlu2 %v3431_v13  ;;  %v4921_v33 = vpop.eup %4920  ;;  %v3455_v23 = vadd.f32 %v7921_v58, %v7917_v27  ;;  %v8435_v27 = vld [vmem:[#allocation20_spill] sm:$0xff]  ;;  %v8436_v58 = vld [vmem:[#allocation31_spill] sm:$0xff] }
 0x649   : > { %v1978_v43 = vmul.f32 %v4921_v33, %v1939_v40  ;;  %v4923_v46 = vpop.eup %4922  ;;  %v1948_v40 = vadd.f32 %v8436_v58, %v8435_v27 }
 0x64a   : > { %v4925_v52 = vpop.eup %4924 }
 0x64b   : > { %v3449_v4 = vadd.f32 %v4925_v52, %v4923_v46 }
 0x64f   : > { %2022 = vrot.lane.b32.xlu0 %v1978_v43, %s5160_s18 }
 0x650   : > { %3441 = vadd.xlane.f32.xlu2 %v3440_v7 }
 0x653   : > { %v2013_v17 = vpop.permute.xlu1 %2012 }
 0x654   : > { %2054 = vst.msk [vmem:[#allocation2 + $0x70] sm:$0xff] %vm2046_vm1, %v2013_v17 }
 0x658   : > { %3450 = vadd.xlane.f32.xlu2 %v3449_v4 }
 0x65b   : > { %v3845_v31 = vld [vmem:[#allocation2 + $0x70] sm:$0xff]  ;;  %v2019_v54 = vpop.permute.xlu1 %2018 }
 0x65c   : > { %3877 = vst [vmem:[%s7544_s29 + $0x70] sm:$0xff] %v3845_v31 }
 0x65d   : > { %2057 = vst.msk [vmem:[#allocation2 + $0xa0] sm:$0xff] %vm2046_vm1, %v2019_v54 }
 0x660   : > { %v2606_v60 = vpop.xlane.xlu0 %2605 }
 0x661   : > { %4926 = vrcp.f32 %v2606_v60 }
 0x663   : > { %v2025_v44 = vpop.permute.xlu1 %2024 }
 0x664   : > { %v3851_v29 = vld [vmem:[#allocation2 + $0xa0] sm:$0xff]  ;;  %2060 = vst.msk [vmem:[#allocation2 + $0xd0] sm:$0xff] %vm2046_vm1, %v2025_v44 }
 0x665   : > { %3883 = vst [vmem:[%s7544_s29 + $0xa0] sm:$0xff] %v3851_v29  ;;  %v7935_v9 = vpop.f32.mrf.mxu0 }
 0x666   : > { %v7937_v47 = vpop.f32.mrf.mxu1 }
 0x667   : > { %v4927_v51 = vpop.eup %4926 }
 0x668   : > { %v2780_v10 = vmul.f32 %v4927_v51, %v7779_v5  ;;  %v3304_v42 = vpop.xlane.xlu0 %3303  ;;  %v2750_v5 = vadd.f32 %v7850_v8, %v7848_v2  ;;  %v3344_v2 = vsub.f32 %v7721_v28, %v7886_v63 }
 0x669   : > { %v3339_v56 = vsub.f32 %v7682_v34, %v3304_v42  ;;  %v3340_v57 = vsub.f32 %v7684_v0, %v3304_v42 }
 0x66a   : > { %2796 = vst.msk [vmem:[#allocation2 + $0x98] sm:$0xff] %vm389_vm0, %v2780_v10  ;;  %v2621_v12 = vpop.xlane.xlu2 %2620  ;;  %v3403_v13 = vmul.f32 1.442695, %v3344_v2  ;;  %v3672_v10 = vadd.f32 %v7881_v24, %v7876_v25 }
 0x66b   : > { %v3857_v35 = vld [vmem:[#allocation2 + $0xd0] sm:$0xff]  ;;  %v3393_v49 = vmul.f32 1.442695, %v3339_v56  ;;  %v3395_v48 = vmul.f32 1.442695, %v3340_v57  ;;  %4928 = vrcp.f32 %v2621_v12 }
 0x66c   : > { %3889 = vst [vmem:[%s7544_s29 + $0xd0] sm:$0xff] %v3857_v35 }
 0x66d   : > { %4930 = vpow2.f32 %v3393_v49  ;;  %v3618_v39 = vpop.f32.mrf.mxu0  ;;  %v8437_v49 = vld [vmem:[#allocation33_spill] sm:$0xff] }
 0x66e   : > { %4932 = vpow2.f32 %v3395_v48  ;;  %v3683_v59 = vpop.f32.mrf.mxu1 }
 0x66f   : > { %v7944_v30 = vadd.f32 %v3683_v59, %v3618_v39 }
 0x670   : > { %v2615_v34 = vpop.xlane.xlu0 %2614 }
 0x671   : > { %v4929_v1 = vpop.eup %4928  ;;  %4934 = vrcp.f32 %v2615_v34 }
 0x672   : > { %v2785_v0 = vmul.f32 %v4929_v1, %v2750_v5  ;;  %v2027_v26 = vpop.permute.xlu2 %2026  ;;  %4936 = vpow2.f32 %v3401_v62 }
 0x673   : > { %v4931_v20 = vpop.eup %4930  ;;  %2061 = vst.msk [vmem:[#allocation2 + $0xe0] sm:$0xff] %vm2046_vm1, %v2027_v26  ;;  %4938 = vpow2.f32 %v3403_v13 }
 0x674   : > { %v4933_v32 = vpop.eup %4932  ;;  %2801 = vst.msk [vmem:[#allocation2 + $0xe8] sm:$0xff] %vm389_vm0, %v2785_v0  ;;  %3638 = vmatmul.f32.gmra.mxu0 %v4931_v20  ;;  %4940 = vrcp.f32 %v8434_v53 }
 0x675   : > { %3703 = vmatmul.f32.gmra.mxu1 %v4933_v32  ;;  %v3446_v38 = vadd.f32 %v4933_v32, %v4931_v20 }
 0x677   : > { %v4935_v8 = vpop.eup %4934  ;;  %3447 = vadd.xlane.f32.xlu1 %v3446_v38 }
 0x678   : > { %v2783_v16 = vmul.f32 %v4935_v8, %v7811_v15  ;;  %v7961_v28 = vpop.eup %4936 }
 0x679   : > { %2623 = vadd.xlane.f32.xlu0 %v2622_v45  ;;  %v7963_v15 = vpop.eup %4938 }
 0x67a   : > { %2799 = vst.msk [vmem:[#allocation2 + $0xc8] sm:$0xff] %vm389_vm0, %v2783_v16  ;;  %v3859_v37 = vld [vmem:[#allocation2 + $0xe0] sm:$0xff]  ;;  %v4941_v43 = vpop.eup %4940 }
 0x67b   : > { %3891 = vst [vmem:[%s7544_s29 + $0xe0] sm:$0xff] %v3859_v37  ;;  %v1981_v7 = vmul.f32 %v4941_v43, %v1948_v40 }
 0x67c   : > { %3641 = vmatmul.f32.gmra.mxu0 %v4923_v46 }
 0x67d   : > { %3706 = vmatmul.f32.gmra.mxu1 %v4925_v52 }
 0x67f   : > { %3456 = vadd.xlane.f32.xlu1 %v3455_v23 }
 0x683   : > { %v2017_v63 = vpop.permute.xlu0 %2016 }
 0x684   : > { %2056 = vst.msk [vmem:[#allocation2 + $0x90] sm:$0xff] %vm2046_vm1, %v2017_v63  ;;  %v3621_v33 = vpop.f32.mrf.mxu0  ;;  %3644 = vmatmul.f32.gmra.mxu0 %v7961_v28 }
 0x685   : > { %v3686_v36 = vpop.f32.mrf.mxu1  ;;  %3709 = vmatmul.f32.gmra.mxu1 %v7963_v15 }
 0x686   : > { %v7969_v6 = vadd.f32 %v3686_v36, %v3621_v33 }
 0x68b   : > { %v3849_v46 = vld [vmem:[#allocation2 + $0x90] sm:$0xff] }
 0x68c   : > { %3881 = vst [vmem:[%s7544_s29 + $0x90] sm:$0xff] %v3849_v46  ;;  %v3624_v52 = vpop.f32.mrf.mxu0 }
 0x68d   : > { %v3689_v17 = vpop.f32.mrf.mxu1  ;;  %2028 = vrot.lane.b32.xlu0 %v1981_v7, %s5160_s18 }
 0x68e   : > { %v3690_v1 = vadd.f32 %v3689_v17, %v3624_v52  ;;  %v3421_v14 = vpop.xlane.xlu1 %3420 }
 0x694   : > { %v3627_v4 = vpop.f32.mrf.mxu0 }
 0x695   : > { %v3692_v31 = vpop.f32.mrf.mxu1 }
 0x696   : > { %v7975_v54 = vadd.f32 %v3692_v31, %v3627_v4  ;;  %v3430_v50 = vpop.xlane.xlu1 %3429 }
 0x69c   : > { %v3630_v59 = vpop.f32.mrf.mxu0 }
 0x69d   : > { %v3695_v5 = vpop.f32.mrf.mxu1 }
 0x69e   : > { %v3439_v13 = vpop.xlane.xlu1 %3438  ;;  %v3696_v27 = vadd.f32 %v3695_v5, %v3630_v59 }
 0x6a4   : > { %v3633_v20 = vpop.f32.mrf.mxu0 }
 0x6a5   : > { %v3698_v32 = vpop.f32.mrf.mxu1 }
 0x6a6   : > { %v3699_v19 = vadd.f32 %v3698_v32, %v3633_v20 }
 0x6ab   : > { %v3415_v60 = vpop.xlane.xlu2 %3414 }
 0x6ac   : > { %4942 = vrcp.f32 %v3415_v60  ;;  %v7995_v16 = vpop.f32.mrf.mxu0 }
 0x6ad   : > { %v7998_v62 = vpop.f32.mrf.mxu1 }
 0x6ae   : > { %v3316_v44 = vpop.xlane.xlu0 %3315 }
 0x6af   : > { %v3347_v29 = vsub.f32 %v7894_v11, %v3316_v44  ;;  %v3348_v51 = vsub.f32 %v7896_v18, %v3316_v44  ;;  %v3681_v11 = vadd.f32 %v7937_v47, %v7935_v9 }
 0x6b1   : > { %v3409_v42 = vmul.f32 1.442695, %v3347_v29  ;;  %v3411_v56 = vmul.f32 1.442695, %v3348_v51 }
 0x6b2   : > { %v4943_v57 = vpop.eup %4942 }
 0x6b3   : > { %4944 = vpow2.f32 %v3409_v42  ;;  %v3424_v12 = vpop.xlane.xlu2 %3423  ;;  %v3735_v35 = vmul.f32 %v4943_v57, %v3672_v10 }
 0x6b4   : > { %4946 = vpow2.f32 %v3411_v56 }
 0x6b5   : > { %4948 = vrcp.f32 %v3424_v12  ;;  %3767 = vrot.lane.b32.xlu1 %v3735_v35, %s5160_s18 }
 0x6b7   : > { %3417 = vadd.xlane.f32.xlu0 %v8437_v49 }
 0x6b9   : > { %v4945_v48 = vpop.eup %4944 }
 0x6ba   : > { %v4947_v39 = vpop.eup %4946  ;;  %3650 = vmatmul.f32.gmra.mxu2 %v4945_v48 }
 0x6bb   : > { %v4949_v18 = vpop.eup %4948  ;;  %v3433_v25 = vpop.xlane.xlu2 %3432  ;;  %3715 = vmatmul.f32.gmra.mxu3 %v4947_v39  ;;  %v3458_v24 = vadd.f32 %v4947_v39, %v4945_v48 }
 0x6bc   : > { %4950 = vrcp.f32 %v3433_v25  ;;  %v3738_v34 = vmul.f32 %v4949_v18, %v3681_v11 }
 0x6bd   : > { %3459 = vadd.xlane.f32.xlu2 %v3458_v24 }
 0x6be   : > { %3773 = vrot.lane.b32.xlu1 %v3738_v34, %s5160_s18 }
 0x6bf   : > { %3426 = vadd.xlane.f32.xlu0 %v7716_v3  ;;  %v3452_v3 = vadd.f32 %v7963_v15, %v7961_v28 }
 0x6c1   : > { %v2023_v0 = vpop.permute.xlu0 %2022 }
 0x6c2   : > { %v4951_v26 = vpop.eup %4950  ;;  %2059 = vst.msk [vmem:[#allocation2 + $0xc0] sm:$0xff] %vm2046_vm1, %v2023_v0 }
 0x6c3   : > { %v3442_v9 = vpop.xlane.xlu2 %3441  ;;  %v3741_v47 = vmul.f32 %v4951_v26, %v3690_v1 }
 0x6c4   : > { %4952 = vrcp.f32 %v3442_v9 }
 0x6c5   : > { %4954 = vrcp.f32 %v3421_v14 }
 0x6c6   : > { %3779 = vrot.lane.b32.xlu1 %v3741_v47, %s5160_s18  ;;  %4956 = vrcp.f32 %v3430_v50 }
 0x6c7   : > { %3435 = vadd.xlane.f32.xlu0 %v7852_v21 }
 0x6c9   : > { %v3855_v38 = vld [vmem:[#allocation2 + $0xc0] sm:$0xff] }
 0x6ca   : > { %v4953_v2 = vpop.eup %4952  ;;  %3887 = vst [vmem:[%s7544_s29 + $0xc0] sm:$0xff] %v3855_v38  ;;  %v3648_v60 = vpop.f32.mrf.mxu2 }
 0x6cb   : > { %v3744_v8 = vmul.f32 %v4953_v2, %v3699_v19  ;;  %v4955_v45 = vpop.eup %4954  ;;  %v3451_v53 = vpop.xlane.xlu2 %3450 }
 0x6cc   : > { %v3737_v21 = vmul.f32 %v4955_v45, %v7904_v22  ;;  %v3713_v44 = vpop.f32.mrf.mxu3 }
 0x6cd   : > { %v3714_v51 = vadd.f32 %v3713_v44, %v3648_v60 }
 0x6ce   : > { %3785 = vrot.lane.b32.xlu1 %v3744_v8, %s5160_s18 }
 0x6cf   : > { %3444 = vadd.xlane.f32.xlu0 %v7860_v61  ;;  %v4957_v61 = vpop.eup %4956 }
 0x6d0   : > { %v3740_v28 = vmul.f32 %v4957_v61, %v7969_v6 }
 0x6d7   : > { %3453 = vadd.xlane.f32.xlu0 %v3452_v3 }
 0x6ea   : > { %v3448_v33 = vpop.xlane.xlu1 %3447 }
 0x6eb   : > { %3771 = vrot.lane.b32.xlu0 %v3737_v21, %s5160_s18 }
 0x6ec   : > { %v2624_v37 = vpop.xlane.xlu0 %2623 }
 0x6ed   : > { %4958 = vrcp.f32 %v2624_v37 }
 0x6ee   : > { %4960 = vrcp.f32 %v3439_v13 }
 0x6ef   : > { %4962 = vrcp.f32 %v3451_v53 }
 0x6f0   : > { %4964 = vrcp.f32 %v3448_v33 }
 0x6f1   : > { %v3639_v23 = vpop.f32.mrf.mxu0 }
 0x6f2   : > { %v3704_v63 = vpop.f32.mrf.mxu1  ;;  %v3457_v46 = vpop.xlane.xlu1 %3456 }
 0x6f3   : > { %v4959_v15 = vpop.eup %4958  ;;  %3777 = vrot.lane.b32.xlu0 %v3740_v28, %s5160_s18  ;;  %v3705_v52 = vadd.f32 %v3704_v63, %v3639_v23  ;;  %4966 = vrcp.f32 %v3457_v46 }
 0x6f4   : > { %v2786_v22 = vmul.f32 %v4959_v15, %v7864_v41  ;;  %v4961_v36 = vpop.eup %4960 }
 0x6f5   : > { %v3743_v40 = vmul.f32 %v4961_v36, %v3696_v27  ;;  %v4963_v6 = vpop.eup %4962 }
 0x6f6   : > { %2802 = vst.msk [vmem:[#allocation2 + $0xf8] sm:$0xff] %vm389_vm0, %v2786_v22  ;;  %v4965_v4 = vpop.eup %4964 }
 0x6f7   : > { %v3746_v31 = vmul.f32 %v4965_v4, %v3705_v52 }
 0x6f9   : > { %v3642_v58 = vpop.f32.mrf.mxu0  ;;  %v4967_v29 = vpop.eup %4966 }
 0x6fa   : > { %v3707_v43 = vpop.f32.mrf.mxu1  ;;  %v3749_v42 = vmul.f32 %v4967_v29, %v3714_v51 }
 0x6fb   : > { %v3708_v7 = vadd.f32 %v3707_v43, %v3642_v58  ;;  %3783 = vrot.lane.b32.xlu0 %v3743_v40, %s5160_s18 }
 0x6fd   : > { %v3747_v17 = vmul.f32 %v4963_v6, %v3708_v7 }
 0x6ff   : > { %3791 = vrot.lane.b32.xlu1 %v3747_v17, %s5160_s18  ;;  %v2029_v41 = vpop.permute.xlu0 %2028 }
 0x700   : > { %2062 = vst.msk [vmem:[#allocation2 + $0xf0] sm:$0xff] %vm2046_vm1, %v2029_v41 }
 0x701   : > { %v3645_v14 = vpop.f32.mrf.mxu0 }
 0x703   : > { %3789 = vrot.lane.b32.xlu0 %v3746_v31, %s5160_s18 }
 0x707   : > { %v3861_v10 = vld [vmem:[#allocation2 + $0xf0] sm:$0xff] }
 0x708   : > { %3893 = vst [vmem:[%s7544_s29 + $0xf0] sm:$0xff] %v3861_v10 }
 0x70b   : > { %3795 = vrot.lane.b32.xlu0 %v3749_v42, %s5160_s18 }
 0x727   : > { %v3768_v56 = vpop.permute.xlu1 %3767 }
 0x728   : > { %3815 = vst.msk [vmem:[#allocation2 + $0x8] sm:$0xff] %vm2046_vm1, %v3768_v56 }
 0x72a   : > { %v3418_v57 = vpop.xlane.xlu0 %3417 }
 0x72b   : > { %4968 = vrcp.f32 %v3418_v57 }
 0x72f   : > { %v3832_v12 = vld [vmem:[#allocation2 + $0x8] sm:$0xff] }
 0x730   : > { %3864 = vst [vmem:[%s7544_s29 + $0x8] sm:$0xff] %v3832_v12  ;;  %v3774_v35 = vpop.permute.xlu1 %3773  ;;  %v3460_v11 = vpop.xlane.xlu2 %3459 }
 0x731   : > { %v4969_v49 = vpop.eup %4968  ;;  %3818 = vst.msk [vmem:[#allocation2 + $0x38] sm:$0xff] %vm2046_vm1, %v3774_v35 }
 0x732   : > { %v3427_v48 = vpop.xlane.xlu0 %3426  ;;  %v3736_v39 = vmul.f32 %v4969_v49, %v7890_v55 }
 0x733   : > { %4970 = vrcp.f32 %v3427_v48 }
 0x734   : > { %3769 = vrot.lane.b32.xlu2 %v3736_v39, %s5160_s18  ;;  %4972 = vrcp.f32 %v3460_v11 }
 0x738   : > { %v3838_v18 = vld [vmem:[#allocation2 + $0x38] sm:$0xff]  ;;  %v3780_v25 = vpop.permute.xlu1 %3779 }
 0x739   : > { %v4971_v24 = vpop.eup %4970  ;;  %3870 = vst [vmem:[%s7544_s29 + $0x38] sm:$0xff] %v3838_v18 }
 0x73a   : > { %3821 = vst.msk [vmem:[#allocation2 + $0x68] sm:$0xff] %vm2046_vm1, %v3780_v25  ;;  %v3436_v59 = vpop.xlane.xlu0 %3435  ;;  %v3739_v5 = vmul.f32 %v4971_v24, %v7944_v30  ;;  %v4973_v0 = vpop.eup %4972  ;;  %v3702_v30 = vadd.f32 %v7998_v62, %v7995_v16 }
 0x73b   : > { %4974 = vrcp.f32 %v3436_v59 }
 0x73c   : > { %3775 = vrot.lane.b32.xlu2 %v3739_v5, %s5160_s18 }
 0x73d   : > { %v3651_v34 = vpop.f32.mrf.mxu2 }
 0x73e   : > { %v3716_v55 = vpop.f32.mrf.mxu3 }
 0x73f   : > { %v3717_v1 = vadd.f32 %v3716_v55, %v3651_v34 }
 0x740   : > { %v3786_v26 = vpop.permute.xlu1 %3785 }
 0x741   : > { %v4975_v9 = vpop.eup %4974  ;;  %v3844_v47 = vld [vmem:[#allocation2 + $0x68] sm:$0xff]  ;;  %v3750_v20 = vmul.f32 %v4973_v0, %v3717_v1  ;;  %3824 = vst.msk [vmem:[#allocation2 + $0x98] sm:$0xff] %vm2046_vm1, %v3786_v26 }
 0x742   : > { %3876 = vst [vmem:[%s7544_s29 + $0x68] sm:$0xff] %v3844_v47  ;;  %v3445_v32 = vpop.xlane.xlu0 %3444  ;;  %v3742_v19 = vmul.f32 %v4975_v9, %v7975_v54  ;;  %v3710_v54 = vpop.f32.mrf.mxu1 }
 0x743   : > { %4976 = vrcp.f32 %v3445_v32  ;;  %3797 = vrot.lane.b32.xlu1 %v3750_v20, %s5160_s18  ;;  %v3711_v50 = vadd.f32 %v3710_v54, %v3645_v14 }
 0x744   : > { %3781 = vrot.lane.b32.xlu2 %v3742_v19, %s5160_s18 }
 0x748   : > { %v3850_v38 = vld [vmem:[#allocation2 + $0x98] sm:$0xff] }
 0x749   : > { %v4977_v2 = vpop.eup %4976  ;;  %3882 = vst [vmem:[%s7544_s29 + $0x98] sm:$0xff] %v3850_v38 }
 0x74a   : > { %v3454_v8 = vpop.xlane.xlu0 %3453  ;;  %v3745_v3 = vmul.f32 %v4977_v2, %v3702_v30 }
 0x74b   : > { %4978 = vrcp.f32 %v3454_v8 }
 0x74c   : > { %3787 = vrot.lane.b32.xlu2 %v3745_v3, %s5160_s18 }
 0x751   : > { %v4979_v45 = vpop.eup %4978 }
 0x752   : > { %v3748_v21 = vmul.f32 %v4979_v45, %v3711_v50 }
 0x754   : > { %3793 = vrot.lane.b32.xlu2 %v3748_v21, %s5160_s18 }
 0x75d   : > { %v3772_v13 = vpop.permute.xlu0 %3771 }
 0x75e   : > { %3817 = vst.msk [vmem:[#allocation2 + $0x28] sm:$0xff] %vm2046_vm1, %v3772_v13 }
 0x765   : > { %v3836_v16 = vld [vmem:[#allocation2 + $0x28] sm:$0xff]  ;;  %v3778_v62 = vpop.permute.xlu0 %3777 }
 0x766   : > { %3868 = vst [vmem:[%s7544_s29 + $0x28] sm:$0xff] %v3836_v16 }
 0x767   : > { %3820 = vst.msk [vmem:[#allocation2 + $0x58] sm:$0xff] %vm2046_vm1, %v3778_v62 }
 0x76d   : > { %v3784_v37 = vpop.permute.xlu0 %3783 }
 0x76e   : > { %v3842_v61 = vld [vmem:[#allocation2 + $0x58] sm:$0xff]  ;;  %3823 = vst.msk [vmem:[#allocation2 + $0x88] sm:$0xff] %vm2046_vm1, %v3784_v37 }
 0x76f   : > { %3874 = vst [vmem:[%s7544_s29 + $0x58] sm:$0xff] %v3842_v61 }
 0x771   : > { %v3792_v23 = vpop.permute.xlu1 %3791 }
 0x772   : > { %3827 = vst.msk [vmem:[#allocation2 + $0xc8] sm:$0xff] %vm2046_vm1, %v3792_v23 }
 0x775   : > { %v3848_v28 = vld [vmem:[#allocation2 + $0x88] sm:$0xff]  ;;  %v3790_v63 = vpop.permute.xlu0 %3789 }
 0x776   : > { %3880 = vst [vmem:[%s7544_s29 + $0x88] sm:$0xff] %v3848_v28 }
 0x777   : > { %3826 = vst.msk [vmem:[#allocation2 + $0xb8] sm:$0xff] %vm2046_vm1, %v3790_v63 }
 0x779   : > { %v3856_v15 = vld [vmem:[#allocation2 + $0xc8] sm:$0xff] }
 0x77a   : > { %3888 = vst [vmem:[%s7544_s29 + $0xc8] sm:$0xff] %v3856_v15 }
 0x77d   : > { %v3796_v53 = vpop.permute.xlu0 %3795 }
 0x77e   : > { %v3854_v33 = vld [vmem:[#allocation2 + $0xb8] sm:$0xff]  ;;  %3829 = vst.msk [vmem:[#allocation2 + $0xe8] sm:$0xff] %vm2046_vm1, %v3796_v53 }
 0x77f   : > { %3886 = vst [vmem:[%s7544_s29 + $0xb8] sm:$0xff] %v3854_v33 }
 0x785   : > { %v3860_v22 = vld [vmem:[#allocation2 + $0xe8] sm:$0xff] }
 0x786   : > { %3892 = vst [vmem:[%s7544_s29 + $0xe8] sm:$0xff] %v3860_v22 }
 0x78e   : > { %v3770_v36 = vpop.permute.xlu2 %3769 }
 0x78f   : > { %3816 = vst.msk [vmem:[#allocation2 + $0x18] sm:$0xff] %vm2046_vm1, %v3770_v36 }
 0x796   : > { %v3834_v27 = vld [vmem:[#allocation2 + $0x18] sm:$0xff]  ;;  %v3776_v58 = vpop.permute.xlu2 %3775 }
 0x797   : > { %3866 = vst [vmem:[%s7544_s29 + $0x18] sm:$0xff] %v3834_v27 }
 0x798   : > { %3819 = vst.msk [vmem:[#allocation2 + $0x48] sm:$0xff] %vm2046_vm1, %v3776_v58 }
 0x79e   : > { %v3782_v40 = vpop.permute.xlu2 %3781 }
 0x79f   : > { %v3840_v43 = vld [vmem:[#allocation2 + $0x48] sm:$0xff]  ;;  %3822 = vst.msk [vmem:[#allocation2 + $0x78] sm:$0xff] %vm2046_vm1, %v3782_v40 }
 0x7a0   : > { %3872 = vst [vmem:[%s7544_s29 + $0x48] sm:$0xff] %v3840_v43 }
 0x7a6   : > { %v3846_v7 = vld [vmem:[#allocation2 + $0x78] sm:$0xff]  ;;  %v3788_v6 = vpop.permute.xlu2 %3787 }
 0x7a7   : > { %3878 = vst [vmem:[%s7544_s29 + $0x78] sm:$0xff] %v3846_v7 }
 0x7a8   : > { %3825 = vst.msk [vmem:[#allocation2 + $0xa8] sm:$0xff] %vm2046_vm1, %v3788_v6 }
 0x7ae   : > { %v3794_v46 = vpop.permute.xlu2 %3793 }
 0x7af   : > { %v3852_v52 = vld [vmem:[#allocation2 + $0xa8] sm:$0xff]  ;;  %3828 = vst.msk [vmem:[#allocation2 + $0xd8] sm:$0xff] %vm2046_vm1, %v3794_v46 }
 0x7b0   : > { %3884 = vst [vmem:[%s7544_s29 + $0xa8] sm:$0xff] %v3852_v52 }
 0x7b5   : > { %v3798_v17 = vpop.permute.xlu1 %3797 }
 0x7b6   : > { %v3858_v41 = vld [vmem:[#allocation2 + $0xd8] sm:$0xff]  ;;  %3830 = vst.msk [vmem:[#allocation2 + $0xf8] sm:$0xff] %vm2046_vm1, %v3798_v17 }
 0x7b7   : > { %3890 = vst [vmem:[%s7544_s29 + $0xd8] sm:$0xff] %v3858_v41 }
 0x7bd   : > { %v3862_v4 = vld [vmem:[#allocation2 + $0xf8] sm:$0xff] }
 0x7be   : > { %3894 = vst [vmem:[%s7544_s29 + $0xf8] sm:$0xff] %v3862_v4 }
 0x7bf   : > { %5097 = shalt.err (!%p5094_p13)
}
 0x7c0   : > { %s5161_s14 = smov 256   ;;  %s5162_s1 = smov 16  }
 0x7c1   : > { %4365 = dma.vmem_to_hbm [thread:$0]  (%p5238_p9), %s3912_s19, 4096, %s3914_s5, %s3896_s30, %s5161_s14, %s5161_s14, %s5162_s1  }
 0x7c2 PF: > { %s3928_s20 = sand.u32 1, %s5136_s12   ;;  %p4378_p0 = pnand %p4047_p12, %p5245_p11 }
 0x7c3   : > { %s3929_s26 = scalar_lea.sflag [#allocation5], %s3928_s20 }
 0x7c4   : > { %p4379_p1 = pneg %p4378_p0 }
 0x7c6   : > { %5131 = dma.done.wait (%p4379_p1), %s3929_s26, 4096  }
 0x7c7   : > { %5133 = vsyncadd (%p4379_p1), %s3929_s26, 4294963200  ;;  %s22_s17 = sadd.s32 1, %s5156_s17   ;;  %s8438_s28 = sld [smem:[#allocation13_spill]] }
 0x7c8   : > { %p19_p2 = scmp.ge.s32.totalorder %s22_s17, 4   ;;  %s8439_s14 = sld [smem:[#allocation15_spill]] }
 0x7c9   : > { %s8440_s25 = sld [smem:[#allocation14_spill]]  ;;  %s8441_s12 = smov %s5140_s13 }
 0x7ca   : > { %s8443_s15 = smov %s5152_s16 }
 0x7cb   :  { %21 = sbr.rel (!%p19_p2) target bundleno = 10 (0xa), region = 101 }
 0x7cd   : > { %s8442_s13 = smov %s8438_s28 }
 0x7cf   : > { %s8444_s16 = smov %s8440_s25 }
 0x7d0   :  { %3935 = vsyncpa [#allocation4], 1 }
 0x7d1   :  { %3937 = vsyncpa [#allocation4 + $0x1], 1 }
 0x7d2   :  { %3938 = vsyncpa [#allocation7], 1 }
 0x7d3   :  { %3940 = vsyncpa [#allocation7 + $0x1], 1 }
 0x7d4   :  { %3941 = vsyncpa [#allocation5], 1 }
 0x7d5   :  { %3943 = vsyncpa [#allocation5 + $0x1], 1 }

</bundles_post_ra>
